<compile_context>
chip_gen: v7x
topology: tpu7x:2x2x1
jax: 0.10.0
libtpu: 0.0.40
codegen_flags: <defaults>
</compile_context>

<pallas_src>
import jax
import jax.numpy as jnp
from jax.experimental import pallas as pl
from jax.experimental.pallas import tpu as pltpu

EPS = 1e-5


def _round_up(v, m):
  return (v + m - 1) // m * m


def _resblock_se_kernel(x_ref, xres_ref,
                        w1_ref, g1_ref, be1_ref,
                        sew1t_ref, sew2t_ref,
                        w2_ref, g2_ref, be2_ref,
                        o_ref, pad_ref):
  N, H, W, Cp = x_ref.shape
  Hp, Wp = H + 2, W + 2
  HW = H * W
  NHW = N * H * W
  inv_nhw = 1.0 / NHW

  # --- zero ONLY the halo of the pad scratch (interior is overwritten before
  # --- every conv reads it); four lane-dense (Cp = 128) stores, done once ---
  pad_ref[:, 0:1, :, :] = jnp.zeros((N, 1, Wp, Cp), jnp.float32)
  pad_ref[:, Hp - 1:Hp, :, :] = jnp.zeros((N, 1, Wp, Cp), jnp.float32)
  pad_ref[:, 1:H + 1, 0:1, :] = jnp.zeros((N, H, 1, Cp), jnp.float32)
  pad_ref[:, 1:H + 1, Wp - 1:Wp, :] = jnp.zeros((N, H, 1, Cp), jnp.float32)

  def conv3x3(w_ref):
    """3x3 'same' conv from pad_ref as ONE im2col matmul (bf16 in, f32 acc)."""
    taps = []
    for dy in range(3):
      for dx in range(3):
        taps.append(
            pad_ref[:, dy:dy + H, dx:dx + W, :]
            .reshape(NHW, Cp).astype(jnp.bfloat16))
    tapmat = jnp.concatenate(taps, axis=-1)                 # (NHW, 9*Cp) bf16
    return jnp.dot(tapmat, w_ref[...],
                   preferred_element_type=jnp.float32)      # (NHW, Cp) f32

  def bn(h, gamma_row, beta_row):
    """Training-mode BN, single pass; fused scale/offset FMA on (NHW, Cp)."""
    s1 = jnp.sum(h, axis=0, keepdims=True)
    s2 = jnp.sum(h * h, axis=0, keepdims=True)
    mean = s1 * inv_nhw
    var = jnp.maximum(s2 * inv_nhw - mean * mean, 0.0)      # biased, clamped
    scale = gamma_row * jax.lax.rsqrt(var + EPS)
    offset = beta_row - mean * scale
    return h * scale + offset

  # ---- conv1 -> BN1 (conv bias is a no-op under train-mode BN: dropped) ----
  pad_ref[:, 1:H + 1, 1:W + 1, :] = x_ref[...].astype(jnp.float32)
  h1 = bn(conv3x3(w1_ref), g1_ref[...], be1_ref[...])       # (NHW, Cp) f32

  # ---- SE: GAP -> FC -> ReLU -> FC -> sigmoid -> per-(sample,channel) scale
  gap = jnp.mean(h1.reshape(N, HW, Cp), axis=1)             # (N, Cp)
  z = jnp.maximum(
      jnp.dot(gap, sew1t_ref[...], preferred_element_type=jnp.float32), 0.0)
  s = jax.nn.sigmoid(
      jnp.dot(z, sew2t_ref[...], preferred_element_type=jnp.float32))
  h1 = (h1.reshape(N, HW, Cp) * s[:, None, :]).reshape(NHW, Cp)

  # ---- conv2 -> BN2 -> + residual (lane-dense output store) ---------------
  pad_ref[:, 1:H + 1, 1:W + 1, :] = h1.reshape(N, H, W, Cp)
  h2 = bn(conv3x3(w2_ref), g2_ref[...], be2_ref[...])       # (NHW, Cp) f32
  o_ref[...] = h2 + xres_ref[...]


def resblock_with_se(x_nchw, params):
  """Wrapper: NCHW in / NCHW out, single Pallas call (whole problem in VMEM)."""
  N, C, H, W = x_nchw.shape
  Cp = _round_up(C, 128)                     # lane-dense channel padding
  Cmid = params['se_w1'].shape[0]
  Cmid_p = _round_up(max(Cmid, 1), 8)

  x = jnp.transpose(x_nchw, (0, 2, 3, 1)).astype(jnp.float32)   # NHWC
  xc = jnp.pad(x, ((0, 0), (0, 0), (0, 0), (0, Cp - C)))        # pad channels
  x_bf16 = xc.astype(jnp.bfloat16)                              # kernel input
  xres = xc.reshape(N * H * W, Cp)                              # f32 residual

  def conv_w(w_oihw):
    # OIHW -> (ky, kx, Cin, Cout), zero-pad channels, -> (9*Cp, Cp) bf16.
    w = jnp.transpose(w_oihw, (2, 3, 1, 0))
    w = jnp.pad(w, ((0, 0), (0, 0), (0, Cp - C), (0, Cp - C)))
    return w.reshape(9 * Cp, Cp).astype(jnp.bfloat16)

  def row(v):
    return jnp.pad(v.astype(jnp.float32), (0, Cp - C)).reshape(1, Cp)

  sew1t = jnp.zeros((Cp, Cmid_p), jnp.float32)
  sew1t = sew1t.at[:C, :Cmid].set(params['se_w1'].T.astype(jnp.float32))
  sew2t = jnp.zeros((Cmid_p, Cp), jnp.float32)
  sew2t = sew2t.at[:Cmid, :C].set(params['se_w2'].T.astype(jnp.float32))

  args = (
      x_bf16, xres,
      conv_w(params['conv1_w']), row(params['bn1_g']), row(params['bn1_b']),
      sew1t, sew2t,
      conv_w(params['conv2_w']), row(params['bn2_g']), row(params['bn2_b']),
  )

  out2d = pl.pallas_call(
      _resblock_se_kernel,
      out_shape=jax.ShapeDtypeStruct((N * H * W, Cp), jnp.float32),
      in_specs=[pl.BlockSpec(memory_space=pltpu.MemorySpace.VMEM)] * len(args),
      out_specs=pl.BlockSpec(memory_space=pltpu.MemorySpace.VMEM),
      scratch_shapes=[pltpu.VMEM((N, H + 2, W + 2, Cp), jnp.float32)],
      input_output_aliases={1: 0},          # xres buffer reused for the output
      compiler_params=pltpu.CompilerParams(vmem_limit_bytes=64 * 1024 * 1024),
  )(*args)

  out_nhwc = out2d[:, :C].reshape(N, H, W, C)
  # TODO(synk): these NCHW<->NHWC transposes only exist to match the PyTorch
  # interface; keep the surrounding graph NHWC to drop them.
  return jnp.transpose(out_nhwc, (0, 3, 1, 2))


def reference(x, p):
  """Pure-JAX NCHW reference mirroring the PyTorch module (train-mode BN)."""
  def conv(v, w, b):
    y = jax.lax.conv_general_dilated(
        v, w, window_strides=(1, 1), padding=((1, 1), (1, 1)),
        dimension_numbers=('NCHW', 'OIHW', 'NCHW'))
    return y + b[None, :, None, None]

  def bn(v, g, be):
    mean = v.mean(axis=(0, 2, 3), keepdims=True)
    var = ((v - mean) ** 2).mean(axis=(0, 2, 3), keepdims=True)
    return (v - mean) * jax.lax.rsqrt(var + EPS) * g[None, :, None, None] \
        + be[None, :, None, None]

  def se(v):
    gap = v.mean(axis=(2, 3))                    # (N, C)
    z = jnp.maximum(gap @ p['se_w1'].T, 0.0)
    s = jax.nn.sigmoid(z @ p['se_w2'].T)
    return v * s[:, :, None, None]

  h = bn(conv(x, p['conv1_w'], p['conv1_b']), p['bn1_g'], p['bn1_b'])
  h = se(h)
  h = bn(conv(h, p['conv2_w'], p['conv2_b']), p['bn2_g'], p['bn2_b'])
  return h + x


def make_params(key, channels, reduction=16):
  cmid = channels // reduction
  ks = jax.random.split(key, 8)
  f32 = jnp.float32
  return {
      'conv1_w': 0.1 * jax.random.normal(ks[0], (channels, channels, 3, 3), f32),
      'conv1_b': 0.1 * jax.random.normal(ks[1], (channels,), f32),
      'bn1_g': 1.0 + 0.1 * jax.random.normal(ks[2], (channels,), f32),
      'bn1_b': 0.1 * jax.random.normal(ks[3], (channels,), f32),
      'se_w1': 0.3 * jax.random.normal(ks[4], (cmid, channels), f32),  # Linear(C, C//r)
      'se_w2': 0.3 * jax.random.normal(ks[5], (channels, cmid), f32),  # Linear(C//r, C)
      'conv2_w': 0.1 * jax.random.normal(ks[6], (channels, channels, 3, 3), f32),
      'conv2_b': 0.1 * jax.random.normal(ks[7], (channels,), f32),
      'bn2_g': jnp.ones((channels,), f32),
      'bn2_b': jnp.zeros((channels,), f32),
  }


if __name__ == "__main__":
  # reduction=16 requires channels >= 16; residual add requires in == out.
  N, C, H, W = 2, 32, 8, 8
  key = jax.random.PRNGKey(0)
  k_x, k_p = jax.random.split(key)
  x = jax.random.normal(k_x, (N, C, H, W), jnp.float32)
  params = make_params(k_p, C, reduction=16)

  out = jax.jit(resblock_with_se)(x, params)
  out = jax.block_until_ready(out)

  ref = reference(x, params)
  assert out.shape == ref.shape == (N, C, H, W)
  assert jnp.all(jnp.isfinite(out))
  # Conv matmul inputs are bf16 (f32 accumulation); BN stats / SE / residual
  # stay f32 -> tolerance loosened vs. a pure-f32 implementation.
  assert jnp.allclose(out, ref, atol=5e-2, rtol=5e-2), \
      float(jnp.max(jnp.abs(out - ref)))

  print("KERNEL_OK")
</pallas_src>

<mosaic_0001>
module attributes {stable_mosaic.version = 11 : i64} {
  func.func @_resblock_se_kernel(%arg0: memref<2x8x8x128xbf16, #tpu.memory_space<vmem>>, %arg1: memref<128x128xf32, #tpu.memory_space<vmem>>, %arg2: memref<1152x128xbf16, #tpu.memory_space<vmem>>, %arg3: memref<1x128xf32, #tpu.memory_space<vmem>>, %arg4: memref<1x128xf32, #tpu.memory_space<vmem>>, %arg5: memref<128x8xf32, #tpu.memory_space<vmem>>, %arg6: memref<8x128xf32, #tpu.memory_space<vmem>>, %arg7: memref<1152x128xbf16, #tpu.memory_space<vmem>>, %arg8: memref<1x128xf32, #tpu.memory_space<vmem>>, %arg9: memref<1x128xf32, #tpu.memory_space<vmem>>, %arg10: memref<128x128xf32, #tpu.memory_space<vmem>>, %arg11: memref<2x10x10x128xf32, #tpu.memory_space<vmem>>) attributes {dimension_semantics = [], scalar_prefetch = 0 : i64, scratch_operands = 1 : i64, tpu.core_type = #tpu.core_type<tc>} {
    %cst = arith.constant 0.000000e+00 : f32
    %0 = vector.broadcast %cst : f32 to vector<2x1x10x128xf32>
    %c0 = arith.constant 0 : index
    %c0_0 = arith.constant 0 : index
    %c0_1 = arith.constant 0 : index
    %c0_2 = arith.constant 0 : index
    %1 = vector.load %arg11[%c0, %c0_0, %c0_1, %c0_2] : memref<2x10x10x128xf32, #tpu.memory_space<vmem>>, vector<2x1x10x128xf32>
    tpu.vector_store %arg11[%c0, %c0_0, %c0_1, %c0_2], %0 {strides = array<i32>} : memref<2x10x10x128xf32, #tpu.memory_space<vmem>>, vector<2x1x10x128xf32>,
    %cst_3 = arith.constant 0.000000e+00 : f32
    %2 = vector.broadcast %cst_3 : f32 to vector<2x1x10x128xf32>
    %c0_4 = arith.constant 0 : index
    %c9 = arith.constant 9 : index
    %c0_5 = arith.constant 0 : index
    %c0_6 = arith.constant 0 : index
    %3 = vector.load %arg11[%c0_4, %c9, %c0_5, %c0_6] : memref<2x10x10x128xf32, #tpu.memory_space<vmem>>, vector<2x1x10x128xf32>
    tpu.vector_store %arg11[%c0_4, %c9, %c0_5, %c0_6], %2 {strides = array<i32>} : memref<2x10x10x128xf32, #tpu.memory_space<vmem>>, vector<2x1x10x128xf32>,
    %cst_7 = arith.constant 0.000000e+00 : f32
    %4 = vector.broadcast %cst_7 : f32 to vector<2x8x1x128xf32>
    %c0_8 = arith.constant 0 : index
    %c1 = arith.constant 1 : index
    %c0_9 = arith.constant 0 : index
    %c0_10 = arith.constant 0 : index
    %5 = vector.load %arg11[%c0_8, %c1, %c0_9, %c0_10] : memref<2x10x10x128xf32, #tpu.memory_space<vmem>>, vector<2x8x1x128xf32>
    tpu.vector_store %arg11[%c0_8, %c1, %c0_9, %c0_10], %4 {strides = array<i32>} : memref<2x10x10x128xf32, #tpu.memory_space<vmem>>, vector<2x8x1x128xf32>,
    %cst_11 = arith.constant 0.000000e+00 : f32
    %6 = vector.broadcast %cst_11 : f32 to vector<2x8x1x128xf32>
    %c0_12 = arith.constant 0 : index
    %c1_13 = arith.constant 1 : index
    %c9_14 = arith.constant 9 : index
    %c0_15 = arith.constant 0 : index
    %7 = vector.load %arg11[%c0_12, %c1_13, %c9_14, %c0_15] : memref<2x10x10x128xf32, #tpu.memory_space<vmem>>, vector<2x8x1x128xf32>
    tpu.vector_store %arg11[%c0_12, %c1_13, %c9_14, %c0_15], %6 {strides = array<i32>} : memref<2x10x10x128xf32, #tpu.memory_space<vmem>>, vector<2x8x1x128xf32>,
    %c0_16 = arith.constant 0 : index
    %c0_17 = arith.constant 0 : index
    %c0_18 = arith.constant 0 : index
    %c0_19 = arith.constant 0 : index
    %8 = vector.load %arg0[%c0_16, %c0_17, %c0_18, %c0_19] : memref<2x8x8x128xbf16, #tpu.memory_space<vmem>>, vector<2x8x8x128xbf16>
    %9 = arith.extf %8 : vector<2x8x8x128xbf16> to vector<2x8x8x128xf32>
    %c0_20 = arith.constant 0 : index
    %c1_21 = arith.constant 1 : index
    %c1_22 = arith.constant 1 : index
    %c0_23 = arith.constant 0 : index
    %10 = vector.load %arg11[%c0_20, %c1_21, %c1_22, %c0_23] : memref<2x10x10x128xf32, #tpu.memory_space<vmem>>, vector<2x8x8x128xf32>
    tpu.vector_store %arg11[%c0_20, %c1_21, %c1_22, %c0_23], %9 {strides = array<i32>} : memref<2x10x10x128xf32, #tpu.memory_space<vmem>>, vector<2x8x8x128xf32>,
    %c0_24 = arith.constant 0 : index
    %c0_25 = arith.constant 0 : index
    %c0_26 = arith.constant 0 : index
    %c0_27 = arith.constant 0 : index
    %11 = vector.load %arg11[%c0_24, %c0_25, %c0_26, %c0_27] : memref<2x10x10x128xf32, #tpu.memory_space<vmem>>, vector<2x8x8x128xf32>
    %12 = vector.shape_cast %11 : vector<2x8x8x128xf32> to vector<128x128xf32>
    %13 = arith.truncf %12 : vector<128x128xf32> to vector<128x128xbf16>
    %c0_28 = arith.constant 0 : index
    %c0_29 = arith.constant 0 : index
    %c1_30 = arith.constant 1 : index
    %c0_31 = arith.constant 0 : index
    %14 = vector.load %arg11[%c0_28, %c0_29, %c1_30, %c0_31] : memref<2x10x10x128xf32, #tpu.memory_space<vmem>>, vector<2x8x8x128xf32>
    %15 = vector.shape_cast %14 : vector<2x8x8x128xf32> to vector<128x128xf32>
    %16 = arith.truncf %15 : vector<128x128xf32> to vector<128x128xbf16>
    %c0_32 = arith.constant 0 : index
    %c0_33 = arith.constant 0 : index
    %c2 = arith.constant 2 : index
    %c0_34 = arith.constant 0 : index
    %17 = vector.load %arg11[%c0_32, %c0_33, %c2, %c0_34] : memref<2x10x10x128xf32, #tpu.memory_space<vmem>>, vector<2x8x8x128xf32>
    %18 = vector.shape_cast %17 : vector<2x8x8x128xf32> to vector<128x128xf32>
    %19 = arith.truncf %18 : vector<128x128xf32> to vector<128x128xbf16>
    %c0_35 = arith.constant 0 : index
    %c1_36 = arith.constant 1 : index
    %c0_37 = arith.constant 0 : index
    %c0_38 = arith.constant 0 : index
    %20 = vector.load %arg11[%c0_35, %c1_36, %c0_37, %c0_38] : memref<2x10x10x128xf32, #tpu.memory_space<vmem>>, vector<2x8x8x128xf32>
    %21 = vector.shape_cast %20 : vector<2x8x8x128xf32> to vector<128x128xf32>
    %22 = arith.truncf %21 : vector<128x128xf32> to vector<128x128xbf16>
    %c0_39 = arith.constant 0 : index
    %c1_40 = arith.constant 1 : index
    %c1_41 = arith.constant 1 : index
    %c0_42 = arith.constant 0 : index
    %23 = vector.load %arg11[%c0_39, %c1_40, %c1_41, %c0_42] : memref<2x10x10x128xf32, #tpu.memory_space<vmem>>, vector<2x8x8x128xf32>
    %24 = vector.shape_cast %23 : vector<2x8x8x128xf32> to vector<128x128xf32>
    %25 = arith.truncf %24 : vector<128x128xf32> to vector<128x128xbf16>
    %c0_43 = arith.constant 0 : index
    %c1_44 = arith.constant 1 : index
    %c2_45 = arith.constant 2 : index
    %c0_46 = arith.constant 0 : index
    %26 = vector.load %arg11[%c0_43, %c1_44, %c2_45, %c0_46] : memref<2x10x10x128xf32, #tpu.memory_space<vmem>>, vector<2x8x8x128xf32>
    %27 = vector.shape_cast %26 : vector<2x8x8x128xf32> to vector<128x128xf32>
    %28 = arith.truncf %27 : vector<128x128xf32> to vector<128x128xbf16>
    %c0_47 = arith.constant 0 : index
    %c2_48 = arith.constant 2 : index
    %c0_49 = arith.constant 0 : index
    %c0_50 = arith.constant 0 : index
    %29 = vector.load %arg11[%c0_47, %c2_48, %c0_49, %c0_50] : memref<2x10x10x128xf32, #tpu.memory_space<vmem>>, vector<2x8x8x128xf32>
    %30 = vector.shape_cast %29 : vector<2x8x8x128xf32> to vector<128x128xf32>
    %31 = arith.truncf %30 : vector<128x128xf32> to vector<128x128xbf16>
    %c0_51 = arith.constant 0 : index
    %c2_52 = arith.constant 2 : index
    %c1_53 = arith.constant 1 : index
    %c0_54 = arith.constant 0 : index
    %32 = vector.load %arg11[%c0_51, %c2_52, %c1_53, %c0_54] : memref<2x10x10x128xf32, #tpu.memory_space<vmem>>, vector<2x8x8x128xf32>
    %33 = vector.shape_cast %32 : vector<2x8x8x128xf32> to vector<128x128xf32>
    %34 = arith.truncf %33 : vector<128x128xf32> to vector<128x128xbf16>
    %c0_55 = arith.constant 0 : index
    %c2_56 = arith.constant 2 : index
    %c2_57 = arith.constant 2 : index
    %c0_58 = arith.constant 0 : index
    %35 = vector.load %arg11[%c0_55, %c2_56, %c2_57, %c0_58] : memref<2x10x10x128xf32, #tpu.memory_space<vmem>>, vector<2x8x8x128xf32>
    %36 = vector.shape_cast %35 : vector<2x8x8x128xf32> to vector<128x128xf32>
    %37 = arith.truncf %36 : vector<128x128xf32> to vector<128x128xbf16>
    %38 = tpu.concatenate %13, %16, %19, %22, %25, %28, %31, %34, %37 in 1 : vector<128x128xbf16>, vector<128x128xbf16>, vector<128x128xbf16>, vector<128x128xbf16>, vector<128x128xbf16>, vector<128x128xbf16>, vector<128x128xbf16>, vector<128x128xbf16>, vector<128x128xbf16> -> vector<128x1152xbf16>
    %c0_59 = arith.constant 0 : index
    %c0_60 = arith.constant 0 : index
    %39 = vector.load %arg2[%c0_59, %c0_60] : memref<1152x128xbf16, #tpu.memory_space<vmem>>, vector<1152x128xbf16>
    %cst_61 = arith.constant dense<0.000000e+00> : vector<128x128xf32>
    %40 = tpu.matmul %38, %39, %cst_61 {dimension_numbers = #tpu.dot_dimension_numbers<[1], [0], [0], [1], [0, 0, 1, 1], [], []>} : vector<128x1152xbf16>, vector<1152x128xbf16>, vector<128x128xf32> -> vector<128x128xf32>
    %c0_62 = arith.constant 0 : index
    %c0_63 = arith.constant 0 : index
    %41 = vector.load %arg3[%c0_62, %c0_63] : memref<1x128xf32, #tpu.memory_space<vmem>>, vector<1x128xf32>
    %c0_64 = arith.constant 0 : index
    %c0_65 = arith.constant 0 : index
    %42 = vector.load %arg4[%c0_64, %c0_65] : memref<1x128xf32, #tpu.memory_space<vmem>>, vector<1x128xf32>
    %cst_66 = arith.constant dense<0.000000e+00> : vector<128xf32>
    %43 = vector.multi_reduction <add>, %40, %cst_66 [0] : vector<128x128xf32> to vector<128xf32>
    %44 = vector.shape_cast %43 : vector<128xf32> to vector<1x128xf32>
    %45 = arith.mulf %40, %40 : vector<128x128xf32>
    %cst_67 = arith.constant dense<0.000000e+00> : vector<128xf32>
    %46 = vector.multi_reduction <add>, %45, %cst_67 [0] : vector<128x128xf32> to vector<128xf32>
    %47 = vector.shape_cast %46 : vector<128xf32> to vector<1x128xf32>
    %cst_68 = arith.constant 7.812500e-03 : f32
    %48 = vector.broadcast %cst_68 : f32 to vector<1x128xf32>
    %49 = arith.mulf %44, %48 : vector<1x128xf32>
    %cst_69 = arith.constant 7.812500e-03 : f32
    %50 = vector.broadcast %cst_69 : f32 to vector<1x128xf32>
    %51 = arith.mulf %47, %50 : vector<1x128xf32>
    %52 = arith.mulf %49, %49 : vector<1x128xf32>
    %53 = arith.subf %51, %52 : vector<1x128xf32>
    %cst_70 = arith.constant 0.000000e+00 : f32
    %54 = vector.broadcast %cst_70 : f32 to vector<1x128xf32>
    %55 = arith.maximumf %53, %54 : vector<1x128xf32>
    %cst_71 = arith.constant 9.99999974E-6 : f32
    %56 = vector.broadcast %cst_71 : f32 to vector<1x128xf32>
    %57 = arith.addf %55, %56 : vector<1x128xf32>
    %58 = math.rsqrt %57 : vector<1x128xf32>
    %59 = arith.mulf %41, %58 : vector<1x128xf32>
    %60 = arith.mulf %49, %59 : vector<1x128xf32>
    %61 = arith.subf %42, %60 : vector<1x128xf32>
    %62 = vector.broadcast %59 : vector<1x128xf32> to vector<128x128xf32>
    %63 = arith.mulf %40, %62 : vector<128x128xf32>
    %64 = vector.broadcast %61 : vector<1x128xf32> to vector<128x128xf32>
    %65 = arith.addf %63, %64 : vector<128x128xf32>
    %66 = vector.shape_cast %65 : vector<128x128xf32> to vector<2x64x128xf32>
    %cst_72 = arith.constant dense<0.000000e+00> : vector<2x128xf32>
    %67 = vector.multi_reduction <add>, %66, %cst_72 [1] : vector<2x64x128xf32> to vector<2x128xf32>
    %cst_73 = arith.constant 6.400000e+01 : f32
    %68 = vector.broadcast %cst_73 : f32 to vector<2x128xf32>
    %69 = arith.divf %67, %68 : vector<2x128xf32>
    %c0_74 = arith.constant 0 : index
    %c0_75 = arith.constant 0 : index
    %70 = vector.load %arg5[%c0_74, %c0_75] : memref<128x8xf32, #tpu.memory_space<vmem>>, vector<128x8xf32>
    %cst_76 = arith.constant dense<0.000000e+00> : vector<2x8xf32>
    %71 = tpu.matmul %69, %70, %cst_76 {dimension_numbers = #tpu.dot_dimension_numbers<[1], [0], [0], [1], [0, 0, 1, 1], [], []>} : vector<2x128xf32>, vector<128x8xf32>, vector<2x8xf32> -> vector<2x8xf32>
    %cst_77 = arith.constant 0.000000e+00 : f32
    %72 = vector.broadcast %cst_77 : f32 to vector<2x8xf32>
    %73 = arith.maximumf %71, %72 : vector<2x8xf32>
    %c0_78 = arith.constant 0 : index
    %c0_79 = arith.constant 0 : index
    %74 = vector.load %arg6[%c0_78, %c0_79] : memref<8x128xf32, #tpu.memory_space<vmem>>, vector<8x128xf32>
    %cst_80 = arith.constant dense<0.000000e+00> : vector<2x128xf32>
    %75 = tpu.matmul %73, %74, %cst_80 {dimension_numbers = #tpu.dot_dimension_numbers<[1], [0], [0], [1], [0, 0, 1, 1], [], []>} : vector<2x8xf32>, vector<8x128xf32>, vector<2x128xf32> -> vector<2x128xf32>
    %76 = arith.negf %75 : vector<2x128xf32>
    %77 = math.exp %76 : vector<2x128xf32>
    %cst_81 = arith.constant 1.000000e+00 : f32
    %78 = vector.broadcast %cst_81 : f32 to vector<2x128xf32>
    %79 = arith.addf %78, %77 : vector<2x128xf32>
    %80 = arith.divf %78, %79 : vector<2x128xf32>
    %81 = vector.shape_cast %65 : vector<128x128xf32> to vector<2x64x128xf32>
    %82 = vector.shape_cast %80 : vector<2x128xf32> to vector<2x1x128xf32>
    %83 = vector.broadcast %82 : vector<2x1x128xf32> to vector<2x64x128xf32>
    %84 = arith.mulf %81, %83 : vector<2x64x128xf32>
    %85 = vector.shape_cast %84 : vector<2x64x128xf32> to vector<128x128xf32>
    %86 = vector.shape_cast %85 : vector<128x128xf32> to vector<2x8x8x128xf32>
    %c0_82 = arith.constant 0 : index
    %c1_83 = arith.constant 1 : index
    %c1_84 = arith.constant 1 : index
    %c0_85 = arith.constant 0 : index
    %87 = vector.load %arg11[%c0_82, %c1_83, %c1_84, %c0_85] : memref<2x10x10x128xf32, #tpu.memory_space<vmem>>, vector<2x8x8x128xf32>
    tpu.vector_store %arg11[%c0_82, %c1_83, %c1_84, %c0_85], %86 {strides = array<i32>} : memref<2x10x10x128xf32, #tpu.memory_space<vmem>>, vector<2x8x8x128xf32>,
    %c0_86 = arith.constant 0 : index
    %c0_87 = arith.constant 0 : index
    %c0_88 = arith.constant 0 : index
    %c0_89 = arith.constant 0 : index
    %88 = vector.load %arg11[%c0_86, %c0_87, %c0_88, %c0_89] : memref<2x10x10x128xf32, #tpu.memory_space<vmem>>, vector<2x8x8x128xf32>
    %89 = vector.shape_cast %88 : vector<2x8x8x128xf32> to vector<128x128xf32>
    %90 = arith.truncf %89 : vector<128x128xf32> to vector<128x128xbf16>
    %c0_90 = arith.constant 0 : index
    %c0_91 = arith.constant 0 : index
    %c1_92 = arith.constant 1 : index
    %c0_93 = arith.constant 0 : index
    %91 = vector.load %arg11[%c0_90, %c0_91, %c1_92, %c0_93] : memref<2x10x10x128xf32, #tpu.memory_space<vmem>>, vector<2x8x8x128xf32>
    %92 = vector.shape_cast %91 : vector<2x8x8x128xf32> to vector<128x128xf32>
    %93 = arith.truncf %92 : vector<128x128xf32> to vector<128x128xbf16>
    %c0_94 = arith.constant 0 : index
    %c0_95 = arith.constant 0 : index
    %c2_96 = arith.constant 2 : index
    %c0_97 = arith.constant 0 : index
    %94 = vector.load %arg11[%c0_94, %c0_95, %c2_96, %c0_97] : memref<2x10x10x128xf32, #tpu.memory_space<vmem>>, vector<2x8x8x128xf32>
    %95 = vector.shape_cast %94 : vector<2x8x8x128xf32> to vector<128x128xf32>
    %96 = arith.truncf %95 : vector<128x128xf32> to vector<128x128xbf16>
    %c0_98 = arith.constant 0 : index
    %c1_99 = arith.constant 1 : index
    %c0_100 = arith.constant 0 : index
    %c0_101 = arith.constant 0 : index
    %97 = vector.load %arg11[%c0_98, %c1_99, %c0_100, %c0_101] : memref<2x10x10x128xf32, #tpu.memory_space<vmem>>, vector<2x8x8x128xf32>
    %98 = vector.shape_cast %97 : vector<2x8x8x128xf32> to vector<128x128xf32>
    %99 = arith.truncf %98 : vector<128x128xf32> to vector<128x128xbf16>
    %c0_102 = arith.constant 0 : index
    %c1_103 = arith.constant 1 : index
    %c1_104 = arith.constant 1 : index
    %c0_105 = arith.constant 0 : index
    %100 = vector.load %arg11[%c0_102, %c1_103, %c1_104, %c0_105] : memref<2x10x10x128xf32, #tpu.memory_space<vmem>>, vector<2x8x8x128xf32>
    %101 = vector.shape_cast %100 : vector<2x8x8x128xf32> to vector<128x128xf32>
    %102 = arith.truncf %101 : vector<128x128xf32> to vector<128x128xbf16>
    %c0_106 = arith.constant 0 : index
    %c1_107 = arith.constant 1 : index
    %c2_108 = arith.constant 2 : index
    %c0_109 = arith.constant 0 : index
    %103 = vector.load %arg11[%c0_106, %c1_107, %c2_108, %c0_109] : memref<2x10x10x128xf32, #tpu.memory_space<vmem>>, vector<2x8x8x128xf32>
    %104 = vector.shape_cast %103 : vector<2x8x8x128xf32> to vector<128x128xf32>
    %105 = arith.truncf %104 : vector<128x128xf32> to vector<128x128xbf16>
    %c0_110 = arith.constant 0 : index
    %c2_111 = arith.constant 2 : index
    %c0_112 = arith.constant 0 : index
    %c0_113 = arith.constant 0 : index
    %106 = vector.load %arg11[%c0_110, %c2_111, %c0_112, %c0_113] : memref<2x10x10x128xf32, #tpu.memory_space<vmem>>, vector<2x8x8x128xf32>
    %107 = vector.shape_cast %106 : vector<2x8x8x128xf32> to vector<128x128xf32>
    %108 = arith.truncf %107 : vector<128x128xf32> to vector<128x128xbf16>
    %c0_114 = arith.constant 0 : index
    %c2_115 = arith.constant 2 : index
    %c1_116 = arith.constant 1 : index
    %c0_117 = arith.constant 0 : index
    %109 = vector.load %arg11[%c0_114, %c2_115, %c1_116, %c0_117] : memref<2x10x10x128xf32, #tpu.memory_space<vmem>>, vector<2x8x8x128xf32>
    %110 = vector.shape_cast %109 : vector<2x8x8x128xf32> to vector<128x128xf32>
    %111 = arith.truncf %110 : vector<128x128xf32> to vector<128x128xbf16>
    %c0_118 = arith.constant 0 : index
    %c2_119 = arith.constant 2 : index
    %c2_120 = arith.constant 2 : index
    %c0_121 = arith.constant 0 : index
    %112 = vector.load %arg11[%c0_118, %c2_119, %c2_120, %c0_121] : memref<2x10x10x128xf32, #tpu.memory_space<vmem>>, vector<2x8x8x128xf32>
    %113 = vector.shape_cast %112 : vector<2x8x8x128xf32> to vector<128x128xf32>
    %114 = arith.truncf %113 : vector<128x128xf32> to vector<128x128xbf16>
    %115 = tpu.concatenate %90, %93, %96, %99, %102, %105, %108, %111, %114 in 1 : vector<128x128xbf16>, vector<128x128xbf16>, vector<128x128xbf16>, vector<128x128xbf16>, vector<128x128xbf16>, vector<128x128xbf16>, vector<128x128xbf16>, vector<128x128xbf16>, vector<128x128xbf16> -> vector<128x1152xbf16>
    %c0_122 = arith.constant 0 : index
    %c0_123 = arith.constant 0 : index
    %116 = vector.load %arg7[%c0_122, %c0_123] : memref<1152x128xbf16, #tpu.memory_space<vmem>>, vector<1152x128xbf16>
    %cst_124 = arith.constant dense<0.000000e+00> : vector<128x128xf32>
    %117 = tpu.matmul %115, %116, %cst_124 {dimension_numbers = #tpu.dot_dimension_numbers<[1], [0], [0], [1], [0, 0, 1, 1], [], []>} : vector<128x1152xbf16>, vector<1152x128xbf16>, vector<128x128xf32> -> vector<128x128xf32>
    %c0_125 = arith.constant 0 : index
    %c0_126 = arith.constant 0 : index
    %118 = vector.load %arg8[%c0_125, %c0_126] : memref<1x128xf32, #tpu.memory_space<vmem>>, vector<1x128xf32>
    %c0_127 = arith.constant 0 : index
    %c0_128 = arith.constant 0 : index
    %119 = vector.load %arg9[%c0_127, %c0_128] : memref<1x128xf32, #tpu.memory_space<vmem>>, vector<1x128xf32>
    %cst_129 = arith.constant dense<0.000000e+00> : vector<128xf32>
    %120 = vector.multi_reduction <add>, %117, %cst_129 [0] : vector<128x128xf32> to vector<128xf32>
    %121 = vector.shape_cast %120 : vector<128xf32> to vector<1x128xf32>
    %122 = arith.mulf %117, %117 : vector<128x128xf32>
    %cst_130 = arith.constant dense<0.000000e+00> : vector<128xf32>
    %123 = vector.multi_reduction <add>, %122, %cst_130 [0] : vector<128x128xf32> to vector<128xf32>
    %124 = vector.shape_cast %123 : vector<128xf32> to vector<1x128xf32>
    %cst_131 = arith.constant 7.812500e-03 : f32
    %125 = vector.broadcast %cst_131 : f32 to vector<1x128xf32>
    %126 = arith.mulf %121, %125 : vector<1x128xf32>
    %cst_132 = arith.constant 7.812500e-03 : f32
    %127 = vector.broadcast %cst_132 : f32 to vector<1x128xf32>
    %128 = arith.mulf %124, %127 : vector<1x128xf32>
    %129 = arith.mulf %126, %126 : vector<1x128xf32>
    %130 = arith.subf %128, %129 : vector<1x128xf32>
    %cst_133 = arith.constant 0.000000e+00 : f32
    %131 = vector.broadcast %cst_133 : f32 to vector<1x128xf32>
    %132 = arith.maximumf %130, %131 : vector<1x128xf32>
    %cst_134 = arith.constant 9.99999974E-6 : f32
    %133 = vector.broadcast %cst_134 : f32 to vector<1x128xf32>
    %134 = arith.addf %132, %133 : vector<1x128xf32>
    %135 = math.rsqrt %134 : vector<1x128xf32>
    %136 = arith.mulf %118, %135 : vector<1x128xf32>
    %137 = arith.mulf %126, %136 : vector<1x128xf32>
    %138 = arith.subf %119, %137 : vector<1x128xf32>
    %139 = vector.broadcast %136 : vector<1x128xf32> to vector<128x128xf32>
    %140 = arith.mulf %117, %139 : vector<128x128xf32>
    %141 = vector.broadcast %138 : vector<1x128xf32> to vector<128x128xf32>
    %142 = arith.addf %140, %141 : vector<128x128xf32>
    %c0_135 = arith.constant 0 : index
    %c0_136 = arith.constant 0 : index
    %143 = vector.load %arg1[%c0_135, %c0_136] : memref<128x128xf32, #tpu.memory_space<vmem>>, vector<128x128xf32>
    %144 = arith.addf %142, %143 : vector<128x128xf32>
    %c0_137 = arith.constant 0 : index
    %c0_138 = arith.constant 0 : index
    %145 = vector.load %arg10[%c0_137, %c0_138] : memref<128x128xf32, #tpu.memory_space<vmem>>, vector<128x128xf32>
    tpu.vector_store %arg10[%c0_137, %c0_138], %144 {strides = array<i32>} : memref<128x128xf32, #tpu.memory_space<vmem>>, vector<128x128xf32>,
    return
  }
}

</mosaic_0001>

<bundles_post_ra>
// kernel: resblock_with_se.1
= control target key start
LH: loop header
LB: loop body
LE: loop exit
PB: predicated region body
PF: predicated region fallthrough
CT: control target
= control target key end

     0   :  { %15 = vsyncpa [#allocation4], 0  ;;  %s5801_s0 = inlined_call_operand.hbm [shape: bf16[2,8,8,128], index: 0, kind: input, shape index: {}]   ;;  %s5802_s1 = inlined_call_operand.hbm [shape: f32[128,128], index: 1, kind: input, shape index: {}, may-alias: {1,10}]   ;;  %s5803_s2 = inlined_call_operand.hbm [shape: bf16[1152,128], index: 2, kind: input, shape index: {}]   ;;  %s5804_s3 = inlined_call_operand.hbm [shape: f32[1,128], index: 3, kind: input, shape index: {}]   ;;  %s5805_s4 = inlined_call_operand.hbm [shape: f32[1,128], index: 4, kind: input, shape index: {}]   ;;  %s5806_s5 = inlined_call_operand.hbm [shape: f32[128,8], index: 5, kind: input, shape index: {}]   ;;  %s5807_s6 = inlined_call_operand.hbm [shape: f32[8,128], index: 6, kind: input, shape index: {}]   ;;  %s5808_s7 = inlined_call_operand.hbm [shape: bf16[1152,128], index: 7, kind: input, shape index: {}]   ;;  %s5809_s8 = inlined_call_operand.hbm [shape: f32[1,128], index: 8, kind: input, shape index: {}]   ;;  %s5810_s9 = inlined_call_operand.hbm [shape: f32[1,128], index: 9, kind: input, shape index: {}]   ;;  %s5811_s10 = inlined_call_operand.hbm [shape: f32[128,128], index: 10, kind: output, shape index: {}, may-alias: {1,10}]  }
   0x1   :  { %16 = vsyncpa [#allocation7], 0 }
   0x2   :  { %17 = vsyncpa [#allocation10], 0 }
   0x3   :  { %18 = vsyncpa [#allocation13], 0 }
   0x4   :  { %19 = vsyncpa [#allocation16], 0 }
   0x5   :  { %20 = vsyncpa [#allocation19], 0 }
   0x6   :  { %21 = vsyncpa [#allocation5], 0  ;;  %s4708_s13 = smov [#allocation6]   ;;  %s4452_s17 = scalar_lea.hbm %s5802_s1, 2048 }
   0x7   :  { %s39_s14 = sshll.u32 %s4708_s13, 4  ;;  %p4453_p0 = scmp.ne.s32.totalorder %s5802_s1, %s4452_s17  ;;  %s40_s14 = int_to_ptr.vmem [resolvable:$true] %s39_s14 }
   0x8   :  { %p4456_p1 = scmp.lt.u32.totalorder %s4452_s17, %s5802_s1 }
   0xa   :  { %p4458_p2 = pnand %p4456_p1, %p4453_p0 }
   0xc   :  { %4461 = shalt.err (!%p4458_p2)
}
   0xd   :  { %s4462_s22 = scalar_lea.vmem %s40_s14, 2048  ;;  %p4467_p4 = scmp.lt.s32.totalorder %s40_s14, %s40_s14 }
   0xe   :  { %p4463_p3 = scmp.ne.s32.totalorder %s40_s14, %s4462_s22  ;;  %p4468_p5 = scmp.lt.s32.totalorder %s4462_s22, %s4462_s22 }
  0x10   :  { %p4469_p6 = por %p4468_p5, %p4467_p4 }
  0x12   :  { %p4470_p7 = pnand %p4469_p6, %p4463_p3 }
  0x14   :  { %4473 = shalt.err (!%p4470_p7)
}
  0x15   :  { %s4709_s23 = smov 128   ;;  %s4710_s24 = smov 8  }
  0x16   :  { %45 = dma.hbm_to_vmem [thread:$0]  %s5802_s1, 2048, %s40_s14, [#allocation7], %s4709_s23, %s4709_s23, %s4710_s24  }
  0x17   :  { %s4711_s27 = smov [#allocation9]   ;;  %s4712_s29 = smov [#allocation12]  }
  0x18   :  { %s64_s28 = sshll.u32 %s4711_s27, 4  ;;  %s83_s30 = sshll.u32 %s4712_s29, 4  ;;  %s65_s28 = int_to_ptr.vmem [resolvable:$true] %s64_s28  ;;  %s84_s30 = int_to_ptr.vmem [resolvable:$true] %s83_s30 }
  0x19   :  { %s4474_s13 = scalar_lea.hbm %s5804_s3, 16 }
  0x1a   :  { %p4475_p8 = scmp.ne.s32.totalorder %s5804_s3, %s4474_s13  ;;  %p4478_p9 = scmp.lt.u32.totalorder %s4474_s13, %s5804_s3 }
  0x1c   :  { %p4480_p10 = pnand %p4478_p9, %p4475_p8 }
  0x1e   :  { %4483 = shalt.err (!%p4480_p10)
}
  0x1f   :  { %s4484_s1 = scalar_lea.vmem %s65_s28, 16  ;;  %s4488_s14 = scalar_lea.vmem %s65_s28, 32 }
  0x20   :  { %p4485_p11 = scmp.ne.s32.totalorder %s65_s28, %s4484_s1  ;;  %p4489_p12 = scmp.lt.s32.totalorder %s65_s28, %s65_s28 }
  0x21   :  { %p4490_p13 = scmp.lt.s32.totalorder %s4488_s14, %s4484_s1 }
  0x23   :  { %p4491_p0 = por %p4490_p13, %p4489_p12 }
  0x25   :  { %p4492_p1 = pnand %p4491_p0, %p4485_p11 }
  0x27   :  { %4495 = shalt.err (!%p4492_p1)
}
  0x28   :  { %67 = dma.hbm_to_vmem [thread:$0]  %s5804_s3, 16, %s65_s28, [#allocation10]  }
  0x29   :  { %s4496_s25 = scalar_lea.hbm %s5806_s5, 2048 }
  0x2a   :  { %p4497_p2 = scmp.ne.s32.totalorder %s5806_s5, %s4496_s25  ;;  %p4500_p3 = scmp.lt.u32.totalorder %s4496_s25, %s5806_s5 }
  0x2c   :  { %p4502_p4 = pnand %p4500_p3, %p4497_p2 }
  0x2e   :  { %4505 = shalt.err (!%p4502_p4)
}
  0x2f   :  { %s4506_s12 = scalar_lea.vmem %s84_s30, 2048  ;;  %p4511_p6 = scmp.lt.s32.totalorder %s84_s30, %s84_s30 }
  0x30   :  { %p4507_p5 = scmp.ne.s32.totalorder %s84_s30, %s4506_s12  ;;  %p4512_p7 = scmp.lt.s32.totalorder %s4506_s12, %s4506_s12 }
  0x32   :  { %p4513_p8 = por %p4512_p7, %p4511_p6 }
  0x34   :  { %p4514_p9 = pnand %p4513_p8, %p4507_p5 }
  0x36   :  { %4517 = shalt.err (!%p4514_p9)
}
  0x37   :  { %89 = dma.hbm_to_vmem [thread:$0]  %s5806_s5, 2048, %s84_s30, [#allocation13], %s4709_s23, %s4709_s23, %s4710_s24  }
  0x38   :  { %s4713_s13 = smov [#allocation15]   ;;  %s4714_s16 = smov [#allocation3]  }
  0x39   :  { %s105_s15 = sshll.u32 %s4713_s13, 4  ;;  %s27_s17 = sshll.u32 %s4714_s16, 4  ;;  %s106_s15 = int_to_ptr.vmem [resolvable:$true] %s105_s15  ;;  %s28_s17 = int_to_ptr.vmem [resolvable:$true] %s27_s17 }
  0x3a   :  { %s4518_s14 = scalar_lea.hbm %s5808_s7, 9216 }
  0x3b   :  { %p4519_p10 = scmp.ne.s32.totalorder %s5808_s7, %s4518_s14  ;;  %p4522_p11 = scmp.lt.u32.totalorder %s4518_s14, %s5808_s7 }
  0x3d   :  { %p4524_p12 = pnand %p4522_p11, %p4519_p10 }
  0x3f   :  { %4527 = shalt.err (!%p4524_p12)
}
  0x40   :  { %s4528_s5 = scalar_lea.vmem %s106_s15, 9216  ;;  %p4533_p0 = scmp.lt.s32.totalorder %s106_s15, %s106_s15 }
  0x41   :  { %p4529_p13 = scmp.ne.s32.totalorder %s106_s15, %s4528_s5  ;;  %p4534_p1 = scmp.lt.s32.totalorder %s4528_s5, %s4528_s5 }
  0x43   :  { %p4535_p2 = por %p4534_p1, %p4533_p0 }
  0x45   :  { %p4536_p3 = pnand %p4535_p2, %p4529_p13 }
  0x47   :  { %4539 = shalt.err (!%p4536_p3)
}
  0x48   :  { %s4715_s30 = smov 64   ;;  %s4716_s25 = smov 4  }
  0x49   :  { %111 = dma.hbm_to_vmem [thread:$0]  %s5808_s7, 9216, %s106_s15, [#allocation16], %s4715_s30, %s4715_s30, %s4716_s25  }
  0x4a   :  { %s4540_s12 = scalar_lea.hbm %s5801_s0, 1024 }
  0x4b   :  { %p4541_p4 = scmp.ne.s32.totalorder %s5801_s0, %s4540_s12  ;;  %p4544_p5 = scmp.lt.u32.totalorder %s4540_s12, %s5801_s0 }
  0x4d   :  { %p4546_p6 = pnand %p4544_p5, %p4541_p4 }
  0x4f   :  { %4549 = shalt.err (!%p4546_p6)
}
  0x50   :  { %s4550_s18 = scalar_lea.vmem %s28_s17, 1024  ;;  %p4555_p8 = scmp.lt.s32.totalorder %s28_s17, %s28_s17 }
  0x51   :  { %p4551_p7 = scmp.ne.s32.totalorder %s28_s17, %s4550_s18  ;;  %p4556_p9 = scmp.lt.s32.totalorder %s4550_s18, %s4550_s18 }
  0x53   :  { %p4557_p10 = por %p4556_p9, %p4555_p8 }
  0x55   :  { %p4558_p11 = pnand %p4557_p10, %p4551_p7 }
  0x57   :  { %4561 = shalt.err (!%p4558_p11)
}
  0x58   :  { %33 = dma.hbm_to_vmem [thread:$0]  %s5801_s0, 1024, %s28_s17, [#allocation4], %s4715_s30, %s4715_s30, %s4716_s25  }
  0x59   :  { %s4717_s1 = smov [#allocation8]   ;;  %s4718_s19 = smov [#allocation11]  }
  0x5a   :  { %s51_s14 = sshll.u32 %s4717_s1, 4  ;;  %s74_s20 = sshll.u32 %s4718_s19, 4  ;;  %s52_s14 = int_to_ptr.vmem [resolvable:$true] %s51_s14  ;;  %s75_s20 = int_to_ptr.vmem [resolvable:$true] %s74_s20 }
  0x5b   :  { %s4562_s5 = scalar_lea.hbm %s5803_s2, 9216 }
  0x5c   :  { %p4563_p12 = scmp.ne.s32.totalorder %s5803_s2, %s4562_s5  ;;  %p4566_p13 = scmp.lt.u32.totalorder %s4562_s5, %s5803_s2 }
  0x5e   :  { %p4568_p0 = pnand %p4566_p13, %p4563_p12 }
  0x60   :  { %4571 = shalt.err (!%p4568_p0)
}
  0x61   :  { %s4572_s0 = scalar_lea.vmem %s52_s14, 9216  ;;  %p4577_p2 = scmp.lt.s32.totalorder %s52_s14, %s52_s14 }
  0x62   :  { %p4573_p1 = scmp.ne.s32.totalorder %s52_s14, %s4572_s0  ;;  %p4578_p3 = scmp.lt.s32.totalorder %s4572_s0, %s4572_s0 }
  0x64   :  { %p4579_p4 = por %p4578_p3, %p4577_p2 }
  0x66   :  { %p4580_p5 = pnand %p4579_p4, %p4573_p1 }
  0x68   :  { %4583 = shalt.err (!%p4580_p5)
}
  0x69   :  { %57 = dma.hbm_to_vmem [thread:$0]  %s5803_s2, 9216, %s52_s14, [#allocation7], %s4715_s30, %s4715_s30, %s4716_s25  }
  0x6a   :  { %s4584_s13 = scalar_lea.hbm %s5805_s4, 16 }
  0x6b   :  { %p4585_p6 = scmp.ne.s32.totalorder %s5805_s4, %s4584_s13  ;;  %p4588_p7 = scmp.lt.u32.totalorder %s4584_s13, %s5805_s4 }
  0x6d   :  { %p4590_p8 = pnand %p4588_p7, %p4585_p6 }
  0x6f   :  { %4593 = shalt.err (!%p4590_p8)
}
  0x70   :  { %s4594_s1 = scalar_lea.vmem %s75_s20, 16  ;;  %s4598_s19 = scalar_lea.vmem %s75_s20, 32 }
  0x71   :  { %p4595_p9 = scmp.ne.s32.totalorder %s75_s20, %s4594_s1  ;;  %p4599_p10 = scmp.lt.s32.totalorder %s75_s20, %s75_s20 }
  0x72   :  { %p4600_p11 = scmp.lt.s32.totalorder %s4598_s19, %s4594_s1 }
  0x74   :  { %p4601_p12 = por %p4600_p11, %p4599_p10 }
  0x76   :  { %p4602_p13 = pnand %p4601_p12, %p4595_p9 }
  0x78   :  { %4605 = shalt.err (!%p4602_p13)
}
  0x79   :  { %77 = dma.hbm_to_vmem [thread:$0]  %s5805_s4, 16, %s75_s20, [#allocation10]  }
  0x7a   :  { %s4719_s25 = smov [#allocation14]   ;;  %s4720_s21 = smov [#allocation17]  }
  0x7b   :  { %s96_s14 = sshll.u32 %s4719_s25, 4  ;;  %s118_s22 = sshll.u32 %s4720_s21, 4  ;;  %s97_s14 = int_to_ptr.vmem [resolvable:$true] %s96_s14  ;;  %s119_s22 = int_to_ptr.vmem [resolvable:$true] %s118_s22 }
  0x7c   :  { %s4606_s27 = scalar_lea.hbm %s5807_s6, 128 }
  0x7d   :  { %p4607_p0 = scmp.ne.s32.totalorder %s5807_s6, %s4606_s27  ;;  %p4610_p1 = scmp.lt.u32.totalorder %s4606_s27, %s5807_s6 }
  0x7f   :  { %p4612_p2 = pnand %p4610_p1, %p4607_p0 }
  0x81   :  { %4615 = shalt.err (!%p4612_p2)
}
  0x82   :  { %s4616_s4 = scalar_lea.vmem %s97_s14, 128  ;;  %p4621_p4 = scmp.lt.s32.totalorder %s97_s14, %s97_s14 }
  0x83   :  { %p4617_p3 = scmp.ne.s32.totalorder %s97_s14, %s4616_s4  ;;  %p4622_p5 = scmp.lt.s32.totalorder %s4616_s4, %s4616_s4 }
  0x85   :  { %p4623_p6 = por %p4622_p5, %p4621_p4 }
  0x87   :  { %p4624_p7 = pnand %p4623_p6, %p4617_p3 }
  0x89   :  { %4627 = shalt.err (!%p4624_p7)
}
  0x8a   :  { %99 = dma.hbm_to_vmem [thread:$0]  %s5807_s6, 128, %s97_s14, [#allocation13]  }
  0x8b   :  { %s4628_s13 = scalar_lea.hbm %s5809_s8, 16 }
  0x8c   :  { %p4629_p8 = scmp.ne.s32.totalorder %s5809_s8, %s4628_s13  ;;  %p4632_p9 = scmp.lt.u32.totalorder %s4628_s13, %s5809_s8 }
  0x8e   :  { %p4634_p10 = pnand %p4632_p9, %p4629_p8 }
  0x90   :  { %4637 = shalt.err (!%p4634_p10)
}
  0x91   :  { %s4638_s1 = scalar_lea.vmem %s119_s22, 16  ;;  %s4642_s19 = scalar_lea.vmem %s119_s22, 32 }
  0x92   :  { %p4639_p11 = scmp.ne.s32.totalorder %s119_s22, %s4638_s1  ;;  %p4643_p12 = scmp.lt.s32.totalorder %s119_s22, %s119_s22 }
  0x93   :  { %p4644_p13 = scmp.lt.s32.totalorder %s4642_s19, %s4638_s1 }
  0x95   :  { %p4645_p0 = por %p4644_p13, %p4643_p12 }
  0x97   :  { %p4646_p1 = pnand %p4645_p0, %p4639_p11 }
  0x99   :  { %4649 = shalt.err (!%p4646_p1)
}
  0x9a   :  { %121 = dma.hbm_to_vmem [thread:$0]  %s5809_s8, 16, %s119_s22, [#allocation16]  }
  0x9b   :  { %s4721_s30 = smov [#allocation18]   ;;  %s4650_s5 = scalar_lea.hbm %s5810_s9, 16 }
  0x9c   :  { %s128_s25 = sshll.u32 %s4721_s30, 4  ;;  %p4651_p2 = scmp.ne.s32.totalorder %s5810_s9, %s4650_s5  ;;  %s129_s25 = int_to_ptr.vmem [resolvable:$true] %s128_s25 }
  0x9d   :  { %p4654_p3 = scmp.lt.u32.totalorder %s4650_s5, %s5810_s9 }
  0x9f   :  { %p4656_p4 = pnand %p4654_p3, %p4651_p2 }
  0xa1   :  { %4659 = shalt.err (!%p4656_p4)
}
  0xa2   :  { %s4660_s0 = scalar_lea.vmem %s129_s25, 16  ;;  %s4664_s8 = scalar_lea.vmem %s129_s25, 32 }
  0xa3   :  { %p4661_p5 = scmp.ne.s32.totalorder %s129_s25, %s4660_s0  ;;  %p4665_p6 = scmp.lt.s32.totalorder %s129_s25, %s129_s25 }
  0xa4   :  { %p4666_p7 = scmp.lt.s32.totalorder %s4664_s8, %s4660_s0 }
  0xa6   :  { %p4667_p8 = por %p4666_p7, %p4665_p6 }
  0xa8   :  { %p4668_p9 = pnand %p4667_p8, %p4661_p5 }
  0xaa   :  { %4671 = shalt.err (!%p4668_p9)
}
  0xab   :  { %131 = dma.hbm_to_vmem [thread:$0]  %s5810_s9, 16, %s129_s25, [#allocation19]  }
  0xac   :  { %4694 = dma.done.wait [#allocation4], 1024  }
  0xad   :  { %4695 = vsyncadd [#allocation4], 4294966272 }
  0xae   :  { %4696 = dma.done.wait [#allocation7], 11264  }
  0xaf   :  { %4697 = vsyncadd [#allocation7], 4294956032 }
  0xb0   :  { %4698 = dma.done.wait [#allocation10], 32  }
  0xb1   :  { %4699 = vsyncadd [#allocation10], 4294967264 }
  0xb2   :  { %4700 = dma.done.wait [#allocation13], 2176  }
  0xb3   :  { %4701 = vsyncadd [#allocation13], 4294965120 }
  0xb4   :  { %4702 = dma.done.wait [#allocation16], 9232  }
  0xb5   :  { %4703 = vsyncadd [#allocation16], 4294958064 }
  0xb6   :  { %4704 = dma.done.wait [#allocation19], 16  }
  0xb7   :  { %4705 = vsyncadd [#allocation19], 4294967280  ;;  %v4722_v0 = vmov 0.0   ;;  %v4284_v1 = vld [vmem:[#allocation8 + $0x40] sm:$0xff]   ;;  %v4288_v5 = vld [vmem:[#allocation8 + $0x48] sm:$0xff]   ;;  %vm4724_vm0 = vmmov 0  }
  0xb8   :  { %163 = vst [vmem:[#allocation2] sm:$0xff] %v4722_v0  ;;  %164 = vst [vmem:[#allocation2 + $0x8] sm:$0x3] %v4722_v0  ;;  %v4285_v2 = vld [vmem:[#allocation8 + $0xc0] sm:$0xff]   ;;  %3558 = vmatprep.subr.bf16.mxu0 %v4284_v1  ;;  %v4289_v6 = vld [vmem:[#allocation8 + $0xc8] sm:$0xff]   ;;  %vm1692_vm1 = vcmask 1041409  }
  0xb9   :  { %165 = vst [vmem:[#allocation2 + $0xa0] sm:$0xff] %v4722_v0  ;;  %166 = vst [vmem:[#allocation2 + $0xa8] sm:$0x3] %v4722_v0  ;;  %v4286_v3 = vld [vmem:[#allocation8] sm:$0xff]   ;;  %3622 = vmatprep.subr.bf16.mxu1 %v4285_v2  ;;  %v4290_v7 = vld [vmem:[#allocation8 + $0x8] sm:$0xff]   ;;  %vm1767_vm2 = vcmask 64512  }
  0xba   :  { %168 = vst [vmem:[#allocation2 + $0x90] sm:$0xff] %v4722_v0  ;;  %169 = vst [vmem:[#allocation2 + $0x98] sm:$0x3] %v4722_v0  ;;  %v4287_v4 = vld [vmem:[#allocation8 + $0x80] sm:$0xff]   ;;  %3559 = vmatpush3.bf16.msra.mxu0 %v4286_v3  ;;  %v4291_v8 = vld [vmem:[#allocation8 + $0x88] sm:$0xff]   ;;  %s4726_s9 = smov [#allocation20]  }
  0xbb   :  { %170 = vst [vmem:[#allocation2 + $0x130] sm:$0xff] %v4722_v0  ;;  %171 = vst [vmem:[#allocation2 + $0x138] sm:$0x3] %v4722_v0  ;;  %3623 = vmatpush3.bf16.msra.mxu1 %v4287_v4  ;;  %3560 = vmatprep.subr.bf16.mxu0 %v4288_v5  ;;  %v4292_v9 = vld [vmem:[#allocation8 + $0x50] sm:$0xff]   ;;  %v4296_v13 = vld [vmem:[#allocation8 + $0x58] sm:$0xff]   ;;  %s3356_s4 = sshll.u32 %s4726_s9, 4  ;;  %s3357_s4 = int_to_ptr.vmem [resolvable:$true] %s3356_s4 }
  0xbc   :  { %173 = vst [vmem:[#allocation2 + $0x10] sm:$0x1] %v4722_v0  ;;  %174 = vst [vmem:[#allocation2 + $0x20] sm:$0x1] %v4722_v0  ;;  %3624 = vmatprep.subr.bf16.mxu1 %v4289_v6  ;;  %v4293_v10 = vld [vmem:[#allocation8 + $0xd0] sm:$0xff]   ;;  %v4297_v14 = vld [vmem:[#allocation8 + $0xd8] sm:$0xff]   ;;  %p4677_p11 = scmp.lt.s32.totalorder %s3357_s4, %s3357_s4 }
  0xbd   :  { %175 = vst [vmem:[#allocation2 + $0x30] sm:$0x1] %v4722_v0  ;;  %176 = vst [vmem:[#allocation2 + $0x40] sm:$0x1] %v4722_v0  ;;  %v4294_v11 = vld [vmem:[#allocation8 + $0x10] sm:$0xff]   ;;  %v4298_v15 = vld [vmem:[#allocation8 + $0x18] sm:$0xff]  }
  0xbe   :  { %177 = vst [vmem:[#allocation2 + $0x50] sm:$0x1] %v4722_v0  ;;  %178 = vst [vmem:[#allocation2 + $0x60] sm:$0x1] %v4722_v0  ;;  %3561 = vmatpush3.bf16.msra.mxu0 %v4290_v7  ;;  %v4295_v12 = vld [vmem:[#allocation8 + $0x90] sm:$0xff]   ;;  %v4299_v16 = vld [vmem:[#allocation8 + $0x98] sm:$0xff]  }
  0xbf   :  { %179 = vst [vmem:[#allocation2 + $0x70] sm:$0x1] %v4722_v0  ;;  %180 = vst [vmem:[#allocation2 + $0x80] sm:$0x1] %v4722_v0  ;;  %3625 = vmatpush3.bf16.msra.mxu1 %v4291_v8  ;;  %3562 = vmatprep.subr.bf16.mxu0 %v4292_v9  ;;  %v4300_v17 = vld [vmem:[#allocation8 + $0x60] sm:$0xff]   ;;  %v4304_v21 = vld [vmem:[#allocation8 + $0x68] sm:$0xff]  }
  0xc0   :  { %181 = vst [vmem:[#allocation2 + $0xb0] sm:$0x1] %v4722_v0  ;;  %182 = vst [vmem:[#allocation2 + $0xc0] sm:$0x1] %v4722_v0  ;;  %3626 = vmatprep.subr.bf16.mxu1 %v4293_v10  ;;  %v4301_v18 = vld [vmem:[#allocation8 + $0xe0] sm:$0xff]   ;;  %v4305_v22 = vld [vmem:[#allocation8 + $0xe8] sm:$0xff]  }
  0xc1   :  { %183 = vst [vmem:[#allocation2 + $0xd0] sm:$0x1] %v4722_v0  ;;  %184 = vst [vmem:[#allocation2 + $0xe0] sm:$0x1] %v4722_v0  ;;  %v4302_v19 = vld [vmem:[#allocation8 + $0x20] sm:$0xff]   ;;  %v4306_v23 = vld [vmem:[#allocation8 + $0x28] sm:$0xff]  }
  0xc2   :  { %185 = vst [vmem:[#allocation2 + $0xf0] sm:$0x1] %v4722_v0  ;;  %186 = vst [vmem:[#allocation2 + $0x100] sm:$0x1] %v4722_v0  ;;  %3563 = vmatpush3.bf16.msra.mxu0 %v4294_v11  ;;  %v4303_v20 = vld [vmem:[#allocation8 + $0xa0] sm:$0xff]   ;;  %v4307_v24 = vld [vmem:[#allocation8 + $0xa8] sm:$0xff]  }
  0xc3   :  { %187 = vst [vmem:[#allocation2 + $0x110] sm:$0x1] %v4722_v0  ;;  %188 = vst [vmem:[#allocation2 + $0x120] sm:$0x1] %v4722_v0  ;;  %3627 = vmatpush3.bf16.msra.mxu1 %v4295_v12  ;;  %3564 = vmatprep.subr.bf16.mxu0 %v4296_v13  ;;  %v4308_v25 = vld [vmem:[#allocation8 + $0x70] sm:$0xff]   ;;  %v4312_v29 = vld [vmem:[#allocation8 + $0x78] sm:$0xff]  }
  0xc4   :  { %189 = vst [vmem:[#allocation2 + $0x19] sm:$0x1] %v4722_v0  ;;  %190 = vst [vmem:[#allocation2 + $0x29] sm:$0x1] %v4722_v0  ;;  %3628 = vmatprep.subr.bf16.mxu1 %v4297_v14  ;;  %v4309_v26 = vld [vmem:[#allocation8 + $0xf0] sm:$0xff]   ;;  %v4313_v30 = vld [vmem:[#allocation8 + $0xf8] sm:$0xff]  }
  0xc5   :  { %191 = vst [vmem:[#allocation2 + $0x39] sm:$0x1] %v4722_v0  ;;  %192 = vst [vmem:[#allocation2 + $0x49] sm:$0x1] %v4722_v0  ;;  %v4310_v27 = vld [vmem:[#allocation8 + $0x30] sm:$0xff]   ;;  %v4314_v31 = vld [vmem:[#allocation8 + $0x38] sm:$0xff]  }
  0xc6   :  { %193 = vst [vmem:[#allocation2 + $0x59] sm:$0x1] %v4722_v0  ;;  %194 = vst [vmem:[#allocation2 + $0x69] sm:$0x1] %v4722_v0  ;;  %3565 = vmatpush3.bf16.msra.mxu0 %v4298_v15  ;;  %v4311_v28 = vld [vmem:[#allocation8 + $0xb0] sm:$0xff]   ;;  %v4315_v32 = vld [vmem:[#allocation8 + $0xb8] sm:$0xff]  }
  0xc7   :  { %195 = vst [vmem:[#allocation2 + $0x79] sm:$0x1] %v4722_v0  ;;  %196 = vst [vmem:[#allocation2 + $0x89] sm:$0x1] %v4722_v0  ;;  %3629 = vmatpush3.bf16.msra.mxu1 %v4299_v16  ;;  %3566 = vmatprep.subr.bf16.mxu0 %v4300_v17  ;;  %v3520_v33 = vld [vmem:[#allocation3] sm:$0xff]   ;;  %v3551_v39 = vld [vmem:[#allocation3 + $0x8] sm:$0xff]  }
  0xc8   :  { %197 = vst [vmem:[#allocation2 + $0xb9] sm:$0x1] %v4722_v0  ;;  %198 = vst [vmem:[#allocation2 + $0xc9] sm:$0x1] %v4722_v0  ;;  %3630 = vmatprep.subr.bf16.mxu1 %v4301_v18  ;;  %v277_v34 = vld [vmem:[#allocation2 + $0x1] sm:$0xff]  ;;  %v3521_v35 = vunpack.c.l.bf16 %v3520_v33  ;;  %v3522_v36 = vunpack.c.h.bf16 %v3520_v33  ;;  %v3525_v40 = vunpack.c.l.bf16 %v3551_v39  ;;  %v3526_v41 = vunpack.c.h.bf16 %v3551_v39  ;;  %v3552_v42 = vld [vmem:[#allocation3 + $0x10] sm:$0xff]  }
  0xc9   :  { %199 = vst [vmem:[#allocation2 + $0xd9] sm:$0x1] %v4722_v0  ;;  %200 = vst [vmem:[#allocation2 + $0xe9] sm:$0x1] %v4722_v0  ;;  %v4316_v37 = vld [vmem:[#allocation8 + $0x140] sm:$0xff]   ;;  %v3529_v43 = vunpack.c.l.bf16 %v3552_v42  ;;  %v3530_v44 = vunpack.c.h.bf16 %v3552_v42  ;;  %v4957_v47 = vld [vmem:[#allocation3 + $0x18] sm:$0xff]  }
  0xca   :  { %201 = vst [vmem:[#allocation2 + $0xf9] sm:$0x1] %v4722_v0  ;;  %202 = vst [vmem:[#allocation2 + $0x109] sm:$0x1] %v4722_v0  ;;  %3567 = vmatpush3.bf16.msra.mxu0 %v4302_v19  ;;  %v293_v38 = vpack.c.bf16 %v3521_v35, %v277_v34  ;;  %v301_v45 = vld [vmem:[#allocation2 + $0x2] sm:$0xff]  ;;  %v3533_v49 = vunpack.c.l.bf16 %v4957_v47  ;;  %v3534_v50 = vunpack.c.h.bf16 %v4957_v47  ;;  %v4322_v4 = vld [vmem:[#allocation8 + $0x150] sm:$0xff]  }
  0xcb   :  { %203 = vst [vmem:[#allocation2 + $0x119] sm:$0x1] %v4722_v0  ;;  %204 = vst [vmem:[#allocation2 + $0x129] sm:$0x1] %v4722_v0  ;;  %3631 = vmatpush3.bf16.msra.mxu1 %v4303_v20  ;;  %3568 = vmatprep.subr.bf16.mxu0 %v4304_v21  ;;  %v4317_v46 = vld [vmem:[#allocation8 + $0x100] sm:$0xff]   ;;  %v4319_v57 = vld [vmem:[#allocation8 + $0x148] sm:$0xff]  }
  0xcc   :  { %3632 = vmatprep.subr.bf16.mxu1 %v4305_v22  ;;  %237 = vst [vmem:[#allocation2 + $0x11] sm:$0xff] %v3521_v35  ;;  %238 = vst [vmem:[#allocation2 + $0x21] sm:$0xff] %v3522_v36  ;;  %1078 = vmatprep.mubr.bf16.mxu0 %v293_v38  ;;  %v4959_v48 = vld [vmem:[#allocation3 + $0x4] ss:$4 sps:$4 sm:$0xff]   ;;  %v4988_v10 = vld [vmem:[#allocation3 + $0xc] ss:$4 sps:$4 sm:$0xff]  }
  0xcd   :  { %239 = vst [vmem:[#allocation2 + $0x31] sm:$0xff] %v3525_v40  ;;  %240 = vst [vmem:[#allocation2 + $0x41] sm:$0xff] %v3526_v41  ;;  %v4969_v58 = vld [vmem:[#allocation3 + $0x20] sm:$0xff]   ;;  %v4320_v1 = vld [vmem:[#allocation8 + $0x108] sm:$0xff]   ;;  %s4672_s20 = scalar_lea.vmem %s3357_s4, 2048 }
  0xce   :  { %3569 = vmatpush3.bf16.msra.mxu0 %v4306_v23  ;;  %241 = vst [vmem:[#allocation2 + $0x51] sm:$0xff] %v3529_v43  ;;  %242 = vst [vmem:[#allocation2 + $0x61] sm:$0xff] %v3530_v44  ;;  %v3537_v61 = vunpack.c.l.bf16 %v4969_v58  ;;  %v3538_v62 = vunpack.c.h.bf16 %v4969_v58  ;;  %v4328_v8 = vld [vmem:[#allocation8 + $0x1c0] sm:$0xff]   ;;  %v4323_v11 = vld [vmem:[#allocation8 + $0x110] sm:$0xff]   ;;  %p4673_p10 = scmp.ne.s32.totalorder %s3357_s4, %s4672_s20  ;;  %p4678_p12 = scmp.lt.s32.totalorder %s4672_s20, %s4672_s20 }
  0xcf   :  { %3633 = vmatpush3.bf16.msra.mxu1 %v4307_v24  ;;  %3570 = vmatprep.subr.bf16.mxu0 %v4308_v25  ;;  %243 = vst [vmem:[#allocation2 + $0x71] sm:$0xff] %v3533_v49  ;;  %244 = vst [vmem:[#allocation2 + $0x81] sm:$0xff] %v3534_v50  ;;  %v4325_v13 = vld [vmem:[#allocation8 + $0x158] sm:$0xff]   ;;  %v4330_v14 = vld [vmem:[#allocation8 + $0x180] sm:$0xff]  }
  0xd0   :  { %3634 = vmatprep.subr.bf16.mxu1 %v4309_v26  ;;  %245 = vst [vmem:[#allocation2 + $0xb1] sm:$0xff] %v3537_v61  ;;  %246 = vst [vmem:[#allocation2 + $0xc1] sm:$0xff] %v3538_v62  ;;  %v4326_v15 = vld [vmem:[#allocation8 + $0x118] sm:$0xff]   ;;  %v4331_v16 = vld [vmem:[#allocation8 + $0x1c8] sm:$0xff]   ;;  %p4679_p13 = por %p4678_p12, %p4677_p11 }
  0xd1   :  { %v4327_v19 = vld [vmem:[#allocation8 + $0x160] sm:$0xff]   ;;  %v3555_v21 = vld [vmem:[#allocation3 + $0x28] sm:$0xff]   ;;  %v4998_v22 = vld [vmem:[#allocation3 + $0x14] ss:$4 sps:$4 sm:$0xff]  }
  0xd2   :  { %3571 = vmatpush3.bf16.msra.mxu0 %v4310_v27  ;;  %v3541_v24 = vunpack.c.l.bf16 %v3555_v21  ;;  %v3542_v25 = vunpack.c.h.bf16 %v3555_v21  ;;  %v4333_v26 = vld [vmem:[#allocation8 + $0x188] sm:$0xff]   ;;  %v4337_v33 = vld [vmem:[#allocation8 + $0x190] sm:$0xff]   ;;  %v4340_v44 = vld [vmem:[#allocation8 + $0x198] sm:$0xff]   ;;  %p4680_p0 = pnand %p4679_p13, %p4673_p10 }
  0xd3   :  { %3635 = vmatpush3.bf16.msra.mxu1 %v4311_v28  ;;  %3572 = vmatprep.subr.bf16.mxu0 %v4312_v29  ;;  %v325_v51 = vld [vmem:[#allocation2 + $0x10] sm:$0xff]  ;;  %v326_v52 = vld [vmem:[#allocation2 + $0x20] sm:$0xff]  ;;  %v4335_v40 = vld [vmem:[#allocation8 + $0x128] sm:$0xff]  }
  0xd4   :  { %3636 = vmatprep.subr.bf16.mxu1 %v4313_v30  ;;  %v4963_v53 = vld [vmem:[#allocation2 + $0x12] sm:$0xff]  ;;  %v341_v54 = vpack.c.bf16 %v326_v52, %v325_v51  ;;  %v269_v55 = vpack.c.bf16 %v325_v51, %v4722_v0  ;;  %v328_v60 = vld [vmem:[#allocation2 + $0x40] sm:$0xff]  ;;  %247 = vst [vmem:[#allocation2 + $0xd1] sm:$0xff] %v3541_v24  ;;  %248 = vst [vmem:[#allocation2 + $0xe1] sm:$0xff] %v3542_v25 }
  0xd5   :  { %v317_v56 = vpack.c.bf16 %v4963_v53, %v301_v45  ;;  %v327_v59 = vld [vmem:[#allocation2 + $0x30] sm:$0xff]  ;;  %v4974_v2 = vld [vmem:[#allocation2 + $0x22] sm:$0xff]  ;;  %v4353_v24 = vld [vmem:[#allocation8 + $0x1b8] sm:$0xff]  }
  0xd6   :  { %3573 = vmatpush3.bf16.msra.mxu0 %v4314_v31  ;;  %1175 = vmatprep.mubr.bf16.mxu1 %v341_v54  ;;  %v342_v63 = vpack.c.bf16 %v328_v60, %v327_v59  ;;  %v4976_v3 = vld [vmem:[#allocation2 + $0x32] sm:$0xff]  ;;  %v4980_v6 = vld [vmem:[#allocation2 + $0x60] sm:$0xff]  ;;  %v4982_v7 = vpack.c.bf16 %v327_v59, %v326_v52  ;;  %v4334_v30 = vld [vmem:[#allocation8 + $0x168] sm:$0xff]  }
  0xd7   :  { %3637 = vmatpush3.bf16.msra.mxu1 %v4315_v32  ;;  %3686 = vmatprep.subr.bf16.mxu0 %v4316_v37  ;;  %v329_v5 = vld [vmem:[#allocation2 + $0x50] sm:$0xff]  ;;  %v4986_v9 = vpack.c.bf16 %v4976_v3, %v4974_v2  ;;  %v4994_v17 = vld [vmem:[#allocation2 + $0x42] sm:$0xff]  ;;  %v4338_v37 = vld [vmem:[#allocation8 + $0x1d8] sm:$0xff]  }
  0xd8   :  { %v343_v12 = vpack.c.bf16 %v4980_v6, %v329_v5  ;;  %3750 = vmatprep.subr.bf16.mxu1 %v4328_v8  ;;  %v4996_v18 = vld [vmem:[#allocation2 + $0x52] sm:$0xff]  ;;  %v5000_v23 = vld [vmem:[#allocation2 + $0x80] sm:$0xff]  ;;  %v5002_v27 = vpack.c.bf16 %v329_v5, %v328_v60 }
  0xd9   :  { %1079 = vmatmul.mubr.bf16.vlgmr.msra.gmra.mrb[0].mxu0 %v269_v55  ;;  %v331_v20 = vld [vmem:[#allocation2 + $0x70] sm:$0xff]  ;;  %v4329_v28 = vld [vmem:[#allocation8 + $0x120] sm:$0xff]   ;;  %v5006_v29 = vpack.c.bf16 %v4996_v18, %v4994_v17  ;;  %v5030_v60 = vld [vmem:[#allocation3 + $0x38] sm:$0xff]  }
  0xda   :  { %1176 = vmatmul.mubr.bf16.vlgmr.msra.gmra.mrb[0].mxu1 %v317_v56  ;;  %3687 = vmatpush3.bf16.msra.mxu0 %v4317_v46  ;;  %v344_v31 = vpack.c.bf16 %v5000_v23, %v331_v20  ;;  %v4336_v32 = vld [vmem:[#allocation8 + $0x1d0] sm:$0xff]   ;;  %v5010_v34 = vld [vmem:[#allocation2 + $0x62] sm:$0xff]  ;;  %v5019_v46 = vpack.c.bf16 %v331_v20, %v4980_v6  ;;  %v3550_v62 = vunpack.c.h.bf16 %v5030_v60  ;;  %v4348_v8 = vld [vmem:[#allocation8 + $0x178] sm:$0xff]  }
  0xdb   :  { %1086 = vmatprep.mubr.bf16.mxu0 %v4959_v48  ;;  %3688 = vmatprep.subr.bf16.mxu0 %v4319_v57  ;;  %v5012_v35 = vld [vmem:[#allocation2 + $0x72] sm:$0xff]  ;;  %v285_v36 = vld [vmem:[#allocation2 + $0xa1] sm:$0xff] }
  0xdc   :  { %1183 = vmatprep.mubr.bf16.mxu1 %v342_v63  ;;  %3751 = vmatpush3.bf16.msra.mxu1 %v4330_v14  ;;  %v333_v38 = vld [vmem:[#allocation2 + $0xb0] sm:$0xff]  ;;  %v5016_v39 = vld [vmem:[#allocation2 + $0xc0] sm:$0xff]  ;;  %v5023_v49 = vpack.c.bf16 %v5012_v35, %v5010_v34  ;;  %v297_v51 = vpack.c.bf16 %v3537_v61, %v285_v36  ;;  %v4345_v57 = vld [vmem:[#allocation8 + $0x1e8] sm:$0xff]   ;;  %v3549_v61 = vunpack.c.l.bf16 %v5030_v60  ;;  %252 = vst [vmem:[#allocation2 + $0x121] sm:$0xff] %v3550_v62 }
  0xdd   :  { %3752 = vmatprep.subr.bf16.mxu1 %v4331_v16  ;;  %v3556_v41 = vld [vmem:[#allocation3 + $0x30] sm:$0xff]   ;;  %v345_v54 = vpack.c.bf16 %v5016_v39, %v333_v38  ;;  %v4343_v55 = vld [vmem:[#allocation8 + $0x1e0] sm:$0xff]   ;;  %v273_v5 = vpack.c.bf16 %v333_v38, %v4722_v0  ;;  %v4352_v0 = vld [vmem:[#allocation8 + $0x1f8] sm:$0xff]  }
  0xde   :  { %3689 = vmatpush3.bf16.msra.mxu0 %v4320_v1  ;;  %v3545_v42 = vunpack.c.l.bf16 %v3556_v41  ;;  %v3546_v43 = vunpack.c.h.bf16 %v3556_v41  ;;  %v4341_v45 = vld [vmem:[#allocation8 + $0x170] sm:$0xff]   ;;  %v4344_v56 = vld [vmem:[#allocation8 + $0x1a0] sm:$0xff]   ;;  %251 = vst [vmem:[#allocation2 + $0x111] sm:$0xff] %v3549_v61 }
  0xdf   :  { %3690 = vmatprep.subr.bf16.mxu0 %v4322_v4  ;;  %v4342_v52 = vld [vmem:[#allocation8 + $0x130] sm:$0xff]   ;;  %v309_v59 = vld [vmem:[#allocation2 + $0xa2] sm:$0xff] }
  0xe0   :  { %3753 = vmatpush3.bf16.msra.mxu1 %v4333_v26  ;;  %249 = vst [vmem:[#allocation2 + $0xf1] sm:$0xff] %v3545_v42  ;;  %250 = vst [vmem:[#allocation2 + $0x101] sm:$0xff] %v3546_v43  ;;  %v5032_v58 = vld [vmem:[#allocation2 + $0xb2] sm:$0xff]  ;;  %v336_v1 = vld [vmem:[#allocation2 + $0xe0] sm:$0xff] }
  0xe1   :  { %1087 = vmatmul.mubr.bf16.gmra.mrb[4].mxu0 %v4982_v7  ;;  %3754 = vmatprep.subr.bf16.mxu1 %v4336_v32  ;;  %v335_v63 = vld [vmem:[#allocation2 + $0xd0] sm:$0xff]  ;;  %v4347_v4 = vld [vmem:[#allocation8 + $0x1a8] sm:$0xff]   ;;  %v4355_v26 = vld [vmem:[#allocation8 + $0x200] sm:$0xff]  }
  0xe2   :  { %1184 = vmatmul.mubr.bf16.gmra.mrb[4].mxu1 %v4986_v9  ;;  %1094 = vmatprep.mubr.bf16.mxu0 %v4988_v10  ;;  %v5037_v6 = vld [vmem:[#allocation3 + $0x24] ss:$4 sps:$4 sm:$0xff]   ;;  %v4350_v14 = vld [vmem:[#allocation8 + $0x1f0] sm:$0xff]   ;;  %v5048_v25 = vpack.c.bf16 %v335_v63, %v5016_v39 }
  0xe3   :  { %1191 = vmatprep.mubr.bf16.mxu1 %v343_v12  ;;  %3691 = vmatpush3.bf16.msra.mxu0 %v4323_v11  ;;  %v321_v11 = vpack.c.bf16 %v5032_v58, %v309_v59  ;;  %v4349_v12 = vld [vmem:[#allocation8 + $0x138] sm:$0xff]   ;;  %v5043_v16 = vld [vmem:[#allocation2 + $0xc2] sm:$0xff] }
  0xe4   :  { %3692 = vmatprep.subr.bf16.mxu0 %v4325_v13  ;;  %3755 = vmatpush3.bf16.msra.mxu1 %v4337_v33  ;;  %v346_v13 = vpack.c.bf16 %v336_v1, %v335_v63  ;;  %v5059_v32 = vld [vmem:[#allocation2 + $0xe2] sm:$0xff]  ;;  %v393_v47 = vpack.c.bf16 %v5043_v16, %v5032_v58 }
  0xe5   :  { %3756 = vmatprep.subr.bf16.mxu1 %v4338_v37  ;;  %v339_v36 = vld [vmem:[#allocation2 + $0x110] sm:$0xff]  ;;  %v5063_v37 = vld [vmem:[#allocation2 + $0x120] sm:$0xff]  ;;  %v4365_v59 = vld [vmem:[#allocation8 + $0x228] sm:$0xff]  }
  0xe6   :  { %v348_v41 = vpack.c.bf16 %v5063_v37, %v339_v36  ;;  %v5077_v43 = vld [vmem:[#allocation2 + $0x112] sm:$0xff]  ;;  %v388_v63 = vld [vmem:[#allocation2 + $0x122] sm:$0xff] }
  0xe7   :  { %3693 = vmatpush3.bf16.msra.mxu0 %v4326_v15  ;;  %v4351_v15 = vld [vmem:[#allocation8 + $0x1b0] sm:$0xff]   ;;  %v338_v21 = vld [vmem:[#allocation2 + $0x100] sm:$0xff] }
  0xe8   :  { %3694 = vmatprep.subr.bf16.mxu0 %v4327_v19  ;;  %3757 = vmatpush3.bf16.msra.mxu1 %v4340_v44  ;;  %v5045_v19 = vld [vmem:[#allocation2 + $0xd2] sm:$0xff]  ;;  %v5075_v42 = vld [vmem:[#allocation2 + $0x102] sm:$0xff]  ;;  %v5081_v44 = vpack.c.bf16 %v339_v36, %v338_v21 }
  0xe9   :  { %1095 = vmatmul.mubr.bf16.gmra.mrb[8].mxu0 %v5002_v27  ;;  %3758 = vmatprep.subr.bf16.mxu1 %v4343_v55  ;;  %v337_v20 = vld [vmem:[#allocation2 + $0xf0] sm:$0xff]  ;;  %v390_v55 = vpack.c.bf16 %v4994_v17, %v4976_v3  ;;  %v4363_v17 = vld [vmem:[#allocation8 + $0x220] sm:$0xff]   ;;  %v394_v61 = vpack.c.bf16 %v5059_v32, %v5045_v19 }
  0xea   :  { %1192 = vmatmul.mubr.bf16.gmra.mrb[8].mxu1 %v5006_v29  ;;  %1102 = vmatprep.mubr.bf16.mxu0 %v4998_v22  ;;  %v5061_v33 = vld [vmem:[#allocation2 + $0xf2] sm:$0xff]  ;;  %v5065_v38 = vpack.c.bf16 %v337_v20, %v336_v1 }
  0xeb   :  { %1199 = vmatprep.mubr.bf16.mxu1 %v344_v31  ;;  %3695 = vmatpush3.bf16.msra.mxu0 %v4329_v28  ;;  %v5052_v28 = vpack.c.bf16 %v5045_v19, %v5043_v16  ;;  %v347_v31 = vpack.c.bf16 %v338_v21, %v337_v20  ;;  %v5069_v39 = vpack.c.bf16 %v5061_v33, %v5059_v32  ;;  %v429_v3 = vld [vmem:[#allocation2 + $0x91] sm:$0xff] }
  0xec   :  { %3696 = vmatprep.subr.bf16.mxu0 %v4334_v30  ;;  %3759 = vmatpush3.bf16.msra.mxu1 %v4344_v56  ;;  %v5054_v30 = vld [vmem:[#allocation3 + $0x2c] ss:$4 sps:$4 sm:$0xff]   ;;  %v395_v58 = vpack.c.bf16 %v5075_v42, %v5061_v33 }
  0xed   :  { %3760 = vmatprep.subr.bf16.mxu1 %v4345_v57  ;;  %v4359_v56 = vld [vmem:[#allocation8 + $0x210] sm:$0xff]   ;;  %v4356_v57 = vld [vmem:[#allocation3 + $0x8] sm:$0xff] }
  0xee   :  { %v437_v1 = vld [vmem:[#allocation2 + $0x131] sm:$0xff] }
  0xef   :  { %3697 = vmatpush3.bf16.msra.mxu0 %v4335_v40  ;;  %v5071_v40 = vld [vmem:[#allocation3 + $0x34] ss:$4 sps:$4 sm:$0xff]  }
  0xf0   :  { %3698 = vmatprep.subr.bf16.mxu0 %v4341_v45  ;;  %3761 = vmatpush3.bf16.msra.mxu1 %v4347_v4  ;;  %v5085_v45 = vpack.c.bf16 %v5077_v43, %v5075_v42  ;;  %v4366_v4 = vld [vmem:[#allocation3 + $0x30] sm:$0xff] }
  0xf1   :  { %1103 = vmatmul.mubr.bf16.gmra.mrb[12].mxu0 %v5019_v46  ;;  %3762 = vmatprep.subr.bf16.mxu1 %v4350_v14 }
  0xf2   :  { %1200 = vmatmul.mubr.bf16.gmra.mrb[12].mxu1 %v5023_v49  ;;  %1110 = vmatprep.mubr.bf16.mxu0 %v297_v51  ;;  %v389_v51 = vpack.c.bf16 %v4974_v2, %v4963_v53  ;;  %v391_v53 = vpack.c.bf16 %v5010_v34, %v4996_v18  ;;  %v4361_v2 = vld [vmem:[#allocation8 + $0x218] sm:$0xff]   ;;  %v441_v18 = vpack.c.bf16 %v429_v3, %v3534_v50 }
  0xf3   :  { %1207 = vmatprep.mubr.bf16.mxu1 %v345_v54  ;;  %3699 = vmatpush3.bf16.msra.mxu0 %v4342_v52  ;;  %v4354_v52 = vld [vmem:[#allocation3] sm:$0xff]  ;;  %v4357_v54 = vld [vmem:[#allocation8 + $0x208] sm:$0xff]   ;;  %v4360_v34 = vld [vmem:[#allocation3 + $0x18] sm:$0xff] }
  0xf4   :  { %3700 = vmatprep.subr.bf16.mxu0 %v4348_v8  ;;  %3763 = vmatpush3.bf16.msra.mxu1 %v4351_v15  ;;  %v4369_v50 = vld [vmem:[#allocation8 + $0x238] sm:$0xff]  }
  0xf5   :  { %3764 = vmatprep.subr.bf16.mxu1 %v4352_v0  ;;  %v4368_v8 = vld [vmem:[#allocation3 + $0x38] sm:$0xff] }
  0xf7   :  { %3701 = vmatpush3.bf16.msra.mxu0 %v4349_v12  ;;  %v453_v12 = vld [vmem:[#allocation2 + $0x92] sm:$0xff] }
  0xf8   :  { %4121 = vmatprep.subr.bf16.mxu0 %v4355_v26  ;;  %3765 = vmatpush3.bf16.msra.mxu1 %v4353_v24 }
  0xf9   :  { %1111 = vmatmul.mubr.bf16.gmra.mrb[16].mxu0 %v273_v5  ;;  %v396_v5 = vpack.c.bf16 %v388_v63, %v5077_v43 }
  0xfa   :  { %1208 = vmatmul.mubr.bf16.gmra.mrb[16].mxu1 %v321_v11  ;;  %1118 = vmatprep.mubr.bf16.mxu0 %v5037_v6 }
  0xfb   :  { %1215 = vmatprep.mubr.bf16.mxu1 %v346_v13 }
 0x101   :  { %1119 = vmatmul.mubr.bf16.gmra.mrb[20].mxu0 %v5048_v25 }
 0x102   :  { %1216 = vmatmul.mubr.bf16.gmra.mrb[20].mxu1 %v5052_v28  ;;  %1126 = vmatprep.mubr.bf16.mxu0 %v5054_v30 }
 0x103   :  { %1223 = vmatprep.mubr.bf16.mxu1 %v347_v31 }
 0x109   :  { %1127 = vmatmul.mubr.bf16.gmra.mrb[24].mxu0 %v5065_v38 }
 0x10a   :  { %1224 = vmatmul.mubr.bf16.gmra.mrb[24].mxu1 %v5069_v39  ;;  %1134 = vmatprep.mubr.bf16.mxu0 %v5071_v40 }
 0x10b   :  { %1231 = vmatprep.mubr.bf16.mxu1 %v348_v41 }
 0x111   :  { %1135 = vmatmul.mubr.bf16.gmra.mrb[28].mxu0 %v5081_v44 }
 0x112   :  { %1232 = vmatmul.mubr.bf16.gmra.mrb[28].mxu1 %v5085_v45  ;;  %1272 = vmatprep.mubr.bf16.mxu0 %v389_v51 }
 0x113   :  { %1369 = vmatprep.mubr.bf16.mxu1 %v4959_v48  ;;  %v5098_v48 = vld [vmem:[#allocation2 + $0x82] sm:$0xff] }
 0x114   :  { %v465_v60 = vpack.c.bf16 %v453_v12, %v5098_v48 }
 0x119   :  { %1273 = vmatmul.mubr.bf16.vlgmr.msra.gmra.mrb[32].mxu0 %v4354_v52 }
 0x11a   :  { %4122 = vmatpush3.bf16.msra.mxu0 %v4355_v26  ;;  %1370 = vmatmul.mubr.bf16.vlgmr.msra.gmra.mrb[32].mxu1 %v4982_v7  ;;  %v4358_v7 = vld [vmem:[#allocation3 + $0x10] sm:$0xff] }
 0x11b   :  { %1280 = vmatprep.mubr.bf16.mxu0 %v390_v55  ;;  %4123 = vmatprep.subr.bf16.mxu0 %v4357_v54 }
 0x11c   :  { %1377 = vmatprep.mubr.bf16.mxu1 %v4988_v10  ;;  %v392_v10 = vpack.c.bf16 %v5098_v48, %v5012_v35 }
 0x11e   :  { %4124 = vmatpush3.bf16.msra.mxu0 %v4357_v54 }
 0x11f   :  { %4125 = vmatprep.subr.bf16.mxu0 %v4359_v56 }
 0x121   :  { %1281 = vmatmul.mubr.bf16.gmra.mrb[36].mxu0 %v4356_v57 }
 0x122   :  { %1378 = vmatmul.mubr.bf16.gmra.mrb[36].mxu1 %v5002_v27  ;;  %1288 = vmatprep.mubr.bf16.mxu0 %v391_v53  ;;  %v4367_v27 = vld [vmem:[#allocation8 + $0x230] sm:$0xff]  }
 0x123   :  { %1385 = vmatprep.mubr.bf16.mxu1 %v4998_v22  ;;  %4126 = vmatpush3.bf16.msra.mxu0 %v4359_v56  ;;  %v5107_v22 = vld [vmem:[#allocation2] sm:$0xff] }
 0x124   :  { %4127 = vmatprep.subr.bf16.mxu0 %v4361_v2  ;;  %v417_v35 = vpack.c.bf16 %v5107_v22, %v5000_v23  ;;  %v4364_v23 = vld [vmem:[#allocation3 + $0x28] sm:$0xff]  ;;  %v421_v11 = vpack.c.bf16 %v5107_v22, %v5063_v37 }
 0x127   :  { %4128 = vmatpush3.bf16.msra.mxu0 %v4361_v2 }
 0x128   :  { %4129 = vmatprep.subr.bf16.mxu0 %v4363_v17 }
 0x129   :  { %1289 = vmatmul.mubr.bf16.gmra.mrb[40].mxu0 %v4358_v7 }
 0x12a   :  { %1386 = vmatmul.mubr.bf16.gmra.mrb[40].mxu1 %v5019_v46  ;;  %1296 = vmatprep.mubr.bf16.mxu0 %v392_v10  ;;  %v4362_v46 = vld [vmem:[#allocation3 + $0x20] sm:$0xff] }
 0x12b   :  { %1393 = vmatprep.mubr.bf16.mxu1 %v441_v18  ;;  %4130 = vmatpush3.bf16.msra.mxu0 %v4363_v17 }
 0x12c   :  { %4131 = vmatprep.subr.bf16.mxu0 %v4365_v59 }
 0x12f   :  { %4132 = vmatpush3.bf16.msra.mxu0 %v4365_v59 }
 0x130   :  { %4133 = vmatprep.subr.bf16.mxu0 %v4367_v27 }
 0x131   :  { %1297 = vmatmul.mubr.bf16.gmra.mrb[44].mxu0 %v4360_v34 }
 0x132   :  { %1394 = vmatmul.mubr.bf16.gmra.mrb[44].mxu1 %v417_v35  ;;  %1304 = vmatprep.mubr.bf16.mxu0 %v393_v47 }
 0x133   :  { %1401 = vmatprep.mubr.bf16.mxu1 %v5037_v6  ;;  %4134 = vmatpush3.bf16.msra.mxu0 %v4367_v27  ;;  %v445_v6 = vpack.c.bf16 %v437_v1, %v3550_v62  ;;  %v461_v62 = vld [vmem:[#allocation2 + $0x132] sm:$0xff] }
 0x134   :  { %4135 = vmatprep.subr.bf16.mxu0 %v4369_v50  ;;  %v469_v13 = vpack.c.bf16 %v461_v62, %v388_v63 }
 0x137   :  { %4136 = vmatpush3.bf16.msra.mxu0 %v4369_v50 }
 0x139   :  { %1305 = vmatmul.mubr.bf16.gmra.mrb[48].mxu0 %v4362_v46 }
 0x13a   :  { %1402 = vmatmul.mubr.bf16.gmra.mrb[48].mxu1 %v5048_v25  ;;  %1312 = vmatprep.mubr.bf16.mxu0 %v394_v61 }
 0x13b   :  { %1409 = vmatprep.mubr.bf16.mxu1 %v5054_v30 }
 0x141   :  { %1313 = vmatmul.mubr.bf16.gmra.mrb[52].mxu0 %v4364_v23 }
 0x142   :  { %1410 = vmatmul.mubr.bf16.gmra.mrb[52].mxu1 %v5065_v38  ;;  %1320 = vmatprep.mubr.bf16.mxu0 %v395_v58 }
 0x143   :  { %1417 = vmatprep.mubr.bf16.mxu1 %v5071_v40 }
 0x149   :  { %1321 = vmatmul.mubr.bf16.gmra.mrb[56].mxu0 %v4366_v4 }
 0x14a   :  { %1418 = vmatmul.mubr.bf16.gmra.mrb[56].mxu1 %v5081_v44  ;;  %1328 = vmatprep.mubr.bf16.mxu0 %v396_v5 }
 0x14b   :  { %1425 = vmatprep.mubr.bf16.mxu1 %v445_v6 }
 0x151   :  { %1329 = vmatmul.mubr.bf16.gmra.mrb[60].mxu0 %v4368_v8 }
 0x152   :  { %1426 = vmatmul.mubr.bf16.gmra.mrb[60].mxu1 %v421_v11  ;;  %4137 = vmatprep.mubr.bf16.mxu0 %v4986_v9 }
 0x153   :  { %4185 = vmatprep.mubr.msk.f32.mxu1 %vm4724_vm0, %v5107_v22 }
 0x159   :  { %4138 = vmatmul.mubr.bf16.vlgmr.msra.gmra.mrb[64].mxu0 %v5006_v29 }
 0x15a   :  { %4141 = vmatprep.mubr.bf16.mxu0 %v5023_v49 }
 0x161   :  { %4142 = vmatmul.mubr.bf16.gmra.mrb[68].mxu0 %v465_v60 }
 0x162   :  { %4145 = vmatprep.mubr.bf16.mxu0 %v5052_v28 }
 0x169   :  { %4146 = vmatmul.mubr.bf16.gmra.mrb[72].mxu0 %v5069_v39 }
 0x16a   :  { %4149 = vmatprep.mubr.bf16.mxu0 %v5085_v45 }
 0x171   :  { %4150 = vmatmul.mubr.bf16.gmra.mrb[76].mxu0 %v469_v13 }
 0x1ac   :  { %v3574_v14 = vpop.f32.mrb[0].mxu0 }
 0x1ad   :  { %v3638_v15 = vpop.f32.mrb[0].mxu1  ;;  %v3575_v9 = vpop.f32.mrb[1].mxu0 }
 0x1ae   :  { %v3576_v0 = vadd.f32 %v3575_v9, %v3574_v14  ;;  %v3639_v29 = vpop.f32.mrb[1].mxu1  ;;  %v3577_v16 = vpop.f32.mrb[2].mxu0 }
 0x1af   :  { %v3640_v49 = vadd.f32 %v3639_v29, %v3638_v15  ;;  %v3641_v19 = vpop.f32.mrb[2].mxu1  ;;  %v3578_v20 = vpop.f32.mrb[3].mxu0 }
 0x1b0   :  { %v3579_v21 = vadd.f32 %v3578_v20, %v3577_v16  ;;  %v3642_v24 = vpop.f32.mrb[3].mxu1 }
 0x1b1   :  { %v5135_v25 = vadd.f32 %v3640_v49, %v3576_v0  ;;  %v3643_v26 = vadd.f32 %v3642_v24, %v3641_v19 }
 0x1b3   :  { %v5137_v28 = vadd.f32 %v3643_v26, %v3579_v21 }
 0x1b4   :  { %v3580_v30 = vpop.f32.mrb[4].mxu0 }
 0x1b5   :  { %v3644_v31 = vpop.f32.mrb[4].mxu1  ;;  %v3581_v32 = vpop.f32.mrb[5].mxu0 }
 0x1b6   :  { %v3582_v33 = vadd.f32 %v3581_v32, %v3580_v30  ;;  %v3645_v36 = vpop.f32.mrb[5].mxu1  ;;  %v3583_v37 = vpop.f32.mrb[6].mxu0 }
 0x1b7   :  { %v3646_v38 = vadd.f32 %v3645_v36, %v3644_v31  ;;  %v3647_v39 = vpop.f32.mrb[6].mxu1  ;;  %v3584_v40 = vpop.f32.mrb[7].mxu0 }
 0x1b8   :  { %v3585_v41 = vadd.f32 %v3584_v40, %v3583_v37  ;;  %v3648_v42 = vpop.f32.mrb[7].mxu1 }
 0x1b9   :  { %v5139_v43 = vadd.f32 %v3646_v38, %v3582_v33  ;;  %v3649_v44 = vadd.f32 %v3648_v42, %v3647_v39 }
 0x1bb   :  { %v5141_v45 = vadd.f32 %v3649_v44, %v3585_v41 }
 0x1bc   :  { %v3586_v51 = vpop.f32.mrb[8].mxu0 }
 0x1bd   :  { %v3650_v52 = vpop.f32.mrb[8].mxu1  ;;  %v3587_v54 = vpop.f32.mrb[9].mxu0 }
 0x1be   :  { %v3588_v55 = vadd.f32 %v3587_v54, %v3586_v51  ;;  %v3651_v56 = vpop.f32.mrb[9].mxu1  ;;  %v3589_v57 = vpop.f32.mrb[10].mxu0 }
 0x1bf   :  { %v3652_v53 = vadd.f32 %v3651_v56, %v3650_v52  ;;  %v3653_v2 = vpop.f32.mrb[10].mxu1  ;;  %v3590_v48 = vpop.f32.mrb[11].mxu0 }
 0x1c0   :  { %v3591_v3 = vadd.f32 %v3590_v48, %v3589_v57  ;;  %v3654_v17 = vpop.f32.mrb[11].mxu1 }
 0x1c1   :  { %v5143_v7 = vadd.f32 %v3652_v53, %v3588_v55  ;;  %v3655_v10 = vadd.f32 %v3654_v17, %v3653_v2 }
 0x1c3   :  { %v5145_v59 = vadd.f32 %v3655_v10, %v3591_v3 }
 0x1c4   :  { %v3592_v18 = vpop.f32.mrb[12].mxu0 }
 0x1c5   :  { %v3656_v27 = vpop.f32.mrb[12].mxu1  ;;  %v3593_v34 = vpop.f32.mrb[13].mxu0 }
 0x1c6   :  { %v3594_v35 = vadd.f32 %v3593_v34, %v3592_v18  ;;  %v3657_v47 = vpop.f32.mrb[13].mxu1  ;;  %v3595_v50 = vpop.f32.mrb[14].mxu0 }
 0x1c7   :  { %v3658_v46 = vadd.f32 %v3657_v47, %v3656_v27  ;;  %v3659_v61 = vpop.f32.mrb[14].mxu1  ;;  %v3596_v23 = vpop.f32.mrb[15].mxu0 }
 0x1c8   :  { %v3597_v58 = vadd.f32 %v3596_v23, %v3595_v50  ;;  %v3660_v63 = vpop.f32.mrb[15].mxu1 }
 0x1c9   :  { %v5147_v1 = vadd.f32 %v3658_v46, %v3594_v35  ;;  %v3661_v4 = vadd.f32 %v3660_v63, %v3659_v61 }
 0x1cb   :  { %v5149_v5 = vadd.f32 %v3661_v4, %v3597_v58 }
 0x1cc   :  { %v3598_v6 = vpop.f32.mrb[16].mxu0 }
 0x1cd   :  { %v3662_v8 = vpop.f32.mrb[16].mxu1  ;;  %v3599_v11 = vpop.f32.mrb[17].mxu0 }
 0x1ce   :  { %v3600_v12 = vadd.f32 %v3599_v11, %v3598_v6  ;;  %v3663_v60 = vpop.f32.mrb[17].mxu1  ;;  %v3601_v62 = vpop.f32.mrb[18].mxu0 }
 0x1cf   :  { %v3664_v13 = vadd.f32 %v3663_v60, %v3662_v8  ;;  %v3665_v14 = vpop.f32.mrb[18].mxu1  ;;  %v3602_v15 = vpop.f32.mrb[19].mxu0 }
 0x1d0   :  { %v3603_v9 = vadd.f32 %v3602_v15, %v3601_v62  ;;  %v3666_v0 = vpop.f32.mrb[19].mxu1 }
 0x1d1   :  { %v5151_v29 = vadd.f32 %v3664_v13, %v3600_v12  ;;  %v3667_v16 = vadd.f32 %v3666_v0, %v3665_v14 }
 0x1d3   :  { %v5153_v49 = vadd.f32 %v3667_v16, %v3603_v9 }
 0x1d4   :  { %v3604_v19 = vpop.f32.mrb[20].mxu0 }
 0x1d5   :  { %v3668_v20 = vpop.f32.mrb[20].mxu1  ;;  %v3605_v21 = vpop.f32.mrb[21].mxu0 }
 0x1d6   :  { %v3606_v24 = vadd.f32 %v3605_v21, %v3604_v19  ;;  %v3669_v26 = vpop.f32.mrb[21].mxu1  ;;  %v3607_v30 = vpop.f32.mrb[22].mxu0 }
 0x1d7   :  { %v3670_v31 = vadd.f32 %v3669_v26, %v3668_v20  ;;  %v3671_v32 = vpop.f32.mrb[22].mxu1  ;;  %v3608_v33 = vpop.f32.mrb[23].mxu0 }
 0x1d8   :  { %v3609_v36 = vadd.f32 %v3608_v33, %v3607_v30  ;;  %v3672_v37 = vpop.f32.mrb[23].mxu1 }
 0x1d9   :  { %v5155_v38 = vadd.f32 %v3670_v31, %v3606_v24  ;;  %v3673_v39 = vadd.f32 %v3672_v37, %v3671_v32 }
 0x1db   :  { %v5157_v40 = vadd.f32 %v3673_v39, %v3609_v36 }
 0x1dc   :  { %v3610_v41 = vpop.f32.mrb[24].mxu0 }
 0x1dd   :  { %v3674_v42 = vpop.f32.mrb[24].mxu1  ;;  %v3611_v44 = vpop.f32.mrb[25].mxu0 }
 0x1de   :  { %v3612_v51 = vadd.f32 %v3611_v44, %v3610_v41  ;;  %v3675_v52 = vpop.f32.mrb[25].mxu1  ;;  %v3613_v54 = vpop.f32.mrb[26].mxu0 }
 0x1df   :  { %v3676_v55 = vadd.f32 %v3675_v52, %v3674_v42  ;;  %v3677_v56 = vpop.f32.mrb[26].mxu1  ;;  %v3614_v57 = vpop.f32.mrb[27].mxu0  ;;  %v1674_v52 = vld [vmem:[#allocation12] sm:$0xff] }
 0x1e0   :  { %v3615_v53 = vadd.f32 %v3614_v57, %v3613_v54  ;;  %v3678_v2 = vpop.f32.mrb[27].mxu1  ;;  %v1675_v54 = vld [vmem:[#allocation12 + $0x8] sm:$0xff] }
 0x1e1   :  { %v5159_v48 = vadd.f32 %v3676_v55, %v3612_v51  ;;  %v3679_v3 = vadd.f32 %v3678_v2, %v3677_v56  ;;  %v4226_v55 = vpack.c.bf16 %v1675_v54, %v1674_v52 }
 0x1e3   :  { %v5161_v17 = vadd.f32 %v3679_v3, %v3615_v53  ;;  %v4723_v53 = vmov 0.0|0.0  }
 0x1e4   :  { %v3616_v10 = vpop.f32.mrb[28].mxu0  ;;  %4225 = vmatprep.subr.bf16.mxu1 %v4723_v53 }
 0x1e5   :  { %v3680_v18 = vpop.f32.mrb[28].mxu1  ;;  %v3617_v27 = vpop.f32.mrb[29].mxu0  ;;  %4227 = vmatpush3.bf16.msra.mxu1 %v4226_v55 }
 0x1e6   :  { %v3618_v34 = vadd.f32 %v3617_v27, %v3616_v10  ;;  %v3681_v35 = vpop.f32.mrb[29].mxu1  ;;  %v3619_v47 = vpop.f32.mrb[30].mxu0  ;;  %4228 = vmatprep.subr.bf16.mxu1 %v4723_v53  ;;  %v1677_v10 = vld [vmem:[#allocation12 + $0x18] sm:$0xff] }
 0x1e7   :  { %v3682_v50 = vadd.f32 %v3681_v35, %v3680_v18  ;;  %v3683_v46 = vpop.f32.mrb[30].mxu1  ;;  %v3620_v61 = vpop.f32.mrb[31].mxu0 }
 0x1e8   :  { %v3621_v23 = vadd.f32 %v3620_v61, %v3619_v47  ;;  %v3684_v58 = vpop.f32.mrb[31].mxu1 }
 0x1e9   :  { %v5163_v63 = vadd.f32 %v3682_v50, %v3618_v34  ;;  %v3685_v4 = vadd.f32 %v3684_v58, %v3683_v46 }
 0x1eb   :  { %v5165_v6 = vadd.f32 %v3685_v4, %v3621_v23 }
 0x1ec   :  { %v3702_v8 = vpop.f32.mrb[32].mxu0 }
 0x1ed   :  { %v3703_v11 = vpop.f32.mrb[33].mxu0  ;;  %v3766_v12 = vpop.f32.mrb[32].mxu1 }
 0x1ee   :  { %v3704_v60 = vadd.f32 %v3703_v11, %v3702_v8  ;;  %v3705_v62 = vpop.f32.mrb[34].mxu0  ;;  %v3767_v13 = vpop.f32.mrb[33].mxu1  ;;  %v1678_v8 = vld [vmem:[#allocation12 + $0x20] sm:$0xff]  ;;  %v1679_v11 = vld [vmem:[#allocation12 + $0x28] sm:$0xff] }
 0x1ef   :  { %v3706_v14 = vpop.f32.mrb[35].mxu0  ;;  %v3768_v15 = vadd.f32 %v3767_v13, %v3766_v12  ;;  %v3769_v9 = vpop.f32.mrb[34].mxu1 }
 0x1f0   :  { %v1275_v0 = vadd.f32 %v3704_v60, %v5135_v25  ;;  %v3707_v16 = vadd.f32 %v3706_v14, %v3705_v62  ;;  %v3770_v19 = vpop.f32.mrb[35].mxu1  ;;  %v4232_v60 = vpack.c.bf16 %v1679_v11, %v1678_v8 }
 0x1f1   :  { %v3771_v20 = vadd.f32 %v3770_v19, %v3769_v9  ;;  %v1680_v9 = vld [vmem:[#allocation12 + $0x30] sm:$0xff] }
 0x1f2   :  { %v1278_v21 = vadd.f32 %v3707_v16, %v5137_v28  ;;  %v5169_v24 = vadd.f32 %v3768_v15, %v1275_v0 }
 0x1f4   :  { %v3708_v26 = vpop.f32.mrb[36].mxu0  ;;  %v5171_v30 = vadd.f32 %v3771_v20, %v1278_v21 }
 0x1f5   :  { %v3709_v31 = vpop.f32.mrb[37].mxu0  ;;  %v3772_v32 = vpop.f32.mrb[36].mxu1 }
 0x1f6   :  { %v3710_v33 = vadd.f32 %v3709_v31, %v3708_v26  ;;  %v3711_v36 = vpop.f32.mrb[38].mxu0  ;;  %v3773_v37 = vpop.f32.mrb[37].mxu1 }
 0x1f7   :  { %v3712_v39 = vpop.f32.mrb[39].mxu0  ;;  %v3774_v41 = vadd.f32 %v3773_v37, %v3772_v32  ;;  %v3775_v42 = vpop.f32.mrb[38].mxu1 }
 0x1f8   :  { %v1283_v25 = vadd.f32 %v3710_v33, %v5139_v43  ;;  %v3713_v44 = vadd.f32 %v3712_v39, %v3711_v36  ;;  %v3776_v51 = vpop.f32.mrb[39].mxu1  ;;  %v1676_v43 = vld [vmem:[#allocation12 + $0x10] sm:$0xff]  ;;  %v1682_v39 = vld [vmem:[#allocation12 + $0x40] sm:$0xff] }
 0x1f9   :  { %v3777_v28 = vadd.f32 %v3776_v51, %v3775_v42  ;;  %v4229_v34 = vpack.c.bf16 %v1677_v10, %v1676_v43  ;;  %v1685_v51 = vld [vmem:[#allocation12 + $0x58] sm:$0xff] }
 0x1fa   :  { %v1286_v56 = vadd.f32 %v3713_v44, %v5141_v45  ;;  %v5175_v57 = vadd.f32 %v3774_v41, %v1283_v25  ;;  %v1683_v41 = vld [vmem:[#allocation12 + $0x48] sm:$0xff]  ;;  %v1684_v44 = vld [vmem:[#allocation12 + $0x50] sm:$0xff] }
 0x1fb   :  { %4230 = vmatpush3.bf16.msra.mxu1 %v4229_v34  ;;  %v4238_v25 = vpack.c.bf16 %v1683_v41, %v1682_v39 }
 0x1fc   :  { %v3714_v2 = vpop.f32.mrb[40].mxu0  ;;  %v5178_v3 = vadd.f32 %v3777_v28, %v1286_v56  ;;  %4231 = vmatprep.subr.bf16.mxu1 %v4723_v53  ;;  %v1686_v56 = vld [vmem:[#allocation12 + $0x60] sm:$0xff] }
 0x1fd   :  { %v3715_v18 = vpop.f32.mrb[41].mxu0  ;;  %v3778_v27 = vpop.f32.mrb[40].mxu1 }
 0x1fe   :  { %v3716_v35 = vadd.f32 %v3715_v18, %v3714_v2  ;;  %v3717_v47 = vpop.f32.mrb[42].mxu0  ;;  %v3779_v50 = vpop.f32.mrb[41].mxu1  ;;  %v1687_v2 = vld [vmem:[#allocation12 + $0x68] sm:$0xff] }
 0x1ff   :  { %v3718_v45 = vpop.f32.mrb[43].mxu0  ;;  %v3780_v46 = vadd.f32 %v3779_v50, %v3778_v27  ;;  %v3781_v61 = vpop.f32.mrb[42].mxu1  ;;  %4233 = vmatpush3.bf16.msra.mxu1 %v4232_v60  ;;  %v4244_v50 = vpack.c.bf16 %v1687_v2, %v1686_v56 }
 0x200   :  { %v1291_v23 = vadd.f32 %v3716_v35, %v5143_v7  ;;  %v3719_v58 = vadd.f32 %v3718_v45, %v3717_v47  ;;  %v3782_v4 = vpop.f32.mrb[43].mxu1  ;;  %4234 = vmatprep.subr.bf16.mxu1 %v4723_v53  ;;  %v1681_v7 = vld [vmem:[#allocation12 + $0x38] sm:$0xff] }
 0x201   :  { %v3783_v12 = vadd.f32 %v3782_v4, %v3781_v61  ;;  %v4235_v19 = vpack.c.bf16 %v1681_v7, %v1680_v9 }
 0x202   :  { %v1294_v62 = vadd.f32 %v3719_v58, %v5145_v59  ;;  %v5184_v13 = vadd.f32 %v3780_v46, %v1291_v23  ;;  %v1688_v23 = vld [vmem:[#allocation12 + $0x70] sm:$0xff]  ;;  %v1689_v58 = vld [vmem:[#allocation12 + $0x78] sm:$0xff] }
 0x203   :  { %4236 = vmatpush3.bf16.msra.mxu1 %v4235_v19 }
 0x204   :  { %v3720_v14 = vpop.f32.mrb[44].mxu0  ;;  %v5186_v15 = vadd.f32 %v3783_v12, %v1294_v62  ;;  %4237 = vmatprep.subr.bf16.mxu1 %v4723_v53  ;;  %v4247_v12 = vpack.c.bf16 %v1689_v58, %v1688_v23 }
 0x205   :  { %v3721_v0 = vpop.f32.mrb[45].mxu0  ;;  %v3784_v16 = vpop.f32.mrb[44].mxu1 }
 0x206   :  { %v3722_v20 = vadd.f32 %v3721_v0, %v3720_v14  ;;  %v3723_v21 = vpop.f32.mrb[46].mxu0  ;;  %v3785_v26 = vpop.f32.mrb[45].mxu1 }
 0x207   :  { %v3724_v31 = vpop.f32.mrb[47].mxu0  ;;  %v3786_v32 = vadd.f32 %v3785_v26, %v3784_v16  ;;  %v3787_v33 = vpop.f32.mrb[46].mxu1  ;;  %4239 = vmatpush3.bf16.msra.mxu1 %v4238_v25 }
 0x208   :  { %v1299_v59 = vadd.f32 %v3722_v20, %v5147_v1  ;;  %v3725_v36 = vadd.f32 %v3724_v31, %v3723_v21  ;;  %v3788_v37 = vpop.f32.mrb[47].mxu1  ;;  %v4241_v1 = vpack.c.bf16 %v1685_v51, %v1684_v44  ;;  %4240 = vmatprep.subr.bf16.mxu1 %v4723_v53 }
 0x209   :  { %v3789_v42 = vadd.f32 %v3788_v37, %v3787_v33 }
 0x20a   :  { %v1302_v52 = vadd.f32 %v3725_v36, %v5149_v5  ;;  %v5192_v54 = vadd.f32 %v3786_v32, %v1299_v59 }
 0x20b   :  { %4242 = vmatpush3.bf16.msra.mxu1 %v4241_v1 }
 0x20c   :  { %v3726_v28 = vpop.f32.mrb[48].mxu0  ;;  %v5196_v55 = vadd.f32 %v3789_v42, %v1302_v52  ;;  %4243 = vmatprep.subr.bf16.mxu1 %v4723_v53 }
 0x20d   :  { %v3727_v43 = vpop.f32.mrb[49].mxu0  ;;  %v3790_v10 = vpop.f32.mrb[48].mxu1 }
 0x20e   :  { %v3728_v18 = vadd.f32 %v3727_v43, %v3726_v28  ;;  %v3729_v27 = vpop.f32.mrb[50].mxu0  ;;  %v3791_v5 = vpop.f32.mrb[49].mxu1 }
 0x20f   :  { %v3730_v34 = vpop.f32.mrb[51].mxu0  ;;  %v3792_v35 = vadd.f32 %v3791_v5, %v3790_v10  ;;  %v3793_v47 = vpop.f32.mrb[50].mxu1  ;;  %4245 = vmatpush3.bf16.msra.mxu1 %v4244_v50 }
 0x210   :  { %v1307_v45 = vadd.f32 %v3728_v18, %v5151_v29  ;;  %v3731_v46 = vadd.f32 %v3730_v34, %v3729_v27  ;;  %v3794_v61 = vpop.f32.mrb[51].mxu1  ;;  %4246 = vmatprep.subr.bf16.mxu1 %v4723_v53 }
 0x211   :  { %v3795_v4 = vadd.f32 %v3794_v61, %v3793_v47 }
 0x212   :  { %v1310_v8 = vadd.f32 %v3731_v46, %v5153_v49  ;;  %v5202_v11 = vadd.f32 %v3792_v35, %v1307_v45 }
 0x213   :  { %4248 = vmatpush3.bf16.msra.mxu1 %v4247_v12 }
 0x214   :  { %v3732_v60 = vpop.f32.mrb[52].mxu0  ;;  %v5204_v62 = vadd.f32 %v3795_v4, %v1310_v8  ;;  %4188 = vmatprep.subr.mxu1 %v5107_v22 }
 0x215   :  { %v3733_v14 = vpop.f32.mrb[53].mxu0  ;;  %v3796_v29 = vpop.f32.mrb[52].mxu1 }
 0x216   :  { %v3734_v9 = vadd.f32 %v3733_v14, %v3732_v60  ;;  %v3735_v7 = vpop.f32.mrb[54].mxu0  ;;  %v3797_v0 = vpop.f32.mrb[53].mxu1 }
 0x217   :  { %v3736_v16 = vpop.f32.mrb[55].mxu0  ;;  %v3798_v19 = vadd.f32 %v3797_v0, %v3796_v29  ;;  %v3799_v20 = vpop.f32.mrb[54].mxu1 }
 0x218   :  { %v1315_v49 = vadd.f32 %v3734_v9, %v5155_v38  ;;  %v3737_v21 = vadd.f32 %v3736_v16, %v3735_v7  ;;  %v3800_v26 = vpop.f32.mrb[55].mxu1 }
 0x219   :  { %v3801_v31 = vadd.f32 %v3800_v26, %v3799_v20 }
 0x21a   :  { %v1318_v32 = vadd.f32 %v3737_v21, %v5157_v40  ;;  %v5210_v33 = vadd.f32 %v3798_v19, %v1315_v49 }
 0x21c   :  { %v3738_v53 = vpop.f32.mrb[56].mxu0  ;;  %v5212_v59 = vadd.f32 %v3801_v31, %v1318_v32 }
 0x21d   :  { %v3739_v36 = vpop.f32.mrb[57].mxu0  ;;  %v3802_v37 = vpop.f32.mrb[56].mxu1 }
 0x21e   :  { %v3740_v39 = vadd.f32 %v3739_v36, %v3738_v53  ;;  %v3741_v41 = vpop.f32.mrb[58].mxu0  ;;  %v3803_v42 = vpop.f32.mrb[57].mxu1 }
 0x21f   :  { %v3742_v25 = vpop.f32.mrb[59].mxu0  ;;  %v3804_v44 = vadd.f32 %v3803_v42, %v3802_v37  ;;  %v3805_v38 = vpop.f32.mrb[58].mxu1 }
 0x220   :  { %v1323_v51 = vadd.f32 %v3740_v39, %v5159_v48  ;;  %v3743_v52 = vadd.f32 %v3742_v25, %v3741_v41  ;;  %v3806_v22 = vpop.f32.mrb[59].mxu1 }
 0x221   :  { %v3807_v1 = vadd.f32 %v3806_v22, %v3805_v38 }
 0x222   :  { %v1326_v40 = vadd.f32 %v3743_v52, %v5161_v17  ;;  %v5216_v28 = vadd.f32 %v3804_v44, %v1323_v51 }
 0x224   :  { %v3744_v56 = vpop.f32.mrb[60].mxu0  ;;  %v5218_v2 = vadd.f32 %v3807_v1, %v1326_v40 }
 0x225   :  { %v3745_v43 = vpop.f32.mrb[61].mxu0  ;;  %v3808_v10 = vpop.f32.mrb[60].mxu1 }
 0x226   :  { %v3746_v18 = vadd.f32 %v3745_v43, %v3744_v56  ;;  %v3747_v27 = vpop.f32.mrb[62].mxu0  ;;  %v3809_v5 = vpop.f32.mrb[61].mxu1 }
 0x227   :  { %v3748_v34 = vpop.f32.mrb[63].mxu0  ;;  %v3810_v35 = vadd.f32 %v3809_v5, %v3808_v10  ;;  %v3811_v47 = vpop.f32.mrb[62].mxu1 }
 0x228   :  { %v1331_v48 = vadd.f32 %v3746_v18, %v5163_v63  ;;  %v3749_v50 = vadd.f32 %v3748_v34, %v3747_v27  ;;  %v3812_v45 = vpop.f32.mrb[63].mxu1 }
 0x229   :  { %v3813_v46 = vadd.f32 %v3812_v45, %v3811_v47 }
 0x22a   :  { %v1334_v17 = vadd.f32 %v3749_v50, %v5165_v6  ;;  %v1428_v61 = vadd.f32 %v3810_v35, %v1331_v48 }
 0x22c   :  { %v4139_v23 = vpop.f32.mrb[64].mxu0  ;;  %v1431_v58 = vadd.f32 %v3813_v46, %v1334_v17 }
 0x22d   :  { %v5223_v4 = vadd.f32 %v4139_v23, %v5175_v57  ;;  %v1468_v8 = vpop.f32.mrb[65].mxu0 }
 0x22e   :  { %v5226_v12 = vadd.f32 %v1468_v8, %v5169_v24  ;;  %v4140_v60 = vpop.f32.mrb[66].mxu0 }
 0x22f   :  { %v5229_v14 = vadd.f32 %v4140_v60, %v5178_v3  ;;  %v1471_v63 = vpop.f32.mrb[67].mxu0  ;;  %v1556_v24 = vmul.f32 %v5223_v4, %v5223_v4 }
 0x230   :  { %v5232_v29 = vadd.f32 %v1471_v63, %v5171_v30  ;;  %v1554_v6 = vmul.f32 %v5226_v12, %v5226_v12 }
 0x231   :  { %v1557_v19 = vmul.f32 %v5229_v14, %v5229_v14 }
 0x232   :  { %v1533_v9 = vadd.f32 %v5232_v29, %v5226_v12  ;;  %v1555_v57 = vmul.f32 %v5232_v29, %v5232_v29 }
 0x234   :  { %v1534_v7 = vadd.f32 %v1533_v9, %v5223_v4  ;;  %v1570_v3 = vadd.f32 %v1555_v57, %v1554_v6  ;;  %v4143_v0 = vpop.f32.mrb[68].mxu0 }
 0x235   :  { %v5244_v16 = vadd.f32 %v4143_v0, %v5192_v54  ;;  %v1484_v30 = vpop.f32.mrb[69].mxu0 }
 0x236   :  { %v1571_v20 = vadd.f32 %v1570_v3, %v1556_v24  ;;  %v5249_v49 = vadd.f32 %v1484_v30, %v5184_v13  ;;  %v1535_v21 = vadd.f32 %v1534_v7, %v5229_v14  ;;  %v4144_v26 = vpop.f32.mrb[70].mxu0 }
 0x237   :  { %v5253_v31 = vadd.f32 %v4144_v26, %v5196_v55  ;;  %v1487_v32 = vpop.f32.mrb[71].mxu0  ;;  %v1560_v55 = vmul.f32 %v5244_v16, %v5244_v16 }
 0x238   :  { %v1536_v53 = vadd.f32 %v1535_v21, %v5249_v49  ;;  %v1558_v54 = vmul.f32 %v5249_v49, %v5249_v49  ;;  %v1572_v36 = vadd.f32 %v1571_v20, %v1557_v19  ;;  %v5259_v37 = vadd.f32 %v1487_v32, %v5186_v15 }
 0x239   :  { %v1561_v15 = vmul.f32 %v5253_v31, %v5253_v31 }
 0x23a   :  { %v1573_v39 = vadd.f32 %v1572_v36, %v1558_v54  ;;  %v1537_v13 = vadd.f32 %v1536_v53, %v5259_v37  ;;  %v1559_v41 = vmul.f32 %v5259_v37, %v5259_v37 }
 0x23c   :  { %v1538_v42 = vadd.f32 %v1537_v13, %v5244_v16  ;;  %v1574_v25 = vadd.f32 %v1573_v39, %v1559_v41  ;;  %v4147_v44 = vpop.f32.mrb[72].mxu0 }
 0x23d   :  { %v5268_v38 = vadd.f32 %v4147_v44, %v5210_v33  ;;  %v1500_v51 = vpop.f32.mrb[73].mxu0 }
 0x23e   :  { %v1575_v52 = vadd.f32 %v1574_v25, %v1560_v55  ;;  %v5273_v22 = vadd.f32 %v1500_v51, %v5202_v11  ;;  %v1539_v1 = vadd.f32 %v1538_v42, %v5253_v31  ;;  %v4148_v40 = vpop.f32.mrb[74].mxu0 }
 0x23f   :  { %v5277_v56 = vadd.f32 %v4148_v40, %v5212_v59  ;;  %v1503_v43 = vpop.f32.mrb[75].mxu0  ;;  %v1564_v11 = vmul.f32 %v5268_v38, %v5268_v38 }
 0x240   :  { %v1540_v10 = vadd.f32 %v1539_v1, %v5273_v22  ;;  %v1562_v33 = vmul.f32 %v5273_v22, %v5273_v22  ;;  %v1576_v18 = vadd.f32 %v1575_v52, %v1561_v15  ;;  %v1504_v27 = vadd.f32 %v1503_v43, %v5204_v62 }
 0x241   :  { %v1565_v46 = vmul.f32 %v5277_v56, %v5277_v56  ;;  %v1602_v43 = vlaneseq }
 0x242   :  { %v1577_v5 = vadd.f32 %v1576_v18, %v1562_v33  ;;  %v1541_v34 = vadd.f32 %v1540_v10, %v1504_v27  ;;  %v1563_v35 = vmul.f32 %v1504_v27, %v1504_v27  ;;  %v1531_v33 = vld [vmem:[#allocation9] sm:$0x1] }
 0x243   :  { %v5291_v10 = vshrl.u32 %v1602_v43, 7 }
 0x244   :  { %v1542_v47 = vadd.f32 %v1541_v34, %v5268_v38  ;;  %v1578_v48 = vadd.f32 %v1577_v5, %v1563_v35  ;;  %v4151_v59 = vpop.f32.mrb[76].mxu0  ;;  %v1532_v35 = vld [vmem:[#allocation11] sm:$0x1] }
 0x245   :  { %v1525_v50 = vadd.f32 %v4151_v59, %v1428_v61  ;;  %v1516_v45 = vpop.f32.mrb[77].mxu0  ;;  %v5294_v18 = vsub.s32 0, %v5291_v10 }
 0x246   :  { %v1579_v17 = vadd.f32 %v1578_v48, %v1564_v11  ;;  %v1517_v23 = vadd.f32 %v1516_v45, %v5216_v28  ;;  %v1543_v62 = vadd.f32 %v1542_v47, %v5277_v56  ;;  %v4152_v8 = vpop.f32.mrb[78].mxu0 }
 0x247   :  { %v1528_v60 = vadd.f32 %v4152_v8, %v1431_v58  ;;  %v1519_v63 = vpop.f32.mrb[79].mxu0  ;;  %v1568_v0 = vmul.f32 %v1525_v50, %v1525_v50 }
 0x248   :  { %v1544_v6 = vadd.f32 %v1543_v62, %v1517_v23  ;;  %v1566_v9 = vmul.f32 %v1517_v23, %v1517_v23  ;;  %v1580_v57 = vadd.f32 %v1579_v17, %v1565_v46  ;;  %v1520_v24 = vadd.f32 %v1519_v63, %v5218_v2 }
 0x249   :  { %v1569_v20 = vmul.f32 %v1528_v60, %v1528_v60 }
 0x24a   :  { %v1581_v7 = vadd.f32 %v1580_v57, %v1566_v9  ;;  %v1545_v3 = vadd.f32 %v1544_v6, %v1520_v24  ;;  %v1567_v61 = vmul.f32 %v1520_v24, %v1520_v24 }
 0x24c   :  { %v1546_v30 = vadd.f32 %v1545_v3, %v1525_v50  ;;  %v1582_v19 = vadd.f32 %v1581_v7, %v1567_v61 }
 0x24e   :  { %v1547_v21 = vadd.f32 %v1546_v30, %v1528_v60  ;;  %v1583_v26 = vadd.f32 %v1582_v19, %v1568_v0 }
 0x250   :  { %v1548_v28 = vrot.slane %v1547_v21, 4  ;;  %v1584_v32 = vadd.f32 %v1583_v26, %v1569_v20 }
 0x252   :  { %v1549_v53 = vadd.f32 %v1548_v28, %v1547_v21  ;;  %v1585_v54 = vrot.slane %v1584_v32, 4 }
 0x254   :  { %v1550_v58 = vrot.slane %v1549_v53, 2  ;;  %v1586_v36 = vadd.f32 %v1585_v54, %v1584_v32 }
 0x256   :  { %v1551_v39 = vadd.f32 %v1550_v58, %v1549_v53  ;;  %v1587_v13 = vrot.slane %v1586_v36, 2 }
 0x258   :  { %v1552_v41 = vrot.slane %v1551_v39, 1  ;;  %v1588_v55 = vadd.f32 %v1587_v13, %v1586_v36 }
 0x25a   :  { %v1553_v2 = vadd.f32 %v1552_v41, %v1551_v39  ;;  %v1589_v42 = vrot.slane %v1588_v55, 1 }
 0x25c   :  { %v1590_v25 = vadd.f32 %v1589_v42, %v1588_v55  ;;  %v1591_v44 = vmul.f32 0.0078125, %v1553_v2 }
 0x25e   :  { %v1592_v51 = vmul.f32 0.0078125, %v1590_v25  ;;  %v1593_v15 = vmul.f32 %v1591_v44, %v1591_v44 }
 0x260   :  { %v1594_v52 = vsub.f32 %v1592_v51, %v1593_v15 }
 0x262   :  { %v1595_v1 = vmax.f32 %v1594_v52, 0.0 }
 0x264   :  { %v1596_v40 = vadd.f32 1e-05, %v1595_v1 }
 0x266   :  { %4442 = vrsqrt.f32 %v1596_v40 }
 0x270   :  { %v4443_v5 = vpop.eup %4442 }
 0x271   :  { %v1598_v34 = vmul.f32 %v4443_v5, %v1531_v33 }
 0x273   :  { %v1599_v11 = vmul.f32 %v1598_v34, %v1591_v44  ;;  %v1605_v47 = vrot.slane %v1598_v34, %v5294_v18 }
 0x275   :  { %v1600_v48 = vsub.f32 %v1532_v35, %v1599_v11  ;;  %v1615_v59 = vmul.f32 %v1605_v47, %v5273_v22  ;;  %v1616_v45 = vmul.f32 %v1605_v47, %v1504_v27  ;;  %v1617_v46 = vmul.f32 %v1605_v47, %v5268_v38 }
 0x276   :  { %v1618_v17 = vmul.f32 %v1605_v47, %v5277_v56  ;;  %v1619_v62 = vmul.f32 %v1605_v47, %v1517_v23  ;;  %v1620_v8 = vmul.f32 %v1605_v47, %v1520_v24  ;;  %v1621_v63 = vmul.f32 %v1605_v47, %v1525_v50 }
 0x277   :  { %v1622_v6 = vmul.f32 %v1605_v47, %v1528_v60  ;;  %v1627_v9 = vrot.slane %v1600_v48, %v5294_v18  ;;  %v1607_v57 = vmul.f32 %v1605_v47, %v5226_v12  ;;  %v1608_v7 = vmul.f32 %v1605_v47, %v5232_v29 }
 0x278   :  { %v1609_v3 = vmul.f32 %v1605_v47, %v5223_v4  ;;  %v1610_v61 = vmul.f32 %v1605_v47, %v5229_v14  ;;  %v1611_v22 = vmul.f32 %v1605_v47, %v5249_v49  ;;  %v1612_v38 = vmul.f32 %v1605_v47, %v5259_v37 }
 0x279   :  { %v5307_v27 = vadd.f32 %v1627_v9, %v1615_v59  ;;  %v5309_v56 = vadd.f32 %v1627_v9, %v1616_v45  ;;  %v5311_v50 = vadd.f32 %v1627_v9, %v1617_v46  ;;  %v5313_v23 = vadd.f32 %v1627_v9, %v1618_v17  ;;  %v5357_v59 = vld [vmem:[#allocation2] sm:$0xff] }
 0x27a   :  { %v5315_v60 = vadd.f32 %v1627_v9, %v1619_v62  ;;  %v5317_v12 = vadd.f32 %v1627_v9, %v1620_v8  ;;  %v5319_v29 = vadd.f32 %v1627_v9, %v1621_v63  ;;  %v5321_v4 = vadd.f32 %v1627_v9, %v1622_v6  ;;  %v1766_v45 = vld [vmem:[#allocation14] sm:$0xff]  ;;  %v4370_v8 = vld [vmem:[#allocation15 + $0x40] sm:$0xff]  }
 0x27b   :  { %v1658_v14 = vadd.f32 %v5309_v56, %v5307_v27  ;;  %v1613_v49 = vmul.f32 %v1605_v47, %v5244_v16  ;;  %v1614_v37 = vmul.f32 %v1605_v47, %v5253_v31  ;;  %v5327_v24 = vadd.f32 %v1627_v9, %v1607_v57  ;;  %v4371_v63 = vld [vmem:[#allocation15 + $0xc0] sm:$0xff]   ;;  %3849 = vmatprep.subr.bf16.mxu0 %v4370_v8  ;;  %v4374_v57 = vld [vmem:[#allocation15 + $0x48] sm:$0xff]  }
 0x27c   :  { %v5329_v0 = vadd.f32 %v1627_v9, %v1608_v7  ;;  %v5331_v30 = vadd.f32 %v1627_v9, %v1609_v3  ;;  %v5333_v19 = vadd.f32 %v1627_v9, %v1610_v61  ;;  %v5335_v20 = vadd.f32 %v1627_v9, %v1611_v22  ;;  %v4372_v6 = vld [vmem:[#allocation15] sm:$0xff]   ;;  %v4375_v7 = vld [vmem:[#allocation15 + $0xc8] sm:$0xff]   ;;  %v4378_v22 = vld [vmem:[#allocation15 + $0x50] sm:$0xff]  }
 0x27d   :  { %v1659_v21 = vadd.f32 %v1658_v14, %v5311_v50  ;;  %v5338_v26 = vadd.f32 %v1627_v9, %v1612_v38  ;;  %v5340_v28 = vadd.f32 %v1627_v9, %v1613_v49  ;;  %v5342_v32 = vadd.f32 %v1627_v9, %v1614_v37  ;;  %v4373_v9 = vld [vmem:[#allocation15 + $0x80] sm:$0xff]   ;;  %3850 = vmatpush3.bf16.msra.mxu0 %v4372_v6  ;;  %v4376_v3 = vld [vmem:[#allocation15 + $0x8] sm:$0xff]   ;;  %v4379_v38 = vld [vmem:[#allocation15 + $0xd0] sm:$0xff]  }
 0x27e   :  { %v1645_v16 = vadd.f32 %v5329_v0, %v5327_v24  ;;  %3851 = vmatprep.subr.bf16.mxu0 %v4374_v57  ;;  %v4377_v61 = vld [vmem:[#allocation15 + $0x88] sm:$0xff]   ;;  %v4380_v14 = vld [vmem:[#allocation15 + $0x10] sm:$0xff]   ;;  %v4382_v37 = vld [vmem:[#allocation15 + $0x58] sm:$0xff]  }
 0x27f   :  { %v1660_v31 = vadd.f32 %v1659_v21, %v5313_v23  ;;  %v4381_v49 = vld [vmem:[#allocation15 + $0x90] sm:$0xff]   ;;  %v4383_v21 = vld [vmem:[#allocation15 + $0xd8] sm:$0xff]  }
 0x280   :  { %v1646_v53 = vadd.f32 %v1645_v16, %v5331_v30  ;;  %v4384_v16 = vld [vmem:[#allocation15 + $0x18] sm:$0xff]  }
 0x281   :  { %v1661_v54 = vadd.f32 %v1660_v31, %v5315_v60  ;;  %3852 = vmatpush3.bf16.msra.mxu0 %v4376_v3  ;;  %v4385_v31 = vld [vmem:[#allocation15 + $0x98] sm:$0xff]  }
 0x282   :  { %v1647_v58 = vadd.f32 %v1646_v53, %v5333_v19  ;;  %3853 = vmatprep.subr.bf16.mxu0 %v4378_v22  ;;  %v4386_v53 = vld [vmem:[#allocation15 + $0x60] sm:$0xff]  }
 0x283   :  { %v1662_v36 = vadd.f32 %v1661_v54, %v5317_v12  ;;  %v4387_v54 = vld [vmem:[#allocation15 + $0xe0] sm:$0xff]  }
 0x284   :  { %v1648_v39 = vadd.f32 %v1647_v58, %v5335_v20  ;;  %v4388_v58 = vld [vmem:[#allocation15 + $0x20] sm:$0xff]  }
 0x285   :  { %v1663_v13 = vadd.f32 %v1662_v36, %v5319_v29  ;;  %3854 = vmatpush3.bf16.msra.mxu0 %v4380_v14  ;;  %v4389_v36 = vld [vmem:[#allocation15 + $0xa0] sm:$0xff]  }
 0x286   :  { %v1649_v41 = vadd.f32 %v1648_v39, %v5338_v26  ;;  %3855 = vmatprep.subr.bf16.mxu0 %v4382_v37  ;;  %v4390_v39 = vld [vmem:[#allocation15 + $0x68] sm:$0xff]  }
 0x287   :  { %v1664_v55 = vadd.f32 %v1663_v13, %v5321_v4  ;;  %v4391_v13 = vld [vmem:[#allocation15 + $0xe8] sm:$0xff]  }
 0x288   :  { %v1650_v2 = vadd.f32 %v1649_v41, %v5340_v28  ;;  %v4392_v41 = vld [vmem:[#allocation15 + $0x28] sm:$0xff]  }
 0x289   :  { %v1665_v42 = vrot.slane %v1664_v55, 4  ;;  %3856 = vmatpush3.bf16.msra.mxu0 %v4384_v16 }
 0x28a   :  { %v1651_v25 = vadd.f32 %v1650_v2, %v5342_v32  ;;  %3857 = vmatprep.subr.bf16.mxu0 %v4386_v53  ;;  %v4394_v2 = vld [vmem:[#allocation15 + $0x70] sm:$0xff]  }
 0x28b   :  { %v1666_v44 = vadd.f32 %v1665_v42, %v1664_v55  ;;  %v4393_v55 = vld [vmem:[#allocation15 + $0xa8] sm:$0xff]   ;;  %v4395_v42 = vld [vmem:[#allocation15 + $0xf0] sm:$0xff]  }
 0x28c   :  { %v1652_v51 = vrot.slane %v1651_v25, 4 }
 0x28d   :  { %v1667_v15 = vrot.slane %v1666_v44, 2  ;;  %3858 = vmatpush3.bf16.msra.mxu0 %v4388_v58 }
 0x28e   :  { %v1653_v52 = vadd.f32 %v1652_v51, %v1651_v25  ;;  %3859 = vmatprep.subr.bf16.mxu0 %v4390_v39  ;;  %v4396_v25 = vld [vmem:[#allocation15 + $0x30] sm:$0xff]   ;;  %v4398_v51 = vld [vmem:[#allocation15 + $0x78] sm:$0xff]  }
 0x28f   :  { %v1668_v1 = vadd.f32 %v1667_v15, %v1666_v44  ;;  %v4397_v44 = vld [vmem:[#allocation15 + $0xb0] sm:$0xff]   ;;  %v4399_v15 = vld [vmem:[#allocation15 + $0xf8] sm:$0xff]  }
 0x290   :  { %v1654_v40 = vrot.slane %v1653_v52, 2 }
 0x291   :  { %v1669_v43 = vrot.slane %v1668_v1, 1  ;;  %3860 = vmatpush3.bf16.msra.mxu0 %v4392_v41 }
 0x292   :  { %v1655_v33 = vadd.f32 %v1654_v40, %v1653_v52  ;;  %3861 = vmatprep.subr.bf16.mxu0 %v4394_v2  ;;  %v4400_v52 = vld [vmem:[#allocation15 + $0x38] sm:$0xff]   ;;  %v4402_v40 = vld [vmem:[#allocation15 + $0x140] sm:$0xff]  }
 0x293   :  { %v1670_v5 = vadd.f32 %v1669_v43, %v1668_v1  ;;  %v4401_v1 = vld [vmem:[#allocation15 + $0xb8] sm:$0xff]   ;;  %v4409_v43 = vld [vmem:[#allocation15 + $0x1c0] sm:$0xff]  }
 0x294   :  { %v1656_v34 = vrot.slane %v1655_v33, 1  ;;  %v4411_v2 = vld [vmem:[#allocation15 + $0x180] sm:$0xff]  }
 0x295   :  { %v1673_v11 = vmul.f32 0.015625, %v1670_v5  ;;  %3862 = vmatpush3.bf16.msra.mxu0 %v4396_v25  ;;  %v4413_v25 = vld [vmem:[#allocation15 + $0x1c8] sm:$0xff]  }
 0x296   :  { %v1657_v35 = vadd.f32 %v1656_v34, %v1655_v33  ;;  %3863 = vmatprep.subr.bf16.mxu0 %v4398_v51  ;;  %v4406_v51 = vld [vmem:[#allocation15 + $0x150] sm:$0xff]  }
 0x298   :  { %v1672_v47 = vmul.f32 0.015625, %v1657_v35 }
 0x299   :  { %3864 = vmatpush3.bf16.msra.mxu0 %v4400_v52 }
 0x29a   :  { %v1693_v48 = vsel %vm1692_vm1, %v1673_v11, %v1672_v47  ;;  %3977 = vmatprep.subr.bf16.mxu0 %v4402_v40  ;;  %v4725_v47 = vmov 1966171168   ;;  %v4417_v40 = vld [vmem:[#allocation15 + $0x1d0] sm:$0xff]  }
 0x29b   :  { %4186 = vmatmul.mubr.f32.vlgmr.msra.gmra.mrb[64].mxu1 %v1693_v48  ;;  %v1849_v48 = vunpack.c.l.s4 %v4725_v47  ;;  %v4408_v47 = vld [vmem:[#allocation15 + $0x158] sm:$0xff]  }
 0x29c   :  { %4190 = vmatprep.mubr.msk.f32.mxu1 %vm4724_vm0, %v5357_v59  ;;  %4189 = vmatpush3.msra.mxu1 %v1766_v45 }
 0x29d   :  { %3913 = vmatprep.subr.bf16.mxu1 %v4371_v63  ;;  %v1850_v45 = vunpack.c.0.s8 %v1849_v48  ;;  %v4419_v48 = vld [vmem:[#allocation15 + $0x190] sm:$0xff]  }
 0x36e   :  { %v1761_v46 = vpop.f32.mrb[64].mxu1 }
 0x36f   :  { %v1765_v17 = vmax.f32 %v1761_v46, 0.0  ;;  %v4187_v62 = vpop.f32.mrb[65].mxu1  ;;  %v1853_v46 = vsub.s32 %v1850_v45, %v5291_v10 }
 0x371   :  { %4191 = vmatmul.mubr.msk.f32.vlgmr.msra.gmra.mrb[66].mxu1 %vm1767_vm2, %v1765_v17 }
 0x372   :  { %3914 = vmatpush3.bf16.msra.mxu1 %v4373_v9 }
 0x373   :  { %3915 = vmatprep.subr.bf16.mxu1 %v4375_v7 }
 0x376   :  { %3916 = vmatpush3.bf16.msra.mxu1 %v4377_v61 }
 0x377   :  { %3917 = vmatprep.subr.bf16.mxu1 %v4379_v38 }
 0x37a   :  { %3918 = vmatpush3.bf16.msra.mxu1 %v4381_v49 }
 0x37b   :  { %3919 = vmatprep.subr.bf16.mxu1 %v4383_v21 }
 0x37e   :  { %3920 = vmatpush3.bf16.msra.mxu1 %v4385_v31 }
 0x37f   :  { %3921 = vmatprep.subr.bf16.mxu1 %v4387_v54 }
 0x382   :  { %3922 = vmatpush3.bf16.msra.mxu1 %v4389_v36 }
 0x383   :  { %3923 = vmatprep.subr.bf16.mxu1 %v4391_v13  ;;  %v4403_v13 = vld [vmem:[#allocation15 + $0x100] sm:$0xff]  }
 0x386   :  { %3924 = vmatpush3.bf16.msra.mxu1 %v4393_v55  ;;  %v4404_v55 = vld [vmem:[#allocation15 + $0x148] sm:$0xff]  }
 0x387   :  { %3925 = vmatprep.subr.bf16.mxu1 %v4395_v42 }
 0x38a   :  { %3926 = vmatpush3.bf16.msra.mxu1 %v4397_v44  ;;  %v4405_v44 = vld [vmem:[#allocation15 + $0x108] sm:$0xff]  }
 0x38b   :  { %3927 = vmatprep.subr.bf16.mxu1 %v4399_v15  ;;  %v4415_v15 = vld [vmem:[#allocation15 + $0x188] sm:$0xff]  }
 0x38e   :  { %3928 = vmatpush3.bf16.msra.mxu1 %v4401_v1 }
 0x38f   :  { %4041 = vmatprep.subr.bf16.mxu1 %v4409_v43 }
 0x444   :  { %v1837_v33 = vpop.f32.mrb[66].mxu1 }
 0x445   :  { %v3446_v5 = vmul.f32 -1.442695, %v1837_v33  ;;  %v4192_v34 = vpop.f32.mrb[67].mxu1 }
 0x446   :  { %v4407_v34 = vld [vmem:[#allocation15 + $0x110] sm:$0xff]  }
 0x447   :  { %4444 = vpow2.f32 %v3446_v5 }
 0x451   :  { %v4445_v35 = vpop.eup %4444 }
 0x452   :  { %v1844_v11 = vadd.f32 1.0, %v4445_v35 }
 0x454   :  { %4446 = vrcp.f32 %v1844_v11 }
 0x45e   :  { %v4447_v17 = vpop.eup %4446 }
 0x45f   :  { %v1854_v62 = vrot.slane %v4447_v17, %v1853_v46  ;;  %v4410_v17 = vld [vmem:[#allocation15 + $0x118] sm:$0xff]  }
 0x461   :  { %v1855_v8 = vcombine.high %v1854_v62, %v1854_v62  ;;  %v1862_v63 = vrot.slane %v1854_v62, %v1853_v46  ;;  %v4412_v62 = vld [vmem:[#allocation15 + $0x160] sm:$0xff]  }
 0x463   :  { %v1869_v6 = vrot.slane %v1855_v8, %v1853_v46  ;;  %v1873_v9 = vrot.slane %v1862_v63, %v5294_v18  ;;  %v4420_v46 = vld [vmem:[#allocation15 + $0x1d8] sm:$0xff]  }
 0x464   :  { %v4421_v8 = vld [vmem:[#allocation15 + $0x198] sm:$0xff]  }
 0x465   :  { %v1877_v57 = vrot.slane %v1869_v6, %v5294_v18  ;;  %v5365_v7 = vmul.f32 %v1873_v9, %v5327_v24  ;;  %v5368_v3 = vmul.f32 %v1873_v9, %v5329_v0  ;;  %v5371_v61 = vmul.f32 %v1873_v9, %v5331_v30  ;;  %v1936_v24 = vld [vmem:[#allocation2 + $0x1] sm:$0xff] }
 0x466   :  { %v5374_v10 = vmul.f32 %v1873_v9, %v5333_v19  ;;  %v5377_v22 = vmul.f32 %v1873_v9, %v5335_v20  ;;  %v5380_v38 = vmul.f32 %v1873_v9, %v5338_v26  ;;  %v5383_v14 = vmul.f32 %v1873_v9, %v5340_v28 }
 0x467   :  { %v5386_v49 = vmul.f32 %v1873_v9, %v5342_v32  ;;  %v5389_v0 = vmul.f32 %v1877_v57, %v5307_v27  ;;  %v5392_v30 = vmul.f32 %v1877_v57, %v5309_v56  ;;  %v5395_v19 = vmul.f32 %v1877_v57, %v5311_v50  ;;  %1896 = vst [vmem:[#allocation2 + $0x11] sm:$0xff] %v5365_v7  ;;  %v4423_v9 = vld [vmem:[#allocation15 + $0x1e0] sm:$0xff]  }
 0x468   :  { %1897 = vst [vmem:[#allocation2 + $0x21] sm:$0xff] %v5368_v3  ;;  %1898 = vst [vmem:[#allocation2 + $0x31] sm:$0xff] %v5371_v61  ;;  %v5401_v20 = vmul.f32 %v1877_v57, %v5313_v23  ;;  %v5404_v26 = vmul.f32 %v1877_v57, %v5315_v60  ;;  %v5407_v27 = vmul.f32 %v1877_v57, %v5317_v12 }
 0x469   :  { %v5410_v56 = vmul.f32 %v1877_v57, %v5319_v29  ;;  %1899 = vst [vmem:[#allocation2 + $0x41] sm:$0xff] %v5374_v10  ;;  %1900 = vst [vmem:[#allocation2 + $0x51] sm:$0xff] %v5377_v22  ;;  %v1895_v50 = vmul.f32 %v1877_v57, %v5321_v4  ;;  %v1952_v23 = vpack.c.bf16 %v5365_v7, %v1936_v24  ;;  %v1960_v4 = vld [vmem:[#allocation2 + $0x2] sm:$0xff] }
 0x46a   :  { %1901 = vst [vmem:[#allocation2 + $0x61] sm:$0xff] %v5380_v38  ;;  %1902 = vst [vmem:[#allocation2 + $0x71] sm:$0xff] %v5383_v14  ;;  %v2024_v60 = vpack.c.bf16 %v5368_v3, %v5365_v7  ;;  %v2025_v12 = vpack.c.bf16 %v5374_v10, %v5371_v61  ;;  %v2026_v29 = vpack.c.bf16 %v5380_v38, %v5377_v22  ;;  %v4438_v7 = vld [vmem:[#allocation15 + $0x220] sm:$0xff]  }
 0x46b   :  { %1903 = vst [vmem:[#allocation2 + $0x81] sm:$0xff] %v5386_v49  ;;  %1904 = vst [vmem:[#allocation2 + $0xb1] sm:$0xff] %v5389_v0  ;;  %2736 = vmatprep.mubr.bf16.mxu0 %v1952_v23  ;;  %v2027_v28 = vpack.c.bf16 %v5386_v49, %v5383_v14  ;;  %v2028_v32 = vpack.c.bf16 %v5392_v30, %v5389_v0  ;;  %v2029_v37 = vpack.c.bf16 %v5401_v20, %v5395_v19  ;;  %v4414_v23 = vld [vmem:[#allocation15 + $0x120] sm:$0xff]  }
 0x46c   :  { %1905 = vst [vmem:[#allocation2 + $0xc1] sm:$0xff] %v5392_v30  ;;  %1906 = vst [vmem:[#allocation2 + $0xd1] sm:$0xff] %v5395_v19  ;;  %v5444_v41 = vpack.c.bf16 %v5371_v61, %v5368_v3  ;;  %v5459_v11 = vpack.c.bf16 %v5377_v22, %v5374_v10  ;;  %v4439_v61 = vld [vmem:[#allocation15 + $0x228] sm:$0xff]  }
 0x46d   :  { %1907 = vst [vmem:[#allocation2 + $0xe1] sm:$0xff] %v5401_v20  ;;  %1908 = vst [vmem:[#allocation2 + $0xf1] sm:$0xff] %v5404_v26 }
 0x46e   :  { %1909 = vst [vmem:[#allocation2 + $0x101] sm:$0xff] %v5407_v27  ;;  %1910 = vst [vmem:[#allocation2 + $0x111] sm:$0xff] %v5410_v56  ;;  %v1984_v21 = vld [vmem:[#allocation2 + $0x10] sm:$0xff] }
 0x46f   :  { %1911 = vst [vmem:[#allocation2 + $0x121] sm:$0xff] %v1895_v50  ;;  %v1985_v16 = vld [vmem:[#allocation2 + $0x20] sm:$0xff]  ;;  %v5438_v31 = vld [vmem:[#allocation2 + $0x12] sm:$0xff]  ;;  %v1928_v54 = vpack.c.bf16 %v1984_v21, %v5357_v59 }
 0x470   :  { %v2000_v53 = vpack.c.bf16 %v1985_v16, %v1984_v21  ;;  %v1976_v58 = vpack.c.bf16 %v5438_v31, %v1960_v4  ;;  %v1986_v36 = vld [vmem:[#allocation2 + $0x30] sm:$0xff]  ;;  %v1987_v39 = vld [vmem:[#allocation2 + $0x40] sm:$0xff]  ;;  %v5478_v21 = vpack.c.bf16 %v5383_v14, %v5380_v38 }
 0x471   :  { %2737 = vmatmul.mubr.bf16.vlgmr.msra.gmra.mrb[80].mxu0 %v1928_v54  ;;  %v2001_v42 = vpack.c.bf16 %v1987_v39, %v1986_v36  ;;  %v5447_v52 = vld [vmem:[#allocation2 + $0x22] sm:$0xff]  ;;  %v5449_v1 = vld [vmem:[#allocation2 + $0x32] sm:$0xff]  ;;  %v5451_v5 = vpack.c.bf16 %v1986_v36, %v1985_v16 }
 0x472   :  { %2833 = vmatprep.mubr.bf16.mxu1 %v2000_v53  ;;  %2744 = vmatprep.mubr.bf16.mxu0 %v5444_v41  ;;  %v1988_v43 = vld [vmem:[#allocation2 + $0x50] sm:$0xff]  ;;  %v1989_v33 = vld [vmem:[#allocation2 + $0x60] sm:$0xff]  ;;  %v5455_v35 = vpack.c.bf16 %v5449_v1, %v5447_v52 }
 0x473   :  { %2834 = vmatmul.mubr.bf16.vlgmr.msra.gmra.mrb[68].mxu1 %v1976_v58  ;;  %3978 = vmatpush3.bf16.msra.mxu0 %v4403_v13  ;;  %v2002_v45 = vpack.c.bf16 %v1989_v33, %v1988_v43  ;;  %v5464_v63 = vld [vmem:[#allocation2 + $0x42] sm:$0xff]  ;;  %v5466_v6 = vld [vmem:[#allocation2 + $0x52] sm:$0xff]  ;;  %v5470_v50 = vpack.c.bf16 %v1988_v43, %v1987_v39 }
 0x474   :  { %2841 = vmatprep.mubr.bf16.mxu1 %v2001_v42  ;;  %3979 = vmatprep.subr.bf16.mxu0 %v4404_v55  ;;  %v1990_v57 = vld [vmem:[#allocation2 + $0x70] sm:$0xff]  ;;  %v5468_v24 = vld [vmem:[#allocation2 + $0x80] sm:$0xff]  ;;  %v5474_v4 = vpack.c.bf16 %v5466_v6, %v5464_v63 }
 0x475   :  { %4042 = vmatpush3.bf16.msra.mxu1 %v4411_v2  ;;  %v4416_v16 = vld [vmem:[#allocation15 + $0x168] sm:$0xff]   ;;  %v4425_v53 = vld [vmem:[#allocation15 + $0x1a0] sm:$0xff]   ;;  %v2003_v54 = vpack.c.bf16 %v5468_v24, %v1990_v57  ;;  %v1944_v39 = vld [vmem:[#allocation2 + $0xa1] sm:$0xff] }
 0x476   :  { %4043 = vmatprep.subr.bf16.mxu1 %v4413_v25  ;;  %v4426_v58 = vld [vmem:[#allocation15 + $0x1e8] sm:$0xff]   ;;  %v4422_v13 = vld [vmem:[#allocation15 + $0x170] sm:$0xff]   ;;  %v4441_v38 = vld [vmem:[#allocation15 + $0x238] sm:$0xff]  }
 0x477   :  { %3980 = vmatpush3.bf16.msra.mxu0 %v4405_v44  ;;  %v4418_v36 = vld [vmem:[#allocation15 + $0x128] sm:$0xff]   ;;  %v5484_v2 = vld [vmem:[#allocation2 + $0x62] sm:$0xff] }
 0x478   :  { %3981 = vmatprep.subr.bf16.mxu0 %v4406_v51  ;;  %v4427_v55 = vld [vmem:[#allocation15 + $0x1a8] sm:$0xff]   ;;  %v4429_v25 = vld [vmem:[#allocation15 + $0x1f0] sm:$0xff]  }
 0x479   :  { %4044 = vmatpush3.bf16.msra.mxu1 %v4415_v15  ;;  %2745 = vmatmul.mubr.bf16.gmra.mrb[84].mxu0 %v5451_v5  ;;  %v5486_v42 = vld [vmem:[#allocation2 + $0x72] sm:$0xff]  ;;  %v1993_v51 = vld [vmem:[#allocation2 + $0xc0] sm:$0xff]  ;;  %v5488_v15 = vpack.c.bf16 %v1990_v57, %v1989_v33 }
 0x47a   :  { %4045 = vmatprep.subr.bf16.mxu1 %v4417_v40  ;;  %2752 = vmatprep.mubr.bf16.mxu0 %v5459_v11  ;;  %v1992_v44 = vld [vmem:[#allocation2 + $0xb0] sm:$0xff]  ;;  %v4424_v40 = vld [vmem:[#allocation15 + $0x130] sm:$0xff]   ;;  %v5492_v43 = vpack.c.bf16 %v5486_v42, %v5484_v2  ;;  %v4430_v33 = vld [vmem:[#allocation15 + $0x138] sm:$0xff]  }
 0x47b   :  { %2842 = vmatmul.mubr.bf16.gmra.mrb[72].mxu1 %v5455_v35  ;;  %3982 = vmatpush3.bf16.msra.mxu0 %v4407_v34  ;;  %v1956_v34 = vpack.c.bf16 %v5389_v0, %v1944_v39  ;;  %v1994_v57 = vld [vmem:[#allocation2 + $0xd0] sm:$0xff]  ;;  %v5569_v3 = vld [vmem:[#allocation2 + $0x82] sm:$0xff] }
 0x47c   :  { %2849 = vmatprep.mubr.bf16.mxu1 %v2002_v45  ;;  %3983 = vmatprep.subr.bf16.mxu0 %v4408_v47  ;;  %v4428_v47 = vld [vmem:[#allocation15 + $0x178] sm:$0xff]   ;;  %v2004_v45 = vpack.c.bf16 %v1993_v51, %v1992_v44  ;;  %v5508_v39 = vld [vmem:[#allocation2 + $0xd2] sm:$0xff] }
 0x47d   :  { %4046 = vmatpush3.bf16.msra.mxu1 %v4419_v48  ;;  %v4431_v48 = vld [vmem:[#allocation15 + $0x1b0] sm:$0xff]   ;;  %v2020_v0 = vld [vmem:[#allocation2 + $0xf1] sm:$0xff] }
 0x47e   :  { %4047 = vmatprep.subr.bf16.mxu1 %v4420_v46  ;;  %v4432_v46 = vld [vmem:[#allocation15 + $0x1f8] sm:$0xff]  }
 0x47f   :  { %3984 = vmatpush3.bf16.msra.mxu0 %v4410_v17  ;;  %v4433_v17 = vld [vmem:[#allocation15 + $0x1b8] sm:$0xff]  }
 0x480   :  { %3985 = vmatprep.subr.bf16.mxu0 %v4412_v62  ;;  %v4434_v62 = vld [vmem:[#allocation15 + $0x200] sm:$0xff]   ;;  %v2092_v14 = vld [vmem:[#allocation2 + $0x101] sm:$0xff] }
 0x481   :  { %4048 = vmatpush3.bf16.msra.mxu1 %v4421_v8  ;;  %2753 = vmatmul.mubr.bf16.gmra.mrb[88].mxu0 %v5470_v50  ;;  %v1968_v8 = vld [vmem:[#allocation2 + $0xa2] sm:$0xff] }
 0x482   :  { %4049 = vmatprep.subr.bf16.mxu1 %v4423_v9  ;;  %2760 = vmatprep.mubr.bf16.mxu0 %v5478_v21  ;;  %v5497_v9 = vld [vmem:[#allocation2 + $0xb2] sm:$0xff] }
 0x483   :  { %2850 = vmatmul.mubr.bf16.gmra.mrb[76].mxu1 %v5474_v4  ;;  %3986 = vmatpush3.bf16.msra.mxu0 %v4414_v23  ;;  %v1995_v23 = vld [vmem:[#allocation2 + $0xe0] sm:$0xff] }
 0x484   :  { %2857 = vmatprep.mubr.bf16.mxu1 %v2003_v54  ;;  %3987 = vmatprep.subr.bf16.mxu0 %v4416_v16  ;;  %v1932_v16 = vpack.c.bf16 %v1992_v44, %v5357_v59  ;;  %v5503_v54 = vpack.c.bf16 %v5395_v19, %v5392_v30  ;;  %v2047_v30 = vld [vmem:[#allocation2 + $0x122] sm:$0xff] }
 0x485   :  { %4050 = vmatpush3.bf16.msra.mxu1 %v4425_v53  ;;  %v1980_v53 = vpack.c.bf16 %v5497_v9, %v1968_v8  ;;  %v5540_v8 = vld [vmem:[#allocation2 + $0x102] sm:$0xff] }
 0x486   :  { %4051 = vmatprep.subr.bf16.mxu1 %v4426_v58  ;;  %v2005_v58 = vpack.c.bf16 %v1995_v23, %v1994_v57 }
 0x487   :  { %3988 = vmatpush3.bf16.msra.mxu0 %v4418_v36  ;;  %v5506_v36 = vld [vmem:[#allocation2 + $0xc2] sm:$0xff] }
 0x488   :  { %3989 = vmatprep.subr.bf16.mxu0 %v4422_v13  ;;  %v1996_v13 = vld [vmem:[#allocation2 + $0xf0] sm:$0xff]  ;;  %v5514_v44 = vpack.c.bf16 %v5508_v39, %v5506_v36  ;;  %v2052_v22 = vpack.c.bf16 %v5506_v36, %v5497_v9 }
 0x489   :  { %4052 = vmatpush3.bf16.msra.mxu1 %v4427_v55  ;;  %2761 = vmatmul.mubr.bf16.gmra.mrb[92].mxu0 %v5488_v15  ;;  %v1997_v55 = vld [vmem:[#allocation2 + $0x100] sm:$0xff] }
 0x48a   :  { %4053 = vmatprep.subr.bf16.mxu1 %v4429_v25  ;;  %2768 = vmatprep.mubr.bf16.mxu0 %v1956_v34  ;;  %v5510_v25 = vpack.c.bf16 %v1994_v57, %v1993_v51  ;;  %v2006_v34 = vpack.c.bf16 %v1997_v55, %v1996_v13  ;;  %v5525_v51 = vld [vmem:[#allocation2 + $0xf2] sm:$0xff] }
 0x48b   :  { %2858 = vmatmul.mubr.bf16.gmra.mrb[80].mxu1 %v5492_v43  ;;  %3990 = vmatpush3.bf16.msra.mxu0 %v4424_v40  ;;  %v5518_v40 = vpack.c.bf16 %v5404_v26, %v5401_v20  ;;  %v5542_v57 = vld [vmem:[#allocation2 + $0x112] sm:$0xff] }
 0x48c   :  { %2865 = vmatprep.mubr.bf16.mxu1 %v2004_v45  ;;  %3991 = vmatprep.subr.bf16.mxu0 %v4428_v47  ;;  %v5523_v47 = vld [vmem:[#allocation2 + $0xe2] sm:$0xff] }
 0x48d   :  { %4054 = vmatpush3.bf16.msra.mxu1 %v4431_v48  ;;  %v1998_v48 = vld [vmem:[#allocation2 + $0x110] sm:$0xff]  ;;  %v5527_v45 = vld [vmem:[#allocation2 + $0x120] sm:$0xff]  ;;  %v5533_v26 = vpack.c.bf16 %v5525_v51, %v5523_v47 }
 0x48e   :  { %4055 = vmatprep.subr.bf16.mxu1 %v4432_v46  ;;  %v5529_v46 = vpack.c.bf16 %v1996_v13, %v1995_v23  ;;  %v5544_v23 = vpack.c.bf16 %v1998_v48, %v1997_v55  ;;  %v2079_v20 = vpack.c.bf16 %v5357_v59, %v5527_v45 }
 0x48f   :  { %3992 = vmatpush3.bf16.msra.mxu0 %v4430_v33  ;;  %v1959_v33 = vpack.c.bf16 %v5410_v56, %v5407_v27  ;;  %v2048_v27 = vpack.c.bf16 %v5447_v52, %v5438_v31  ;;  %v2049_v56 = vpack.c.bf16 %v5464_v63, %v5449_v1  ;;  %v4436_v31 = vld [vmem:[#allocation15 + $0x210] sm:$0xff]   ;;  %v4437_v52 = vld [vmem:[#allocation15 + $0x218] sm:$0xff]   ;;  %v2051_v1 = vpack.c.bf16 %v5569_v3, %v5486_v42  ;;  %v2095_v63 = vld [vmem:[#allocation2 + $0x131] sm:$0xff] }
 0x490   :  { %4193 = vmatprep.subr.bf16.mxu0 %v4434_v62 }
 0x491   :  { %4056 = vmatpush3.bf16.msra.mxu1 %v4433_v17  ;;  %2769 = vmatmul.mubr.bf16.gmra.mrb[96].mxu0 %v1932_v16  ;;  %v2007_v17 = vpack.c.bf16 %v5527_v45, %v1998_v48  ;;  %v5548_v16 = vpack.c.bf16 %v5542_v57, %v5540_v8 }
 0x492   :  { %4249 = vmatprep.subr.bf16.mxu1 %v4434_v62  ;;  %2776 = vmatprep.mubr.bf16.mxu0 %v5503_v54 }
 0x493   :  { %2866 = vmatmul.mubr.bf16.gmra.mrb[84].mxu1 %v1980_v53  ;;  %v4435_v53 = vld [vmem:[#allocation15 + $0x208] sm:$0xff]  }
 0x494   :  { %2873 = vmatprep.mubr.bf16.mxu1 %v2005_v58 }
 0x499   :  { %2777 = vmatmul.mubr.bf16.gmra.mrb[100].mxu0 %v5510_v25 }
 0x49a   :  { %2784 = vmatprep.mubr.bf16.mxu0 %v5518_v40 }
 0x49b   :  { %2874 = vmatmul.mubr.bf16.gmra.mrb[88].mxu1 %v5514_v44 }
 0x49c   :  { %2881 = vmatprep.mubr.bf16.mxu1 %v2006_v34 }
 0x4a1   :  { %2785 = vmatmul.mubr.bf16.gmra.mrb[104].mxu0 %v5529_v46 }
 0x4a2   :  { %2792 = vmatprep.mubr.bf16.mxu0 %v1959_v33 }
 0x4a3   :  { %2882 = vmatmul.mubr.bf16.gmra.mrb[92].mxu1 %v5533_v26 }
 0x4a4   :  { %2889 = vmatprep.mubr.bf16.mxu1 %v2007_v17 }
 0x4a9   :  { %2793 = vmatmul.mubr.bf16.gmra.mrb[108].mxu0 %v5544_v23 }
 0x4aa   :  { %2930 = vmatprep.mubr.bf16.mxu0 %v2048_v27 }
 0x4ab   :  { %2890 = vmatmul.mubr.bf16.gmra.mrb[96].mxu1 %v5548_v16 }
 0x4ac   :  { %3027 = vmatprep.mubr.bf16.mxu1 %v5444_v41  ;;  %v2050_v41 = vpack.c.bf16 %v5484_v2, %v5466_v6  ;;  %v2030_v6 = vpack.c.bf16 %v2092_v14, %v2020_v0  ;;  %v2111_v2 = vld [vmem:[#allocation2 + $0x92] sm:$0xff] }
 0x4ad   :  { %v2123_v42 = vpack.c.bf16 %v2111_v2, %v5569_v3 }
 0x4b1   :  { %2931 = vmatmul.mubr.bf16.vlgmr.msra.gmra.mrb[112].mxu0 %v2024_v60  ;;  %v2087_v60 = vld [vmem:[#allocation2 + $0x91] sm:$0xff] }
 0x4b2   :  { %2938 = vmatprep.mubr.bf16.mxu0 %v2049_v56  ;;  %4194 = vmatpush3.bf16.msra.mxu0 %v4434_v62  ;;  %v2099_v10 = vpack.c.bf16 %v2087_v60, %v5386_v49  ;;  %v2093_v49 = vld [vmem:[#allocation2 + $0x111] sm:$0xff] }
 0x4b3   :  { %3028 = vmatmul.mubr.bf16.vlgmr.msra.gmra.mrb[100].mxu1 %v5451_v5  ;;  %4195 = vmatprep.subr.bf16.mxu0 %v4435_v53  ;;  %v2075_v5 = vpack.c.bf16 %v5357_v59, %v5468_v24  ;;  %v2055_v24 = vpack.c.bf16 %v2047_v30, %v5542_v57 }
 0x4b4   :  { %3035 = vmatprep.mubr.bf16.mxu1 %v5459_v11  ;;  %4257 = vmatpush3.bf16.msra.mxu1 %v4434_v62  ;;  %v2102_v11 = vpack.c.bf16 %v2093_v49, %v2092_v14 }
 0x4b5   :  { %4250 = vmatprep.subr.bf16.mxu1 %v4435_v53 }
 0x4b6   :  { %4196 = vmatpush3.bf16.msra.mxu0 %v4435_v53 }
 0x4b7   :  { %4197 = vmatprep.subr.bf16.mxu0 %v4436_v31 }
 0x4b8   :  { %4258 = vmatpush3.bf16.msra.mxu1 %v4435_v53 }
 0x4b9   :  { %2939 = vmatmul.mubr.bf16.gmra.mrb[116].mxu0 %v2025_v12  ;;  %4251 = vmatprep.subr.bf16.mxu1 %v4436_v31  ;;  %v4440_v12 = vld [vmem:[#allocation15 + $0x230] sm:$0xff]  }
 0x4ba   :  { %2946 = vmatprep.mubr.bf16.mxu0 %v2050_v41  ;;  %4198 = vmatpush3.bf16.msra.mxu0 %v4436_v31 }
 0x4bb   :  { %3036 = vmatmul.mubr.bf16.gmra.mrb[104].mxu1 %v5470_v50  ;;  %4199 = vmatprep.subr.bf16.mxu0 %v4437_v52 }
 0x4bc   :  { %3043 = vmatprep.mubr.bf16.mxu1 %v5478_v21  ;;  %4259 = vmatpush3.bf16.msra.mxu1 %v4436_v31 }
 0x4bd   :  { %4252 = vmatprep.subr.bf16.mxu1 %v4437_v52 }
 0x4be   :  { %4200 = vmatpush3.bf16.msra.mxu0 %v4437_v52 }
 0x4bf   :  { %4201 = vmatprep.subr.bf16.mxu0 %v4438_v7 }
 0x4c0   :  { %4260 = vmatpush3.bf16.msra.mxu1 %v4437_v52 }
 0x4c1   :  { %2947 = vmatmul.mubr.bf16.gmra.mrb[120].mxu0 %v2026_v29  ;;  %4253 = vmatprep.subr.bf16.mxu1 %v4438_v7  ;;  %v2053_v29 = vpack.c.bf16 %v5523_v47, %v5508_v39 }
 0x4c2   :  { %2954 = vmatprep.mubr.bf16.mxu0 %v2051_v1  ;;  %4202 = vmatpush3.bf16.msra.mxu0 %v4438_v7 }
 0x4c3   :  { %3044 = vmatmul.mubr.bf16.gmra.mrb[108].mxu1 %v5488_v15  ;;  %4203 = vmatprep.subr.bf16.mxu0 %v4439_v61 }
 0x4c4   :  { %3051 = vmatprep.mubr.bf16.mxu1 %v2099_v10  ;;  %4261 = vmatpush3.bf16.msra.mxu1 %v4438_v7 }
 0x4c5   :  { %4254 = vmatprep.subr.bf16.mxu1 %v4439_v61 }
 0x4c6   :  { %4204 = vmatpush3.bf16.msra.mxu0 %v4439_v61 }
 0x4c7   :  { %4205 = vmatprep.subr.bf16.mxu0 %v4440_v12 }
 0x4c8   :  { %4262 = vmatpush3.bf16.msra.mxu1 %v4439_v61 }
 0x4c9   :  { %2955 = vmatmul.mubr.bf16.gmra.mrb[124].mxu0 %v2027_v28  ;;  %4255 = vmatprep.subr.bf16.mxu1 %v4440_v12  ;;  %v2054_v28 = vpack.c.bf16 %v5540_v8, %v5525_v51 }
 0x4ca   :  { %2962 = vmatprep.mubr.bf16.mxu0 %v2052_v22  ;;  %4206 = vmatpush3.bf16.msra.mxu0 %v4440_v12 }
 0x4cb   :  { %3052 = vmatmul.mubr.bf16.gmra.mrb[112].mxu1 %v2075_v5  ;;  %4207 = vmatprep.subr.bf16.mxu0 %v4441_v38 }
 0x4cc   :  { %3059 = vmatprep.mubr.bf16.mxu1 %v5503_v54  ;;  %4263 = vmatpush3.bf16.msra.mxu1 %v4440_v12 }
 0x4cd   :  { %4256 = vmatprep.subr.bf16.mxu1 %v4441_v38 }
 0x4ce   :  { %4208 = vmatpush3.bf16.msra.mxu0 %v4441_v38 }
 0x4d0   :  { %4264 = vmatpush3.bf16.msra.mxu1 %v4441_v38 }
 0x4d1   :  { %2963 = vmatmul.mubr.bf16.gmra.mrb[128].mxu0 %v2028_v32  ;;  %v2094_v32 = vld [vmem:[#allocation2 + $0x121] sm:$0xff] }
 0x4d2   :  { %2970 = vmatprep.mubr.bf16.mxu0 %v2053_v29  ;;  %v2103_v50 = vpack.c.bf16 %v2095_v63, %v2094_v32  ;;  %v2031_v19 = vpack.c.bf16 %v2094_v32, %v2093_v49 }
 0x4d3   :  { %3060 = vmatmul.mubr.bf16.gmra.mrb[116].mxu1 %v5510_v25 }
 0x4d4   :  { %3067 = vmatprep.mubr.bf16.mxu1 %v5518_v40 }
 0x4d9   :  { %2971 = vmatmul.mubr.bf16.gmra.mrb[132].mxu0 %v2029_v37  ;;  %v2119_v37 = vld [vmem:[#allocation2 + $0x132] sm:$0xff] }
 0x4da   :  { %2978 = vmatprep.mubr.bf16.mxu0 %v2054_v28  ;;  %v2127_v21 = vpack.c.bf16 %v2119_v37, %v2047_v30 }
 0x4db   :  { %3068 = vmatmul.mubr.bf16.gmra.mrb[120].mxu1 %v5529_v46 }
 0x4dc   :  { %3075 = vmatprep.mubr.bf16.mxu1 %v2102_v11 }
 0x4e1   :  { %2979 = vmatmul.mubr.bf16.gmra.mrb[136].mxu0 %v2030_v6 }
 0x4e2   :  { %2986 = vmatprep.mubr.bf16.mxu0 %v2055_v24 }
 0x4e3   :  { %3076 = vmatmul.mubr.bf16.gmra.mrb[124].mxu1 %v5544_v23 }
 0x4e4   :  { %3083 = vmatprep.mubr.bf16.mxu1 %v2103_v50 }
 0x4e9   :  { %2987 = vmatmul.mubr.bf16.gmra.mrb[140].mxu0 %v2031_v19 }
 0x4ea   :  { %4209 = vmatprep.mubr.bf16.mxu0 %v5455_v35 }
 0x4eb   :  { %3084 = vmatmul.mubr.bf16.gmra.mrb[128].mxu1 %v2079_v20 }
 0x4ec   :  { %4221 = vmatprep.mubr.bf16.mxu1 %v5548_v16 }
 0x4f1   :  { %4210 = vmatmul.mubr.bf16.vlgmr.msra.gmra.mrb[144].mxu0 %v5474_v4 }
 0x4f2   :  { %4213 = vmatprep.mubr.bf16.mxu0 %v5492_v43 }
 0x4f3   :  { %4222 = vmatmul.mubr.bf16.vlgmr.msra.gmra.mrb[132].mxu1 %v2127_v21 }
 0x4f9   :  { %4214 = vmatmul.mubr.bf16.gmra.mrb[148].mxu0 %v2123_v42 }
 0x4fa   :  { %4217 = vmatprep.mubr.bf16.mxu0 %v5514_v44 }
 0x501   :  { %4218 = vmatmul.mubr.bf16.gmra.mrb[152].mxu0 %v5533_v26 }
 0x544   :  { %v3865_v59 = vpop.f32.mrb[80].mxu0 }
 0x545   :  { %v3866_v35 = vpop.f32.mrb[81].mxu0 }
 0x546   :  { %v3929_v15 = vpop.f32.mrb[68].mxu1  ;;  %v3867_v62 = vadd.f32 %v3866_v35, %v3865_v59  ;;  %v3868_v54 = vpop.f32.mrb[82].mxu0 }
 0x547   :  { %v3930_v9 = vpop.f32.mrb[69].mxu1  ;;  %v3869_v4 = vpop.f32.mrb[83].mxu0 }
 0x548   :  { %v3931_v58 = vadd.f32 %v3930_v9, %v3929_v15  ;;  %v3932_v36 = vpop.f32.mrb[70].mxu1  ;;  %v3870_v39 = vadd.f32 %v3869_v4, %v3868_v54 }
 0x549   :  { %v3933_v13 = vpop.f32.mrb[71].mxu1 }
 0x54a   :  { %v5610_v43 = vadd.f32 %v3931_v58, %v3867_v62  ;;  %v3934_v55 = vadd.f32 %v3933_v13, %v3932_v36 }
 0x54c   :  { %v5612_v25 = vadd.f32 %v3934_v55, %v3870_v39  ;;  %v3871_v40 = vpop.f32.mrb[84].mxu0 }
 0x54d   :  { %v3872_v34 = vpop.f32.mrb[85].mxu0 }
 0x54e   :  { %v3935_v44 = vpop.f32.mrb[72].mxu1  ;;  %v3873_v47 = vadd.f32 %v3872_v34, %v3871_v40  ;;  %v3874_v48 = vpop.f32.mrb[86].mxu0 }
 0x54f   :  { %v3936_v51 = vpop.f32.mrb[73].mxu1  ;;  %v3875_v26 = vpop.f32.mrb[87].mxu0 }
 0x550   :  { %v3937_v45 = vadd.f32 %v3936_v51, %v3935_v44  ;;  %v3938_v46 = vpop.f32.mrb[74].mxu1  ;;  %v3876_v33 = vadd.f32 %v3875_v26, %v3874_v48 }
 0x551   :  { %v3939_v17 = vpop.f32.mrb[75].mxu1 }
 0x552   :  { %v5614_v8 = vadd.f32 %v3937_v45, %v3873_v47  ;;  %v3940_v57 = vadd.f32 %v3939_v17, %v3938_v46 }
 0x554   :  { %v5616_v23 = vadd.f32 %v3940_v57, %v3876_v33  ;;  %v3877_v16 = vpop.f32.mrb[88].mxu0 }
 0x555   :  { %v3878_v56 = vpop.f32.mrb[89].mxu0 }
 0x556   :  { %v3941_v27 = vpop.f32.mrb[76].mxu1  ;;  %v3879_v53 = vadd.f32 %v3878_v56, %v3877_v16  ;;  %v3880_v41 = vpop.f32.mrb[90].mxu0 }
 0x557   :  { %v3942_v31 = vpop.f32.mrb[77].mxu1  ;;  %v3881_v3 = vpop.f32.mrb[91].mxu0 }
 0x558   :  { %v3943_v52 = vadd.f32 %v3942_v31, %v3941_v27  ;;  %v3944_v7 = vpop.f32.mrb[78].mxu1  ;;  %v3882_v60 = vadd.f32 %v3881_v3, %v3880_v41 }
 0x559   :  { %v3945_v1 = vpop.f32.mrb[79].mxu1 }
 0x55a   :  { %v5618_v61 = vadd.f32 %v3943_v52, %v3879_v53  ;;  %v3946_v10 = vadd.f32 %v3945_v1, %v3944_v7 }
 0x55c   :  { %v5620_v12 = vadd.f32 %v3946_v10, %v3882_v60  ;;  %v3883_v5 = vpop.f32.mrb[92].mxu0 }
 0x55d   :  { %v3884_v38 = vpop.f32.mrb[93].mxu0 }
 0x55e   :  { %v3947_v22 = vpop.f32.mrb[80].mxu1  ;;  %v3885_v29 = vadd.f32 %v3884_v38, %v3883_v5  ;;  %v3886_v49 = vpop.f32.mrb[94].mxu0 }
 0x55f   :  { %v3948_v14 = vpop.f32.mrb[81].mxu1  ;;  %v3887_v0 = vpop.f32.mrb[95].mxu0 }
 0x560   :  { %v3949_v28 = vadd.f32 %v3948_v14, %v3947_v22  ;;  %v3950_v11 = vpop.f32.mrb[82].mxu1  ;;  %v3888_v30 = vadd.f32 %v3887_v0, %v3886_v49 }
 0x561   :  { %v3951_v32 = vpop.f32.mrb[83].mxu1 }
 0x562   :  { %v5622_v63 = vadd.f32 %v3949_v28, %v3885_v29  ;;  %v3952_v6 = vadd.f32 %v3951_v32, %v3950_v11 }
 0x564   :  { %v5624_v24 = vadd.f32 %v3952_v6, %v3888_v30  ;;  %v3889_v50 = vpop.f32.mrb[96].mxu0 }
 0x565   :  { %v3890_v20 = vpop.f32.mrb[97].mxu0 }
 0x566   :  { %v3953_v19 = vpop.f32.mrb[84].mxu1  ;;  %v3891_v37 = vadd.f32 %v3890_v20, %v3889_v50  ;;  %v3892_v2 = vpop.f32.mrb[98].mxu0 }
 0x567   :  { %v3954_v21 = vpop.f32.mrb[85].mxu1  ;;  %v3893_v15 = vpop.f32.mrb[99].mxu0 }
 0x568   :  { %v3955_v42 = vadd.f32 %v3954_v21, %v3953_v19  ;;  %v3956_v59 = vpop.f32.mrb[86].mxu1  ;;  %v3894_v35 = vadd.f32 %v3893_v15, %v3892_v2 }
 0x569   :  { %v3957_v62 = vpop.f32.mrb[87].mxu1 }
 0x56a   :  { %v5626_v9 = vadd.f32 %v3955_v42, %v3891_v37  ;;  %v3958_v54 = vadd.f32 %v3957_v62, %v3956_v59 }
 0x56c   :  { %v5628_v58 = vadd.f32 %v3958_v54, %v3894_v35  ;;  %v3895_v36 = vpop.f32.mrb[100].mxu0 }
 0x56d   :  { %v3896_v39 = vpop.f32.mrb[101].mxu0 }
 0x56e   :  { %v3959_v4 = vpop.f32.mrb[88].mxu1  ;;  %v3897_v13 = vadd.f32 %v3896_v39, %v3895_v36  ;;  %v3898_v40 = vpop.f32.mrb[102].mxu0 }
 0x56f   :  { %v3960_v55 = vpop.f32.mrb[89].mxu1  ;;  %v3899_v47 = vpop.f32.mrb[103].mxu0 }
 0x570   :  { %v3961_v44 = vadd.f32 %v3960_v55, %v3959_v4  ;;  %v3962_v34 = vpop.f32.mrb[90].mxu1  ;;  %v3900_v51 = vadd.f32 %v3899_v47, %v3898_v40 }
 0x571   :  { %v3963_v48 = vpop.f32.mrb[91].mxu1 }
 0x572   :  { %v5630_v45 = vadd.f32 %v3961_v44, %v3897_v13  ;;  %v3964_v46 = vadd.f32 %v3963_v48, %v3962_v34 }
 0x574   :  { %v5632_v26 = vadd.f32 %v3964_v46, %v3900_v51  ;;  %v3901_v33 = vpop.f32.mrb[104].mxu0 }
 0x575   :  { %v3902_v57 = vpop.f32.mrb[105].mxu0 }
 0x576   :  { %v3965_v17 = vpop.f32.mrb[92].mxu1  ;;  %v3903_v16 = vadd.f32 %v3902_v57, %v3901_v33  ;;  %v3904_v56 = vpop.f32.mrb[106].mxu0 }
 0x577   :  { %v3966_v27 = vpop.f32.mrb[93].mxu1  ;;  %v3905_v41 = vpop.f32.mrb[107].mxu0 }
 0x578   :  { %v3967_v53 = vadd.f32 %v3966_v27, %v3965_v17  ;;  %v3968_v31 = vpop.f32.mrb[94].mxu1  ;;  %v3906_v52 = vadd.f32 %v3905_v41, %v3904_v56 }
 0x579   :  { %v3969_v7 = vpop.f32.mrb[95].mxu1 }
 0x57a   :  { %v5634_v3 = vadd.f32 %v3967_v53, %v3903_v16  ;;  %v3970_v60 = vadd.f32 %v3969_v7, %v3968_v31 }
 0x57c   :  { %v5636_v1 = vadd.f32 %v3970_v60, %v3906_v52  ;;  %v3907_v10 = vpop.f32.mrb[108].mxu0 }
 0x57d   :  { %v3908_v22 = vpop.f32.mrb[109].mxu0 }
 0x57e   :  { %v3971_v5 = vpop.f32.mrb[96].mxu1  ;;  %v3909_v38 = vadd.f32 %v3908_v22, %v3907_v10  ;;  %v3910_v14 = vpop.f32.mrb[110].mxu0 }
 0x57f   :  { %v3972_v29 = vpop.f32.mrb[97].mxu1  ;;  %v3911_v11 = vpop.f32.mrb[111].mxu0 }
 0x580   :  { %v3973_v49 = vadd.f32 %v3972_v29, %v3971_v5  ;;  %v3974_v28 = vpop.f32.mrb[98].mxu1  ;;  %v3912_v0 = vadd.f32 %v3911_v11, %v3910_v14 }
 0x581   :  { %v3975_v30 = vpop.f32.mrb[99].mxu1 }
 0x582   :  { %v5638_v32 = vadd.f32 %v3973_v49, %v3909_v38  ;;  %v3976_v6 = vadd.f32 %v3975_v30, %v3974_v28 }
 0x584   :  { %v5640_v50 = vadd.f32 %v3976_v6, %v3912_v0  ;;  %v3993_v19 = vpop.f32.mrb[112].mxu0 }
 0x585   :  { %v3994_v37 = vpop.f32.mrb[113].mxu0 }
 0x586   :  { %v4057_v20 = vpop.f32.mrb[100].mxu1  ;;  %v3995_v21 = vadd.f32 %v3994_v37, %v3993_v19  ;;  %v3996_v42 = vpop.f32.mrb[114].mxu0 }
 0x587   :  { %v4058_v2 = vpop.f32.mrb[101].mxu1  ;;  %v3997_v35 = vpop.f32.mrb[115].mxu0 }
 0x588   :  { %v4059_v59 = vadd.f32 %v4058_v2, %v4057_v20  ;;  %v4060_v15 = vpop.f32.mrb[102].mxu1  ;;  %v2933_v62 = vadd.f32 %v3995_v21, %v5610_v43  ;;  %v3998_v54 = vadd.f32 %v3997_v35, %v3996_v42 }
 0x589   :  { %v4061_v36 = vpop.f32.mrb[103].mxu1 }
 0x58a   :  { %v4062_v4 = vadd.f32 %v4061_v36, %v4060_v15  ;;  %v2936_v39 = vadd.f32 %v3998_v54, %v5612_v25  ;;  %v5644_v13 = vadd.f32 %v4059_v59, %v2933_v62 }
 0x58c   :  { %v3999_v55 = vpop.f32.mrb[116].mxu0  ;;  %v5646_v40 = vadd.f32 %v4062_v4, %v2936_v39 }
 0x58d   :  { %v4000_v34 = vpop.f32.mrb[117].mxu0 }
 0x58e   :  { %v4063_v44 = vpop.f32.mrb[104].mxu1  ;;  %v4001_v47 = vadd.f32 %v4000_v34, %v3999_v55  ;;  %v4002_v48 = vpop.f32.mrb[118].mxu0 }
 0x58f   :  { %v4064_v51 = vpop.f32.mrb[105].mxu1  ;;  %v4003_v17 = vpop.f32.mrb[119].mxu0 }
 0x590   :  { %v4065_v46 = vadd.f32 %v4064_v51, %v4063_v44  ;;  %v4066_v33 = vpop.f32.mrb[106].mxu1  ;;  %v2941_v43 = vadd.f32 %v4001_v47, %v5614_v8  ;;  %v4004_v57 = vadd.f32 %v4003_v17, %v4002_v48 }
 0x591   :  { %v4067_v16 = vpop.f32.mrb[107].mxu1 }
 0x592   :  { %v4068_v27 = vadd.f32 %v4067_v16, %v4066_v33  ;;  %v2944_v25 = vadd.f32 %v4004_v57, %v5616_v23  ;;  %v5650_v56 = vadd.f32 %v4065_v46, %v2941_v43 }
 0x594   :  { %v4005_v53 = vpop.f32.mrb[120].mxu0  ;;  %v5652_v31 = vadd.f32 %v4068_v27, %v2944_v25 }
 0x595   :  { %v4006_v52 = vpop.f32.mrb[121].mxu0 }
 0x596   :  { %v4069_v41 = vpop.f32.mrb[108].mxu1  ;;  %v4007_v7 = vadd.f32 %v4006_v52, %v4005_v53  ;;  %v4008_v10 = vpop.f32.mrb[122].mxu0 }
 0x597   :  { %v4070_v60 = vpop.f32.mrb[109].mxu1  ;;  %v4009_v38 = vpop.f32.mrb[123].mxu0 }
 0x598   :  { %v4071_v5 = vadd.f32 %v4070_v60, %v4069_v41  ;;  %v4072_v22 = vpop.f32.mrb[110].mxu1  ;;  %v2949_v8 = vadd.f32 %v4007_v7, %v5618_v61  ;;  %v4010_v29 = vadd.f32 %v4009_v38, %v4008_v10 }
 0x599   :  { %v4073_v14 = vpop.f32.mrb[111].mxu1 }
 0x59a   :  { %v4074_v49 = vadd.f32 %v4073_v14, %v4072_v22  ;;  %v2952_v23 = vadd.f32 %v4010_v29, %v5620_v12  ;;  %v5656_v28 = vadd.f32 %v4071_v5, %v2949_v8 }
 0x59c   :  { %v4011_v11 = vpop.f32.mrb[124].mxu0  ;;  %v5658_v0 = vadd.f32 %v4074_v49, %v2952_v23 }
 0x59d   :  { %v4012_v6 = vpop.f32.mrb[125].mxu0 }
 0x59e   :  { %v4075_v30 = vpop.f32.mrb[112].mxu1  ;;  %v4013_v19 = vadd.f32 %v4012_v6, %v4011_v11  ;;  %v4014_v37 = vpop.f32.mrb[126].mxu0 }
 0x59f   :  { %v4076_v20 = vpop.f32.mrb[113].mxu1  ;;  %v4015_v42 = vpop.f32.mrb[127].mxu0 }
 0x5a0   :  { %v4077_v21 = vadd.f32 %v4076_v20, %v4075_v30  ;;  %v4078_v2 = vpop.f32.mrb[114].mxu1  ;;  %v2957_v61 = vadd.f32 %v4013_v19, %v5622_v63  ;;  %v4016_v59 = vadd.f32 %v4015_v42, %v4014_v37 }
 0x5a1   :  { %v4079_v15 = vpop.f32.mrb[115].mxu1 }
 0x5a2   :  { %v4080_v35 = vadd.f32 %v4079_v15, %v4078_v2  ;;  %v2960_v12 = vadd.f32 %v4016_v59, %v5624_v24  ;;  %v5662_v62 = vadd.f32 %v4077_v21, %v2957_v61 }
 0x5a4   :  { %v4017_v54 = vpop.f32.mrb[128].mxu0  ;;  %v5664_v36 = vadd.f32 %v4080_v35, %v2960_v12 }
 0x5a5   :  { %v4018_v39 = vpop.f32.mrb[129].mxu0 }
 0x5a6   :  { %v4081_v4 = vpop.f32.mrb[116].mxu1  ;;  %v4019_v55 = vadd.f32 %v4018_v39, %v4017_v54  ;;  %v4020_v34 = vpop.f32.mrb[130].mxu0 }
 0x5a7   :  { %v4082_v44 = vpop.f32.mrb[117].mxu1  ;;  %v4021_v48 = vpop.f32.mrb[131].mxu0 }
 0x5a8   :  { %v4083_v47 = vadd.f32 %v4082_v44, %v4081_v4  ;;  %v4084_v51 = vpop.f32.mrb[118].mxu1  ;;  %v2965_v63 = vadd.f32 %v4019_v55, %v5626_v9  ;;  %v4022_v46 = vadd.f32 %v4021_v48, %v4020_v34 }
 0x5a9   :  { %v4085_v33 = vpop.f32.mrb[119].mxu1 }
 0x5aa   :  { %v4086_v17 = vadd.f32 %v4085_v33, %v4084_v51  ;;  %v2968_v24 = vadd.f32 %v4022_v46, %v5628_v58  ;;  %v5668_v43 = vadd.f32 %v4083_v47, %v2965_v63 }
 0x5ac   :  { %v4023_v57 = vpop.f32.mrb[132].mxu0  ;;  %v5670_v16 = vadd.f32 %v4086_v17, %v2968_v24 }
 0x5ad   :  { %v4024_v25 = vpop.f32.mrb[133].mxu0 }
 0x5ae   :  { %v4087_v27 = vpop.f32.mrb[120].mxu1  ;;  %v4025_v53 = vadd.f32 %v4024_v25, %v4023_v57  ;;  %v4026_v52 = vpop.f32.mrb[134].mxu0 }
 0x5af   :  { %v4088_v41 = vpop.f32.mrb[121].mxu1  ;;  %v4027_v10 = vpop.f32.mrb[135].mxu0 }
 0x5b0   :  { %v4089_v7 = vadd.f32 %v4088_v41, %v4087_v27  ;;  %v4090_v60 = vpop.f32.mrb[122].mxu1  ;;  %v2973_v9 = vadd.f32 %v4025_v53, %v5630_v45  ;;  %v4028_v5 = vadd.f32 %v4027_v10, %v4026_v52 }
 0x5b1   :  { %v4091_v22 = vpop.f32.mrb[123].mxu1 }
 0x5b2   :  { %v4092_v38 = vadd.f32 %v4091_v22, %v4090_v60  ;;  %v2976_v58 = vadd.f32 %v4028_v5, %v5632_v26  ;;  %v5674_v8 = vadd.f32 %v4089_v7, %v2973_v9 }
 0x5b4   :  { %v4029_v29 = vpop.f32.mrb[136].mxu0  ;;  %v5676_v14 = vadd.f32 %v4092_v38, %v2976_v58 }
 0x5b5   :  { %v4030_v23 = vpop.f32.mrb[137].mxu0 }
 0x5b6   :  { %v4093_v49 = vpop.f32.mrb[124].mxu1  ;;  %v4031_v11 = vadd.f32 %v4030_v23, %v4029_v29  ;;  %v4032_v6 = vpop.f32.mrb[138].mxu0 }
 0x5b7   :  { %v4094_v30 = vpop.f32.mrb[125].mxu1  ;;  %v4033_v37 = vpop.f32.mrb[139].mxu0 }
 0x5b8   :  { %v4095_v19 = vadd.f32 %v4094_v30, %v4093_v49  ;;  %v4096_v20 = vpop.f32.mrb[126].mxu1  ;;  %v2981_v45 = vadd.f32 %v4031_v11, %v5634_v3  ;;  %v4034_v21 = vadd.f32 %v4033_v37, %v4032_v6 }
 0x5b9   :  { %v4097_v2 = vpop.f32.mrb[127].mxu1 }
 0x5ba   :  { %v4098_v42 = vadd.f32 %v4097_v2, %v4096_v20  ;;  %v2984_v26 = vadd.f32 %v4034_v21, %v5636_v1  ;;  %v3078_v61 = vadd.f32 %v4095_v19, %v2981_v45 }
 0x5bc   :  { %v4035_v59 = vpop.f32.mrb[140].mxu0  ;;  %v3081_v15 = vadd.f32 %v4098_v42, %v2984_v26 }
 0x5bd   :  { %v4036_v12 = vpop.f32.mrb[141].mxu0 }
 0x5be   :  { %v4099_v35 = vpop.f32.mrb[128].mxu1  ;;  %v4037_v54 = vadd.f32 %v4036_v12, %v4035_v59  ;;  %v4038_v39 = vpop.f32.mrb[142].mxu0 }
 0x5bf   :  { %v4100_v4 = vpop.f32.mrb[129].mxu1  ;;  %v4039_v34 = vpop.f32.mrb[143].mxu0 }
 0x5c0   :  { %v4101_v55 = vadd.f32 %v4100_v4, %v4099_v35  ;;  %v4102_v44 = vpop.f32.mrb[130].mxu1  ;;  %v2989_v47 = vadd.f32 %v4037_v54, %v5638_v32  ;;  %v4040_v51 = vadd.f32 %v4039_v34, %v4038_v39 }
 0x5c1   :  { %v4103_v3 = vpop.f32.mrb[131].mxu1 }
 0x5c2   :  { %v4104_v48 = vadd.f32 %v4103_v3, %v4102_v44  ;;  %v2992_v63 = vadd.f32 %v4040_v51, %v5640_v50  ;;  %v3086_v46 = vadd.f32 %v4101_v55, %v2989_v47 }
 0x5c4   :  { %v4211_v1 = vpop.f32.mrb[144].mxu0  ;;  %v3089_v33 = vadd.f32 %v4104_v48, %v2992_v63 }
 0x5c5   :  { %v5683_v17 = vadd.f32 %v4211_v1, %v5650_v56  ;;  %v3126_v57 = vpop.f32.mrb[145].mxu0 }
 0x5c6   :  { %v4223_v24 = vpop.f32.mrb[132].mxu1  ;;  %v5688_v25 = vadd.f32 %v3126_v57, %v5644_v13  ;;  %v4212_v32 = vpop.f32.mrb[146].mxu0 }
 0x5c7   :  { %v5685_v27 = vadd.f32 %v4223_v24, %v3086_v46  ;;  %v3174_v53 = vpop.f32.mrb[133].mxu1  ;;  %v5693_v52 = vadd.f32 %v4212_v32, %v5652_v31  ;;  %v3129_v7 = vpop.f32.mrb[147].mxu0  ;;  %v3214_v22 = vmul.f32 %v5683_v17, %v5683_v17 }
 0x5c8   :  { %v5690_v41 = vadd.f32 %v3174_v53, %v3078_v61  ;;  %v4224_v50 = vpop.f32.mrb[134].mxu1  ;;  %v5698_v56 = vadd.f32 %v3129_v7, %v5646_v40  ;;  %v3212_v13 = vmul.f32 %v5688_v25, %v5688_v25 }
 0x5c9   :  { %v5695_v60 = vadd.f32 %v4224_v50, %v3089_v33  ;;  %v3177_v10 = vpop.f32.mrb[135].mxu1  ;;  %v3215_v23 = vmul.f32 %v5693_v52, %v5693_v52 }
 0x5ca   :  { %v5700_v9 = vadd.f32 %v3177_v10, %v3081_v15  ;;  %v3191_v5 = vadd.f32 %v5698_v56, %v5688_v25  ;;  %v3213_v31 = vmul.f32 %v5698_v56, %v5698_v56  ;;  %v3224_v53 = vmul.f32 %v5690_v41, %v5690_v41 }
 0x5cc   :  { %v3192_v38 = vadd.f32 %v3191_v5, %v5683_v17  ;;  %v3228_v58 = vadd.f32 %v3213_v31, %v3212_v13  ;;  %v4215_v40 = vpop.f32.mrb[148].mxu0  ;;  %v3225_v50 = vmul.f32 %v5700_v9, %v5700_v9  ;;  %v3226_v13 = vmul.f32 %v5685_v27, %v5685_v27 }
 0x5cd   :  { %v5712_v29 = vadd.f32 %v4215_v40, %v5662_v62  ;;  %v3142_v49 = vpop.f32.mrb[149].mxu0 }
 0x5ce   :  { %v3229_v11 = vadd.f32 %v3228_v58, %v3214_v22  ;;  %v5717_v30 = vadd.f32 %v3142_v49, %v5656_v28  ;;  %v3193_v6 = vadd.f32 %v3192_v38, %v5693_v52  ;;  %v4216_v19 = vpop.f32.mrb[150].mxu0  ;;  %v3227_v22 = vmul.f32 %v5695_v60, %v5695_v60 }
 0x5cf   :  { %v5721_v20 = vadd.f32 %v4216_v19, %v5664_v36  ;;  %v3145_v37 = vpop.f32.mrb[151].mxu0  ;;  %v3218_v36 = vmul.f32 %v5712_v29, %v5712_v29 }
 0x5d0   :  { %v3194_v45 = vadd.f32 %v3193_v6, %v5717_v30  ;;  %v3216_v62 = vmul.f32 %v5717_v30, %v5717_v30  ;;  %v3230_v21 = vadd.f32 %v3229_v11, %v3215_v23  ;;  %v5727_v2 = vadd.f32 %v3145_v37, %v5658_v0 }
 0x5d1   :  { %v3219_v0 = vmul.f32 %v5721_v20, %v5721_v20 }
 0x5d2   :  { %v3231_v42 = vadd.f32 %v3230_v21, %v3216_v62  ;;  %v3195_v28 = vadd.f32 %v3194_v45, %v5727_v2  ;;  %v3217_v26 = vmul.f32 %v5727_v2, %v5727_v2 }
 0x5d4   :  { %v3196_v61 = vadd.f32 %v3195_v28, %v5712_v29  ;;  %v3232_v59 = vadd.f32 %v3231_v42, %v3217_v26  ;;  %v4219_v15 = vpop.f32.mrb[152].mxu0 }
 0x5d5   :  { %v5736_v35 = vadd.f32 %v4219_v15, %v5674_v8  ;;  %v3158_v12 = vpop.f32.mrb[153].mxu0 }
 0x5d6   :  { %v3233_v54 = vadd.f32 %v3232_v59, %v3218_v36  ;;  %v5741_v4 = vadd.f32 %v3158_v12, %v5668_v43  ;;  %v3197_v39 = vadd.f32 %v3196_v61, %v5721_v20  ;;  %v4220_v55 = vpop.f32.mrb[154].mxu0 }
 0x5d7   :  { %v5745_v44 = vadd.f32 %v4220_v55, %v5676_v14  ;;  %v3161_v34 = vpop.f32.mrb[155].mxu0  ;;  %v3222_v43 = vmul.f32 %v5736_v35, %v5736_v35 }
 0x5d8   :  { %v3198_v47 = vadd.f32 %v3197_v39, %v5741_v4  ;;  %v3220_v8 = vmul.f32 %v5741_v4, %v5741_v4  ;;  %v3234_v51 = vadd.f32 %v3233_v54, %v3219_v0  ;;  %v3162_v3 = vadd.f32 %v3161_v34, %v5670_v16  ;;  %v3189_v54 = vld [vmem:[#allocation17] sm:$0x1]  ;;  %v3190_v34 = vld [vmem:[#allocation18] sm:$0x1] }
 0x5d9   :  { %v3223_v14 = vmul.f32 %v5745_v44, %v5745_v44 }
 0x5da   :  { %v3235_v48 = vadd.f32 %v3234_v51, %v3220_v8  ;;  %v3199_v63 = vadd.f32 %v3198_v47, %v3162_v3  ;;  %v3221_v46 = vmul.f32 %v3162_v3, %v3162_v3 }
 0x5dc   :  { %v3200_v1 = vadd.f32 %v3199_v63, %v5736_v35  ;;  %v3236_v33 = vadd.f32 %v3235_v48, %v3221_v46 }
 0x5de   :  { %v3201_v24 = vadd.f32 %v3200_v1, %v5745_v44  ;;  %v3237_v57 = vadd.f32 %v3236_v33, %v3222_v43 }
 0x5e0   :  { %v3202_v16 = vadd.f32 %v3201_v24, %v5690_v41  ;;  %v3238_v32 = vadd.f32 %v3237_v57, %v3223_v14 }
 0x5e2   :  { %v3203_v7 = vadd.f32 %v3202_v16, %v5700_v9  ;;  %v3239_v10 = vadd.f32 %v3238_v32, %v3224_v53  ;;  %v3312_v16 = vld [vmem:[#allocation6 + $0x48] sm:$0xff] }
 0x5e4   :  { %v3204_v5 = vadd.f32 %v3203_v7, %v5685_v27  ;;  %v3240_v31 = vadd.f32 %v3239_v10, %v3225_v50  ;;  %v3304_v10 = vld [vmem:[#allocation6 + $0x8] sm:$0xff] }
 0x5e6   :  { %v3205_v38 = vadd.f32 %v3204_v5, %v5695_v60  ;;  %v3241_v58 = vadd.f32 %v3240_v31, %v3226_v13  ;;  %v3305_v13 = vld [vmem:[#allocation6 + $0x10] sm:$0xff] }
 0x5e8   :  { %v3206_v40 = vrot.slane %v3205_v38, 4  ;;  %v3242_v49 = vadd.f32 %v3241_v58, %v3227_v22  ;;  %v3307_v22 = vld [vmem:[#allocation6 + $0x20] sm:$0xff] }
 0x5ea   :  { %v3207_v23 = vadd.f32 %v3206_v40, %v3205_v38  ;;  %v3243_v11 = vrot.slane %v3242_v49, 4  ;;  %v3309_v38 = vld [vmem:[#allocation6 + $0x30] sm:$0xff] }
 0x5ec   :  { %v3208_v6 = vrot.slane %v3207_v23, 2  ;;  %v3244_v19 = vadd.f32 %v3243_v11, %v3242_v49  ;;  %v3310_v49 = vld [vmem:[#allocation6 + $0x38] sm:$0xff]  ;;  %v3313_v11 = vld [vmem:[#allocation6 + $0x50] sm:$0xff] }
 0x5ee   :  { %v3209_v37 = vadd.f32 %v3208_v6, %v3207_v23  ;;  %v3245_v45 = vrot.slane %v3244_v19, 2  ;;  %v3311_v23 = vld [vmem:[#allocation6 + $0x40] sm:$0xff] }
 0x5f0   :  { %v3210_v62 = vrot.slane %v3209_v37, 1  ;;  %v3246_v21 = vadd.f32 %v3245_v45, %v3244_v19  ;;  %v3314_v45 = vld [vmem:[#allocation6 + $0x58] sm:$0xff] }
 0x5f2   :  { %v3211_v42 = vadd.f32 %v3210_v62, %v3209_v37  ;;  %v3247_v28 = vrot.slane %v3246_v21, 1  ;;  %v3315_v62 = vld [vmem:[#allocation6 + $0x60] sm:$0xff] }
 0x5f4   :  { %v3248_v26 = vadd.f32 %v3247_v28, %v3246_v21  ;;  %v3249_v36 = vmul.f32 0.0078125, %v3211_v42  ;;  %v3316_v21 = vld [vmem:[#allocation6 + $0x68] sm:$0xff]  ;;  %v3317_v28 = vld [vmem:[#allocation6 + $0x70] sm:$0xff] }
 0x5f6   :  { %v3250_v61 = vmul.f32 0.0078125, %v3248_v26  ;;  %v3251_v59 = vmul.f32 %v3249_v36, %v3249_v36  ;;  %v3318_v26 = vld [vmem:[#allocation6 + $0x78] sm:$0xff] }
 0x5f8   :  { %v3252_v15 = vsub.f32 %v3250_v61, %v3251_v59 }
 0x5fa   :  { %v3253_v12 = vmax.f32 %v3252_v15, 0.0 }
 0x5fc   :  { %v3254_v0 = vadd.f32 1e-05, %v3253_v12 }
 0x5fe   :  { %4448 = vrsqrt.f32 %v3254_v0 }
 0x608   :  { %v4449_v39 = vpop.eup %4448 }
 0x609   :  { %v3256_v55 = vmul.f32 %v4449_v39, %v3189_v54 }
 0x60b   :  { %v3257_v47 = vmul.f32 %v3256_v55, %v3249_v36  ;;  %v3263_v8 = vrot.slane %v3256_v55, %v5294_v18 }
 0x60d   :  { %v3258_v51 = vsub.f32 %v3190_v34, %v3257_v47  ;;  %v3274_v48 = vmul.f32 %v3263_v8, %v3162_v3  ;;  %v3265_v63 = vmul.f32 %v3263_v8, %v5688_v25  ;;  %v3266_v46 = vmul.f32 %v3263_v8, %v5698_v56 }
 0x60e   :  { %v3267_v43 = vmul.f32 %v3263_v8, %v5683_v17  ;;  %v3268_v1 = vmul.f32 %v3263_v8, %v5693_v52  ;;  %v3269_v33 = vmul.f32 %v3263_v8, %v5717_v30  ;;  %v3270_v14 = vmul.f32 %v3263_v8, %v5727_v2 }
 0x60f   :  { %v3285_v24 = vrot.slane %v3258_v51, %v5294_v18  ;;  %v3271_v57 = vmul.f32 %v3263_v8, %v5712_v29  ;;  %v3272_v53 = vmul.f32 %v3263_v8, %v5721_v20  ;;  %v3273_v3 = vmul.f32 %v3263_v8, %v5741_v4  ;;  %v3303_v29 = vld [vmem:[#allocation6] sm:$0xff] }
 0x610   :  { %v3275_v25 = vmul.f32 %v3263_v8, %v5736_v35  ;;  %v3276_v56 = vmul.f32 %v3263_v8, %v5745_v44  ;;  %v3277_v17 = vmul.f32 %v3263_v8, %v5690_v41  ;;  %v3278_v52 = vmul.f32 %v3263_v8, %v5700_v9  ;;  %v3306_v35 = vld [vmem:[#allocation6 + $0x18] sm:$0xff]  ;;  %v3308_v9 = vld [vmem:[#allocation6 + $0x28] sm:$0xff] }
 0x611   :  { %v3296_v30 = vadd.f32 %v3285_v24, %v3274_v48  ;;  %v3279_v2 = vmul.f32 %v3263_v8, %v5685_v27  ;;  %v3280_v18 = vmul.f32 %v3263_v8, %v5695_v60  ;;  %v3287_v32 = vadd.f32 %v3285_v24, %v3265_v63 }
 0x612   :  { %v3288_v50 = vadd.f32 %v3285_v24, %v3266_v46  ;;  %v3289_v20 = vadd.f32 %v3285_v24, %v3267_v43  ;;  %v3290_v7 = vadd.f32 %v3285_v24, %v3268_v1  ;;  %v3291_v4 = vadd.f32 %v3285_v24, %v3269_v33 }
 0x613   :  { %v3328_v5 = vadd.f32 %v3312_v16, %v3296_v30  ;;  %v3292_v44 = vadd.f32 %v3285_v24, %v3270_v14  ;;  %v3293_v31 = vadd.f32 %v3285_v24, %v3271_v57  ;;  %v3294_v41 = vadd.f32 %v3285_v24, %v3272_v53 }
 0x614   :  { %v3295_v58 = vadd.f32 %v3285_v24, %v3273_v3  ;;  %v3297_v27 = vadd.f32 %v3285_v24, %v3275_v25  ;;  %v3298_v40 = vadd.f32 %v3285_v24, %v3276_v56  ;;  %v3299_v60 = vadd.f32 %v3285_v24, %v3277_v17 }
 0x615   :  { %3344 = vst [vmem:[#allocation20 + $0x48] sm:$0xff] %v3328_v5  ;;  %v3300_v6 = vadd.f32 %v3285_v24, %v3278_v52  ;;  %v3301_v19 = vadd.f32 %v3285_v24, %v3279_v2  ;;  %v3302_v37 = vadd.f32 %v3285_v24, %v3280_v18  ;;  %v3319_v42 = vadd.f32 %v3303_v29, %v3287_v32 }
 0x616   :  { %v3320_v36 = vadd.f32 %v3304_v10, %v3288_v50  ;;  %v3321_v61 = vadd.f32 %v3305_v13, %v3289_v20  ;;  %v3322_v59 = vadd.f32 %v3306_v35, %v3290_v7  ;;  %v3323_v15 = vadd.f32 %v3307_v22, %v3291_v4 }
 0x617   :  { %v3324_v12 = vadd.f32 %v3308_v9, %v3292_v44  ;;  %v3325_v0 = vadd.f32 %v3309_v38, %v3293_v31  ;;  %v3326_v54 = vadd.f32 %v3310_v49, %v3294_v41  ;;  %v3327_v39 = vadd.f32 %v3311_v23, %v3295_v58  ;;  %3335 = vst [vmem:[#allocation20] sm:$0xff] %v3319_v42 }
 0x618   :  { %v3329_v55 = vadd.f32 %v3313_v11, %v3297_v27  ;;  %v3330_v34 = vadd.f32 %v3314_v45, %v3298_v40  ;;  %v3331_v47 = vadd.f32 %v3315_v62, %v3299_v60  ;;  %v3332_v8 = vadd.f32 %v3316_v21, %v3300_v6  ;;  %3336 = vst [vmem:[#allocation20 + $0x8] sm:$0xff] %v3320_v36 }
 0x619   :  { %3337 = vst [vmem:[#allocation20 + $0x10] sm:$0xff] %v3321_v61  ;;  %3338 = vst [vmem:[#allocation20 + $0x18] sm:$0xff] %v3322_v59  ;;  %v3333_v51 = vadd.f32 %v3317_v28, %v3301_v19  ;;  %v3334_v48 = vadd.f32 %v3318_v26, %v3302_v37 }
 0x61a   :  { %3339 = vst [vmem:[#allocation20 + $0x20] sm:$0xff] %v3323_v15  ;;  %3340 = vst [vmem:[#allocation20 + $0x28] sm:$0xff] %v3324_v12 }
 0x61b   :  { %3341 = vst [vmem:[#allocation20 + $0x30] sm:$0xff] %v3325_v0  ;;  %3342 = vst [vmem:[#allocation20 + $0x38] sm:$0xff] %v3326_v54 }
 0x61c   :  { %3343 = vst [vmem:[#allocation20 + $0x40] sm:$0xff] %v3327_v39  ;;  %3345 = vst [vmem:[#allocation20 + $0x50] sm:$0xff] %v3329_v55 }
 0x61d   :  { %3346 = vst [vmem:[#allocation20 + $0x58] sm:$0xff] %v3330_v34  ;;  %3347 = vst [vmem:[#allocation20 + $0x60] sm:$0xff] %v3331_v47 }
 0x61e   :  { %3348 = vst [vmem:[#allocation20 + $0x68] sm:$0xff] %v3332_v8  ;;  %3349 = vst [vmem:[#allocation20 + $0x70] sm:$0xff] %v3333_v51 }
 0x61f   :  { %3350 = vst [vmem:[#allocation20 + $0x78] sm:$0xff] %v3334_v48 }
 0x620   :  { %4683 = shalt.err (!%p4680_p0)
}
 0x621   :  { %s4684_s28 = scalar_lea.hbm %s5811_s10, 2048 }
 0x622   :  { %p4685_p1 = scmp.ne.s32.totalorder %s5811_s10, %s4684_s28  ;;  %p4688_p2 = scmp.lt.u32.totalorder %s4684_s28, %s5811_s10 }
 0x624   :  { %p4690_p3 = pnand %p4688_p2, %p4685_p1 }
 0x626   :  { %4693 = shalt.err (!%p4690_p3)
}
 0x627   :  { %3362 = dma.vmem_to_hbm [thread:$0]  %s3357_s4, 2048, %s5811_s10, [#allocation5], %s4709_s23, %s4709_s23, %s4710_s24  }
 0x628   :  { %4706 = dma.done.wait [#allocation5], 2048  }
 0x629   :  { %4707 = vsyncadd [#allocation5], 4294965248 }
 0x62a   :  { %3366 = vsyncpa [#allocation4], 1 }
 0x62b   :  { %3367 = vsyncpa [#allocation7], 1 }
 0x62c   :  { %3368 = vsyncpa [#allocation10], 1 }
 0x62d   :  { %3369 = vsyncpa [#allocation13], 1 }
 0x62e   :  { %3370 = vsyncpa [#allocation16], 1 }
 0x62f   :  { %3371 = vsyncpa [#allocation19], 1 }
 0x630   :  { %3372 = vsyncpa [#allocation5], 1 }

</bundles_post_ra>
